<compile_context>
chip_gen: v6e
topology: v6e:2x2x1
jax: 0.10.0
libtpu: 0.0.40
codegen_flags: <defaults>
</compile_context>

<pallas_src>
import functools
import math

import jax
import jax.numpy as jnp
from jax import lax
from jax.experimental import pallas as pl
from jax.experimental.pallas import tpu as pltpu

# Hyper-parameters from the PyTorch script
D_MODEL = 64
NHEAD = 4
NUM_LAYERS = 3
DIM_FF = 256
HEAD_DIM = D_MODEL // NHEAD
LN_EPS = 1e-5
ATTN_SCALE = 1.0 / math.sqrt(HEAD_DIM)


# ------------------------------ fused kernel -------------------------------

def _layernorm(h, g, b):
    mu = jnp.mean(h, axis=-1, keepdims=True)
    var = jnp.mean(jnp.square(h - mu), axis=-1, keepdims=True)
    return (h - mu) * lax.rsqrt(var + LN_EPS) * g + b


def _fused_encoder_kernel(
    x_ref,
    qw_ref, qb_ref, kw_ref, kb_ref, vw_ref, vb_ref,
    ow_ref, ob_ref,
    ff1w_ref, ff1b_ref, ff2w_ref, ff2b_ref,
    ln1g_ref, ln1b_ref, ln2g_ref, ln2b_ref,
    outw_ref, outb_ref,
    o_ref,
    *, batch, seq):
    """Whole 3-layer encoder + final linear.  x rows ordered (batch, seq)."""
    x = x_ref[...]                                            # (B*S, E)

    for l in range(NUM_LAYERS):
        # ---- per-token Q / K / V projections (one MXU matmul each) ----
        q = jnp.dot(x, qw_ref[l], preferred_element_type=jnp.float32) + qb_ref[l]
        k = jnp.dot(x, kw_ref[l], preferred_element_type=jnp.float32) + kb_ref[l]
        v = jnp.dot(x, vw_ref[l], preferred_element_type=jnp.float32) + vb_ref[l]

        # ---- multi-head self-attention, unrolled over (batch, head) ----
        batch_rows = []
        for b in range(batch):
            r0 = b * seq
            head_outs = []
            for h in range(NHEAD):
                c0 = h * HEAD_DIM
                qh = q[r0:r0 + seq, c0:c0 + HEAD_DIM]         # (S, Dh)
                kh = k[r0:r0 + seq, c0:c0 + HEAD_DIM]
                vh = v[r0:r0 + seq, c0:c0 + HEAD_DIM]
                s = lax.dot_general(                          # q @ k^T  -> (S, S)
                    qh, kh, (((1,), (1,)), ((), ())),
                    preferred_element_type=jnp.float32) * ATTN_SCALE
                m = jnp.max(s, axis=-1, keepdims=True)
                p = jnp.exp(s - m)
                p = p * pl.reciprocal(jnp.sum(p, axis=-1, keepdims=True))
                head_outs.append(
                    jnp.dot(p, vh, preferred_element_type=jnp.float32))   # (S, Dh)
            batch_rows.append(jnp.concatenate(head_outs, axis=-1))        # (S, E)
        attn = jnp.concatenate(batch_rows, axis=0)                        # (B*S, E)

        attn = jnp.dot(attn, ow_ref[l],
                       preferred_element_type=jnp.float32) + ob_ref[l]
        x = _layernorm(x + attn, ln1g_ref[l], ln1b_ref[l])    # dropout = identity

        # ---- feed-forward ----
        f = jnp.dot(x, ff1w_ref[l], preferred_element_type=jnp.float32) + ff1b_ref[l]
        f = jnp.maximum(f, 0.0)
        f = jnp.dot(f, ff2w_ref[l], preferred_element_type=jnp.float32) + ff2b_ref[l]
        x = _layernorm(x + f, ln2g_ref[l], ln2b_ref[l])

    # ---- output[-1] (last sequence position of every batch) + final linear ----
    last = jnp.concatenate(
        [x[(b + 1) * seq - 1:(b + 1) * seq, :] for b in range(batch)], axis=0)  # (B, E)
    o_ref[...] = jnp.dot(last, outw_ref[...],
                         preferred_element_type=jnp.float32) + outb_ref[...]


# --------------------------------- wrapper ----------------------------------

def encoder_forward(src, params):
    """src: (B, S, d_model) -> (B, 1), matching the PyTorch module."""
    B, S, E = src.shape
    x = src.reshape(B * S, E).astype(jnp.float32)             # batch-major tokens

    weight_args = (
        params["qw"], params["qb"], params["kw"], params["kb"],
        params["vw"], params["vb"], params["ow"], params["ob"],
        params["ff1w"], params["ff1b"], params["ff2w"], params["ff2b"],
        params["ln1g"], params["ln1b"], params["ln2g"], params["ln2b"],
        params["outw"], params["outb"],
    )

    def full(shape):
        return pl.BlockSpec(shape, lambda i, _s=shape: (0,) * len(_s))

    in_specs = [full(x.shape)] + [full(w.shape) for w in weight_args]

    return pl.pallas_call(
        functools.partial(_fused_encoder_kernel, batch=B, seq=S),
        out_shape=jax.ShapeDtypeStruct((B, 1), jnp.float32),
        grid=(1,),
        in_specs=in_specs,
        out_specs=full((B, 1)),
        compiler_params=pltpu.CompilerParams(
            dimension_semantics=("arbitrary",),
            vmem_limit_bytes=16 * 1024 * 1024),
    )(x, *weight_args)


# ------------------------------- parameters --------------------------------

def init_params(key):
    def u(k, shape, fan_in):
        bound = 1.0 / math.sqrt(fan_in)
        return jax.random.uniform(k, shape, jnp.float32, -bound, bound)

    L = NUM_LAYERS
    ks = jax.random.split(key, 14)
    return dict(
        qw=u(ks[0], (L, D_MODEL, D_MODEL), D_MODEL),
        qb=u(ks[1], (L, 1, D_MODEL), D_MODEL),
        kw=u(ks[2], (L, D_MODEL, D_MODEL), D_MODEL),
        kb=u(ks[3], (L, 1, D_MODEL), D_MODEL),
        vw=u(ks[4], (L, D_MODEL, D_MODEL), D_MODEL),
        vb=u(ks[5], (L, 1, D_MODEL), D_MODEL),
        ow=u(ks[6], (L, D_MODEL, D_MODEL), D_MODEL),
        ob=u(ks[7], (L, 1, D_MODEL), D_MODEL),
        ff1w=u(ks[8], (L, D_MODEL, DIM_FF), D_MODEL),
        ff1b=u(ks[9], (L, 1, DIM_FF), D_MODEL),
        ff2w=u(ks[10], (L, DIM_FF, D_MODEL), DIM_FF),
        ff2b=u(ks[11], (L, 1, D_MODEL), DIM_FF),
        ln1g=jnp.ones((L, 1, D_MODEL), jnp.float32),
        ln1b=jnp.zeros((L, 1, D_MODEL), jnp.float32),
        ln2g=jnp.ones((L, 1, D_MODEL), jnp.float32),
        ln2b=jnp.zeros((L, 1, D_MODEL), jnp.float32),
        outw=u(ks[12], (D_MODEL, 1), D_MODEL),
        outb=u(ks[13], (1, 1), D_MODEL),
    )


# ------------------------- pure-JAX reference check -------------------------

def reference_forward(src, params):
    B, S, E = src.shape
    x = src.astype(jnp.float32)                               # (B, S, E)
    for l in range(NUM_LAYERS):
        q = x @ params["qw"][l] + params["qb"][l]
        k = x @ params["kw"][l] + params["kb"][l]
        v = x @ params["vw"][l] + params["vb"][l]

        def heads(t):
            return jnp.transpose(t.reshape(B, S, NHEAD, HEAD_DIM), (0, 2, 1, 3))

        qh, kh, vh = heads(q), heads(k), heads(v)
        s = jnp.einsum("bhqd,bhkd->bhqk", qh, kh) * ATTN_SCALE
        a = jax.nn.softmax(s, axis=-1)
        o = jnp.einsum("bhqk,bhkd->bhqd", a, vh)
        o = jnp.transpose(o, (0, 2, 1, 3)).reshape(B, S, E)
        o = o @ params["ow"][l] + params["ob"][l]

        h = x + o
        h = (h - h.mean(-1, keepdims=True)) / jnp.sqrt(
            h.var(-1, keepdims=True) + LN_EPS) * params["ln1g"][l] + params["ln1b"][l]

        f = jnp.maximum(h @ params["ff1w"][l] + params["ff1b"][l], 0.0)
        f = f @ params["ff2w"][l] + params["ff2b"][l]
        g = h + f
        x = (g - g.mean(-1, keepdims=True)) / jnp.sqrt(
            g.var(-1, keepdims=True) + LN_EPS) * params["ln2g"][l] + params["ln2b"][l]

    last = x[:, -1, :]                                        # == output[-1] in (S,B,E)
    return last @ params["outw"] + params["outb"]


# ----------------------------------- main -----------------------------------

if __name__ == "__main__":
    key = jax.random.PRNGKey(0)
    pkey, xkey = jax.random.split(key)
    params = init_params(pkey)

    B, S = 2, 8
    src = jax.random.normal(xkey, (B, S, D_MODEL), jnp.float32)

    out = encoder_forward(src, params)
    out = jax.block_until_ready(out)

    with jax.default_matmul_precision("highest"):
        ref = jax.block_until_ready(reference_forward(src, params))

    assert out.shape == (B, 1), out.shape
    assert jnp.allclose(out, ref, atol=2e-4, rtol=2e-4), (out, ref)
    print("KERNEL_OK")
</pallas_src>

<mosaic_0001>
module attributes {stable_mosaic.version = 11 : i64} {
  func.func @_fused_encoder_kernel(%arg0: i32, %arg1: memref<16x64xf32, #tpu.memory_space<vmem>>, %arg2: memref<3x64x64xf32, #tpu.memory_space<vmem>>, %arg3: memref<3x1x64xf32, #tpu.memory_space<vmem>>, %arg4: memref<3x64x64xf32, #tpu.memory_space<vmem>>, %arg5: memref<3x1x64xf32, #tpu.memory_space<vmem>>, %arg6: memref<3x64x64xf32, #tpu.memory_space<vmem>>, %arg7: memref<3x1x64xf32, #tpu.memory_space<vmem>>, %arg8: memref<3x64x64xf32, #tpu.memory_space<vmem>>, %arg9: memref<3x1x64xf32, #tpu.memory_space<vmem>>, %arg10: memref<3x64x256xf32, #tpu.memory_space<vmem>>, %arg11: memref<3x1x256xf32, #tpu.memory_space<vmem>>, %arg12: memref<3x256x64xf32, #tpu.memory_space<vmem>>, %arg13: memref<3x1x64xf32, #tpu.memory_space<vmem>>, %arg14: memref<3x1x64xf32, #tpu.memory_space<vmem>>, %arg15: memref<3x1x64xf32, #tpu.memory_space<vmem>>, %arg16: memref<3x1x64xf32, #tpu.memory_space<vmem>>, %arg17: memref<3x1x64xf32, #tpu.memory_space<vmem>>, %arg18: memref<64x1xf32, #tpu.memory_space<vmem>>, %arg19: memref<1x1xf32, #tpu.memory_space<vmem>>, %arg20: memref<2x1xf32, #tpu.memory_space<vmem>>) attributes {dimension_semantics = [#tpu.dimension_semantics<arbitrary>], iteration_bounds = array<i64: 1>, scalar_prefetch = 0 : i64, scratch_operands = 0 : i64, tpu.core_type = #tpu.core_type<tc>, window_params = [{pipeline_mode = #tpu.pipeline_mode<synchronous>, transform_indices = @transform_0, window_bounds = array<i64: 16, 64>}, {pipeline_mode = #tpu.pipeline_mode<synchronous>, transform_indices = @transform_1, window_bounds = array<i64: 3, 64, 64>}, {pipeline_mode = #tpu.pipeline_mode<synchronous>, transform_indices = @transform_2, window_bounds = array<i64: 3, 1, 64>}, {pipeline_mode = #tpu.pipeline_mode<synchronous>, transform_indices = @transform_3, window_bounds = array<i64: 3, 64, 64>}, {pipeline_mode = #tpu.pipeline_mode<synchronous>, transform_indices = @transform_4, window_bounds = array<i64: 3, 1, 64>}, {pipeline_mode = #tpu.pipeline_mode<synchronous>, transform_indices = @transform_5, window_bounds = array<i64: 3, 64, 64>}, {pipeline_mode = #tpu.pipeline_mode<synchronous>, transform_indices = @transform_6, window_bounds = array<i64: 3, 1, 64>}, {pipeline_mode = #tpu.pipeline_mode<synchronous>, transform_indices = @transform_7, window_bounds = array<i64: 3, 64, 64>}, {pipeline_mode = #tpu.pipeline_mode<synchronous>, transform_indices = @transform_8, window_bounds = array<i64: 3, 1, 64>}, {pipeline_mode = #tpu.pipeline_mode<synchronous>, transform_indices = @transform_9, window_bounds = array<i64: 3, 64, 256>}, {pipeline_mode = #tpu.pipeline_mode<synchronous>, transform_indices = @transform_10, window_bounds = array<i64: 3, 1, 256>}, {pipeline_mode = #tpu.pipeline_mode<synchronous>, transform_indices = @transform_11, window_bounds = array<i64: 3, 256, 64>}, {pipeline_mode = #tpu.pipeline_mode<synchronous>, transform_indices = @transform_12, window_bounds = array<i64: 3, 1, 64>}, {pipeline_mode = #tpu.pipeline_mode<synchronous>, transform_indices = @transform_13, window_bounds = array<i64: 3, 1, 64>}, {pipeline_mode = #tpu.pipeline_mode<synchronous>, transform_indices = @transform_14, window_bounds = array<i64: 3, 1, 64>}, {pipeline_mode = #tpu.pipeline_mode<synchronous>, transform_indices = @transform_15, window_bounds = array<i64: 3, 1, 64>}, {pipeline_mode = #tpu.pipeline_mode<synchronous>, transform_indices = @transform_16, window_bounds = array<i64: 3, 1, 64>}, {pipeline_mode = #tpu.pipeline_mode<synchronous>, transform_indices = @transform_17, window_bounds = array<i64: 64, 1>}, {pipeline_mode = #tpu.pipeline_mode<synchronous>, transform_indices = @transform_18, window_bounds = array<i64: 1, 1>}, {pipeline_mode = #tpu.pipeline_mode<synchronous>, transform_indices = @transform_19, window_bounds = array<i64: 2, 1>}]} {
    %c0 = arith.constant 0 : index
    %c0_0 = arith.constant 0 : index
    %0 = vector.load %arg1[%c0, %c0_0] : memref<16x64xf32, #tpu.memory_space<vmem>>, vector<16x64xf32>
    %c0_1 = arith.constant 0 : index
    %c0_2 = arith.constant 0 : index
    %c0_3 = arith.constant 0 : index
    %1 = vector.load %arg2[%c0_1, %c0_2, %c0_3] : memref<3x64x64xf32, #tpu.memory_space<vmem>>, vector<1x64x64xf32>
    %2 = vector.shape_cast %1 : vector<1x64x64xf32> to vector<64x64xf32>
    %cst = arith.constant dense<0.000000e+00> : vector<16x64xf32>
    %3 = tpu.matmul %0, %2, %cst {dimension_numbers = #tpu.dot_dimension_numbers<[1], [0], [0], [1], [0, 0, 1, 1], [], []>} : vector<16x64xf32>, vector<64x64xf32>, vector<16x64xf32> -> vector<16x64xf32>
    %c0_4 = arith.constant 0 : index
    %c0_5 = arith.constant 0 : index
    %c0_6 = arith.constant 0 : index
    %4 = vector.load %arg3[%c0_4, %c0_5, %c0_6] : memref<3x1x64xf32, #tpu.memory_space<vmem>>, vector<1x1x64xf32>
    %5 = vector.shape_cast %4 : vector<1x1x64xf32> to vector<1x64xf32>
    %6 = vector.broadcast %5 : vector<1x64xf32> to vector<16x64xf32>
    %7 = arith.addf %3, %6 : vector<16x64xf32>
    %c0_7 = arith.constant 0 : index
    %c0_8 = arith.constant 0 : index
    %c0_9 = arith.constant 0 : index
    %8 = vector.load %arg4[%c0_7, %c0_8, %c0_9] : memref<3x64x64xf32, #tpu.memory_space<vmem>>, vector<1x64x64xf32>
    %9 = vector.shape_cast %8 : vector<1x64x64xf32> to vector<64x64xf32>
    %cst_10 = arith.constant dense<0.000000e+00> : vector<16x64xf32>
    %10 = tpu.matmul %0, %9, %cst_10 {dimension_numbers = #tpu.dot_dimension_numbers<[1], [0], [0], [1], [0, 0, 1, 1], [], []>} : vector<16x64xf32>, vector<64x64xf32>, vector<16x64xf32> -> vector<16x64xf32>
    %c0_11 = arith.constant 0 : index
    %c0_12 = arith.constant 0 : index
    %c0_13 = arith.constant 0 : index
    %11 = vector.load %arg5[%c0_11, %c0_12, %c0_13] : memref<3x1x64xf32, #tpu.memory_space<vmem>>, vector<1x1x64xf32>
    %12 = vector.shape_cast %11 : vector<1x1x64xf32> to vector<1x64xf32>
    %13 = vector.broadcast %12 : vector<1x64xf32> to vector<16x64xf32>
    %14 = arith.addf %10, %13 : vector<16x64xf32>
    %c0_14 = arith.constant 0 : index
    %c0_15 = arith.constant 0 : index
    %c0_16 = arith.constant 0 : index
    %15 = vector.load %arg6[%c0_14, %c0_15, %c0_16] : memref<3x64x64xf32, #tpu.memory_space<vmem>>, vector<1x64x64xf32>
    %16 = vector.shape_cast %15 : vector<1x64x64xf32> to vector<64x64xf32>
    %cst_17 = arith.constant dense<0.000000e+00> : vector<16x64xf32>
    %17 = tpu.matmul %0, %16, %cst_17 {dimension_numbers = #tpu.dot_dimension_numbers<[1], [0], [0], [1], [0, 0, 1, 1], [], []>} : vector<16x64xf32>, vector<64x64xf32>, vector<16x64xf32> -> vector<16x64xf32>
    %c0_18 = arith.constant 0 : index
    %c0_19 = arith.constant 0 : index
    %c0_20 = arith.constant 0 : index
    %18 = vector.load %arg7[%c0_18, %c0_19, %c0_20] : memref<3x1x64xf32, #tpu.memory_space<vmem>>, vector<1x1x64xf32>
    %19 = vector.shape_cast %18 : vector<1x1x64xf32> to vector<1x64xf32>
    %20 = vector.broadcast %19 : vector<1x64xf32> to vector<16x64xf32>
    %21 = arith.addf %17, %20 : vector<16x64xf32>
    %22 = vector.extract_strided_slice %7 {offsets = [0, 0], sizes = [8, 16], strides = [1, 1]} : vector<16x64xf32> to vector<8x16xf32>
    %23 = vector.extract_strided_slice %14 {offsets = [0, 0], sizes = [8, 16], strides = [1, 1]} : vector<16x64xf32> to vector<8x16xf32>
    %24 = vector.extract_strided_slice %21 {offsets = [0, 0], sizes = [8, 16], strides = [1, 1]} : vector<16x64xf32> to vector<8x16xf32>
    %cst_21 = arith.constant dense<0.000000e+00> : vector<8x8xf32>
    %25 = tpu.matmul %22, %23, %cst_21 {dimension_numbers = #tpu.dot_dimension_numbers<[1], [1], [0], [0], [0, 0, 1, 0], [], []>} : vector<8x16xf32>, vector<8x16xf32>, vector<8x8xf32> -> vector<8x8xf32>
    %cst_22 = arith.constant 2.500000e-01 : f32
    %26 = vector.broadcast %cst_22 : f32 to vector<8x8xf32>
    %27 = arith.mulf %25, %26 : vector<8x8xf32>
    %cst_23 = arith.constant dense<0xFF800000> : vector<8xf32>
    %28 = vector.multi_reduction <maximumf>, %27, %cst_23 [1] : vector<8x8xf32> to vector<8xf32>
    %29 = vector.shape_cast %28 : vector<8xf32> to vector<8x1xf32>
    %30 = vector.broadcast %29 : vector<8x1xf32> to vector<8x8xf32>
    %31 = arith.subf %27, %30 : vector<8x8xf32>
    %32 = math.exp %31 : vector<8x8xf32>
    %cst_24 = arith.constant dense<0.000000e+00> : vector<8xf32>
    %33 = vector.multi_reduction <add>, %32, %cst_24 [1] : vector<8x8xf32> to vector<8xf32>
    %34 = vector.shape_cast %33 : vector<8xf32> to vector<8x1xf32>
    %35 = tpu.reciprocal %34 : vector<8x1xf32> -> vector<8x1xf32>
    %36 = vector.broadcast %35 : vector<8x1xf32> to vector<8x8xf32>
    %37 = arith.mulf %32, %36 : vector<8x8xf32>
    %cst_25 = arith.constant dense<0.000000e+00> : vector<8x16xf32>
    %38 = tpu.matmul %37, %24, %cst_25 {dimension_numbers = #tpu.dot_dimension_numbers<[1], [0], [0], [1], [0, 0, 1, 1], [], []>} : vector<8x8xf32>, vector<8x16xf32>, vector<8x16xf32> -> vector<8x16xf32>
    %39 = vector.extract_strided_slice %7 {offsets = [0, 16], sizes = [8, 16], strides = [1, 1]} : vector<16x64xf32> to vector<8x16xf32>
    %40 = vector.extract_strided_slice %14 {offsets = [0, 16], sizes = [8, 16], strides = [1, 1]} : vector<16x64xf32> to vector<8x16xf32>
    %41 = vector.extract_strided_slice %21 {offsets = [0, 16], sizes = [8, 16], strides = [1, 1]} : vector<16x64xf32> to vector<8x16xf32>
    %cst_26 = arith.constant dense<0.000000e+00> : vector<8x8xf32>
    %42 = tpu.matmul %39, %40, %cst_26 {dimension_numbers = #tpu.dot_dimension_numbers<[1], [1], [0], [0], [0, 0, 1, 0], [], []>} : vector<8x16xf32>, vector<8x16xf32>, vector<8x8xf32> -> vector<8x8xf32>
    %cst_27 = arith.constant 2.500000e-01 : f32
    %43 = vector.broadcast %cst_27 : f32 to vector<8x8xf32>
    %44 = arith.mulf %42, %43 : vector<8x8xf32>
    %cst_28 = arith.constant dense<0xFF800000> : vector<8xf32>
    %45 = vector.multi_reduction <maximumf>, %44, %cst_28 [1] : vector<8x8xf32> to vector<8xf32>
    %46 = vector.shape_cast %45 : vector<8xf32> to vector<8x1xf32>
    %47 = vector.broadcast %46 : vector<8x1xf32> to vector<8x8xf32>
    %48 = arith.subf %44, %47 : vector<8x8xf32>
    %49 = math.exp %48 : vector<8x8xf32>
    %cst_29 = arith.constant dense<0.000000e+00> : vector<8xf32>
    %50 = vector.multi_reduction <add>, %49, %cst_29 [1] : vector<8x8xf32> to vector<8xf32>
    %51 = vector.shape_cast %50 : vector<8xf32> to vector<8x1xf32>
    %52 = tpu.reciprocal %51 : vector<8x1xf32> -> vector<8x1xf32>
    %53 = vector.broadcast %52 : vector<8x1xf32> to vector<8x8xf32>
    %54 = arith.mulf %49, %53 : vector<8x8xf32>
    %cst_30 = arith.constant dense<0.000000e+00> : vector<8x16xf32>
    %55 = tpu.matmul %54, %41, %cst_30 {dimension_numbers = #tpu.dot_dimension_numbers<[1], [0], [0], [1], [0, 0, 1, 1], [], []>} : vector<8x8xf32>, vector<8x16xf32>, vector<8x16xf32> -> vector<8x16xf32>
    %56 = vector.extract_strided_slice %7 {offsets = [0, 32], sizes = [8, 16], strides = [1, 1]} : vector<16x64xf32> to vector<8x16xf32>
    %57 = vector.extract_strided_slice %14 {offsets = [0, 32], sizes = [8, 16], strides = [1, 1]} : vector<16x64xf32> to vector<8x16xf32>
    %58 = vector.extract_strided_slice %21 {offsets = [0, 32], sizes = [8, 16], strides = [1, 1]} : vector<16x64xf32> to vector<8x16xf32>
    %cst_31 = arith.constant dense<0.000000e+00> : vector<8x8xf32>
    %59 = tpu.matmul %56, %57, %cst_31 {dimension_numbers = #tpu.dot_dimension_numbers<[1], [1], [0], [0], [0, 0, 1, 0], [], []>} : vector<8x16xf32>, vector<8x16xf32>, vector<8x8xf32> -> vector<8x8xf32>
    %cst_32 = arith.constant 2.500000e-01 : f32
    %60 = vector.broadcast %cst_32 : f32 to vector<8x8xf32>
    %61 = arith.mulf %59, %60 : vector<8x8xf32>
    %cst_33 = arith.constant dense<0xFF800000> : vector<8xf32>
    %62 = vector.multi_reduction <maximumf>, %61, %cst_33 [1] : vector<8x8xf32> to vector<8xf32>
    %63 = vector.shape_cast %62 : vector<8xf32> to vector<8x1xf32>
    %64 = vector.broadcast %63 : vector<8x1xf32> to vector<8x8xf32>
    %65 = arith.subf %61, %64 : vector<8x8xf32>
    %66 = math.exp %65 : vector<8x8xf32>
    %cst_34 = arith.constant dense<0.000000e+00> : vector<8xf32>
    %67 = vector.multi_reduction <add>, %66, %cst_34 [1] : vector<8x8xf32> to vector<8xf32>
    %68 = vector.shape_cast %67 : vector<8xf32> to vector<8x1xf32>
    %69 = tpu.reciprocal %68 : vector<8x1xf32> -> vector<8x1xf32>
    %70 = vector.broadcast %69 : vector<8x1xf32> to vector<8x8xf32>
    %71 = arith.mulf %66, %70 : vector<8x8xf32>
    %cst_35 = arith.constant dense<0.000000e+00> : vector<8x16xf32>
    %72 = tpu.matmul %71, %58, %cst_35 {dimension_numbers = #tpu.dot_dimension_numbers<[1], [0], [0], [1], [0, 0, 1, 1], [], []>} : vector<8x8xf32>, vector<8x16xf32>, vector<8x16xf32> -> vector<8x16xf32>
    %73 = vector.extract_strided_slice %7 {offsets = [0, 48], sizes = [8, 16], strides = [1, 1]} : vector<16x64xf32> to vector<8x16xf32>
    %74 = vector.extract_strided_slice %14 {offsets = [0, 48], sizes = [8, 16], strides = [1, 1]} : vector<16x64xf32> to vector<8x16xf32>
    %75 = vector.extract_strided_slice %21 {offsets = [0, 48], sizes = [8, 16], strides = [1, 1]} : vector<16x64xf32> to vector<8x16xf32>
    %cst_36 = arith.constant dense<0.000000e+00> : vector<8x8xf32>
    %76 = tpu.matmul %73, %74, %cst_36 {dimension_numbers = #tpu.dot_dimension_numbers<[1], [1], [0], [0], [0, 0, 1, 0], [], []>} : vector<8x16xf32>, vector<8x16xf32>, vector<8x8xf32> -> vector<8x8xf32>
    %cst_37 = arith.constant 2.500000e-01 : f32
    %77 = vector.broadcast %cst_37 : f32 to vector<8x8xf32>
    %78 = arith.mulf %76, %77 : vector<8x8xf32>
    %cst_38 = arith.constant dense<0xFF800000> : vector<8xf32>
    %79 = vector.multi_reduction <maximumf>, %78, %cst_38 [1] : vector<8x8xf32> to vector<8xf32>
    %80 = vector.shape_cast %79 : vector<8xf32> to vector<8x1xf32>
    %81 = vector.broadcast %80 : vector<8x1xf32> to vector<8x8xf32>
    %82 = arith.subf %78, %81 : vector<8x8xf32>
    %83 = math.exp %82 : vector<8x8xf32>
    %cst_39 = arith.constant dense<0.000000e+00> : vector<8xf32>
    %84 = vector.multi_reduction <add>, %83, %cst_39 [1] : vector<8x8xf32> to vector<8xf32>
    %85 = vector.shape_cast %84 : vector<8xf32> to vector<8x1xf32>
    %86 = tpu.reciprocal %85 : vector<8x1xf32> -> vector<8x1xf32>
    %87 = vector.broadcast %86 : vector<8x1xf32> to vector<8x8xf32>
    %88 = arith.mulf %83, %87 : vector<8x8xf32>
    %cst_40 = arith.constant dense<0.000000e+00> : vector<8x16xf32>
    %89 = tpu.matmul %88, %75, %cst_40 {dimension_numbers = #tpu.dot_dimension_numbers<[1], [0], [0], [1], [0, 0, 1, 1], [], []>} : vector<8x8xf32>, vector<8x16xf32>, vector<8x16xf32> -> vector<8x16xf32>
    %90 = tpu.concatenate %38, %55, %72, %89 in 1 : vector<8x16xf32>, vector<8x16xf32>, vector<8x16xf32>, vector<8x16xf32> -> vector<8x64xf32>
    %91 = vector.extract_strided_slice %7 {offsets = [8, 0], sizes = [8, 16], strides = [1, 1]} : vector<16x64xf32> to vector<8x16xf32>
    %92 = vector.extract_strided_slice %14 {offsets = [8, 0], sizes = [8, 16], strides = [1, 1]} : vector<16x64xf32> to vector<8x16xf32>
    %93 = vector.extract_strided_slice %21 {offsets = [8, 0], sizes = [8, 16], strides = [1, 1]} : vector<16x64xf32> to vector<8x16xf32>
    %cst_41 = arith.constant dense<0.000000e+00> : vector<8x8xf32>
    %94 = tpu.matmul %91, %92, %cst_41 {dimension_numbers = #tpu.dot_dimension_numbers<[1], [1], [0], [0], [0, 0, 1, 0], [], []>} : vector<8x16xf32>, vector<8x16xf32>, vector<8x8xf32> -> vector<8x8xf32>
    %cst_42 = arith.constant 2.500000e-01 : f32
    %95 = vector.broadcast %cst_42 : f32 to vector<8x8xf32>
    %96 = arith.mulf %94, %95 : vector<8x8xf32>
    %cst_43 = arith.constant dense<0xFF800000> : vector<8xf32>
    %97 = vector.multi_reduction <maximumf>, %96, %cst_43 [1] : vector<8x8xf32> to vector<8xf32>
    %98 = vector.shape_cast %97 : vector<8xf32> to vector<8x1xf32>
    %99 = vector.broadcast %98 : vector<8x1xf32> to vector<8x8xf32>
    %100 = arith.subf %96, %99 : vector<8x8xf32>
    %101 = math.exp %100 : vector<8x8xf32>
    %cst_44 = arith.constant dense<0.000000e+00> : vector<8xf32>
    %102 = vector.multi_reduction <add>, %101, %cst_44 [1] : vector<8x8xf32> to vector<8xf32>
    %103 = vector.shape_cast %102 : vector<8xf32> to vector<8x1xf32>
    %104 = tpu.reciprocal %103 : vector<8x1xf32> -> vector<8x1xf32>
    %105 = vector.broadcast %104 : vector<8x1xf32> to vector<8x8xf32>
    %106 = arith.mulf %101, %105 : vector<8x8xf32>
    %cst_45 = arith.constant dense<0.000000e+00> : vector<8x16xf32>
    %107 = tpu.matmul %106, %93, %cst_45 {dimension_numbers = #tpu.dot_dimension_numbers<[1], [0], [0], [1], [0, 0, 1, 1], [], []>} : vector<8x8xf32>, vector<8x16xf32>, vector<8x16xf32> -> vector<8x16xf32>
    %108 = vector.extract_strided_slice %7 {offsets = [8, 16], sizes = [8, 16], strides = [1, 1]} : vector<16x64xf32> to vector<8x16xf32>
    %109 = vector.extract_strided_slice %14 {offsets = [8, 16], sizes = [8, 16], strides = [1, 1]} : vector<16x64xf32> to vector<8x16xf32>
    %110 = vector.extract_strided_slice %21 {offsets = [8, 16], sizes = [8, 16], strides = [1, 1]} : vector<16x64xf32> to vector<8x16xf32>
    %cst_46 = arith.constant dense<0.000000e+00> : vector<8x8xf32>
    %111 = tpu.matmul %108, %109, %cst_46 {dimension_numbers = #tpu.dot_dimension_numbers<[1], [1], [0], [0], [0, 0, 1, 0], [], []>} : vector<8x16xf32>, vector<8x16xf32>, vector<8x8xf32> -> vector<8x8xf32>
    %cst_47 = arith.constant 2.500000e-01 : f32
    %112 = vector.broadcast %cst_47 : f32 to vector<8x8xf32>
    %113 = arith.mulf %111, %112 : vector<8x8xf32>
    %cst_48 = arith.constant dense<0xFF800000> : vector<8xf32>
    %114 = vector.multi_reduction <maximumf>, %113, %cst_48 [1] : vector<8x8xf32> to vector<8xf32>
    %115 = vector.shape_cast %114 : vector<8xf32> to vector<8x1xf32>
    %116 = vector.broadcast %115 : vector<8x1xf32> to vector<8x8xf32>
    %117 = arith.subf %113, %116 : vector<8x8xf32>
    %118 = math.exp %117 : vector<8x8xf32>
    %cst_49 = arith.constant dense<0.000000e+00> : vector<8xf32>
    %119 = vector.multi_reduction <add>, %118, %cst_49 [1] : vector<8x8xf32> to vector<8xf32>
    %120 = vector.shape_cast %119 : vector<8xf32> to vector<8x1xf32>
    %121 = tpu.reciprocal %120 : vector<8x1xf32> -> vector<8x1xf32>
    %122 = vector.broadcast %121 : vector<8x1xf32> to vector<8x8xf32>
    %123 = arith.mulf %118, %122 : vector<8x8xf32>
    %cst_50 = arith.constant dense<0.000000e+00> : vector<8x16xf32>
    %124 = tpu.matmul %123, %110, %cst_50 {dimension_numbers = #tpu.dot_dimension_numbers<[1], [0], [0], [1], [0, 0, 1, 1], [], []>} : vector<8x8xf32>, vector<8x16xf32>, vector<8x16xf32> -> vector<8x16xf32>
    %125 = vector.extract_strided_slice %7 {offsets = [8, 32], sizes = [8, 16], strides = [1, 1]} : vector<16x64xf32> to vector<8x16xf32>
    %126 = vector.extract_strided_slice %14 {offsets = [8, 32], sizes = [8, 16], strides = [1, 1]} : vector<16x64xf32> to vector<8x16xf32>
    %127 = vector.extract_strided_slice %21 {offsets = [8, 32], sizes = [8, 16], strides = [1, 1]} : vector<16x64xf32> to vector<8x16xf32>
    %cst_51 = arith.constant dense<0.000000e+00> : vector<8x8xf32>
    %128 = tpu.matmul %125, %126, %cst_51 {dimension_numbers = #tpu.dot_dimension_numbers<[1], [1], [0], [0], [0, 0, 1, 0], [], []>} : vector<8x16xf32>, vector<8x16xf32>, vector<8x8xf32> -> vector<8x8xf32>
    %cst_52 = arith.constant 2.500000e-01 : f32
    %129 = vector.broadcast %cst_52 : f32 to vector<8x8xf32>
    %130 = arith.mulf %128, %129 : vector<8x8xf32>
    %cst_53 = arith.constant dense<0xFF800000> : vector<8xf32>
    %131 = vector.multi_reduction <maximumf>, %130, %cst_53 [1] : vector<8x8xf32> to vector<8xf32>
    %132 = vector.shape_cast %131 : vector<8xf32> to vector<8x1xf32>
    %133 = vector.broadcast %132 : vector<8x1xf32> to vector<8x8xf32>
    %134 = arith.subf %130, %133 : vector<8x8xf32>
    %135 = math.exp %134 : vector<8x8xf32>
    %cst_54 = arith.constant dense<0.000000e+00> : vector<8xf32>
    %136 = vector.multi_reduction <add>, %135, %cst_54 [1] : vector<8x8xf32> to vector<8xf32>
    %137 = vector.shape_cast %136 : vector<8xf32> to vector<8x1xf32>
    %138 = tpu.reciprocal %137 : vector<8x1xf32> -> vector<8x1xf32>
    %139 = vector.broadcast %138 : vector<8x1xf32> to vector<8x8xf32>
    %140 = arith.mulf %135, %139 : vector<8x8xf32>
    %cst_55 = arith.constant dense<0.000000e+00> : vector<8x16xf32>
    %141 = tpu.matmul %140, %127, %cst_55 {dimension_numbers = #tpu.dot_dimension_numbers<[1], [0], [0], [1], [0, 0, 1, 1], [], []>} : vector<8x8xf32>, vector<8x16xf32>, vector<8x16xf32> -> vector<8x16xf32>
    %142 = vector.extract_strided_slice %7 {offsets = [8, 48], sizes = [8, 16], strides = [1, 1]} : vector<16x64xf32> to vector<8x16xf32>
    %143 = vector.extract_strided_slice %14 {offsets = [8, 48], sizes = [8, 16], strides = [1, 1]} : vector<16x64xf32> to vector<8x16xf32>
    %144 = vector.extract_strided_slice %21 {offsets = [8, 48], sizes = [8, 16], strides = [1, 1]} : vector<16x64xf32> to vector<8x16xf32>
    %cst_56 = arith.constant dense<0.000000e+00> : vector<8x8xf32>
    %145 = tpu.matmul %142, %143, %cst_56 {dimension_numbers = #tpu.dot_dimension_numbers<[1], [1], [0], [0], [0, 0, 1, 0], [], []>} : vector<8x16xf32>, vector<8x16xf32>, vector<8x8xf32> -> vector<8x8xf32>
    %cst_57 = arith.constant 2.500000e-01 : f32
    %146 = vector.broadcast %cst_57 : f32 to vector<8x8xf32>
    %147 = arith.mulf %145, %146 : vector<8x8xf32>
    %cst_58 = arith.constant dense<0xFF800000> : vector<8xf32>
    %148 = vector.multi_reduction <maximumf>, %147, %cst_58 [1] : vector<8x8xf32> to vector<8xf32>
    %149 = vector.shape_cast %148 : vector<8xf32> to vector<8x1xf32>
    %150 = vector.broadcast %149 : vector<8x1xf32> to vector<8x8xf32>
    %151 = arith.subf %147, %150 : vector<8x8xf32>
    %152 = math.exp %151 : vector<8x8xf32>
    %cst_59 = arith.constant dense<0.000000e+00> : vector<8xf32>
    %153 = vector.multi_reduction <add>, %152, %cst_59 [1] : vector<8x8xf32> to vector<8xf32>
    %154 = vector.shape_cast %153 : vector<8xf32> to vector<8x1xf32>
    %155 = tpu.reciprocal %154 : vector<8x1xf32> -> vector<8x1xf32>
    %156 = vector.broadcast %155 : vector<8x1xf32> to vector<8x8xf32>
    %157 = arith.mulf %152, %156 : vector<8x8xf32>
    %cst_60 = arith.constant dense<0.000000e+00> : vector<8x16xf32>
    %158 = tpu.matmul %157, %144, %cst_60 {dimension_numbers = #tpu.dot_dimension_numbers<[1], [0], [0], [1], [0, 0, 1, 1], [], []>} : vector<8x8xf32>, vector<8x16xf32>, vector<8x16xf32> -> vector<8x16xf32>
    %159 = tpu.concatenate %107, %124, %141, %158 in 1 : vector<8x16xf32>, vector<8x16xf32>, vector<8x16xf32>, vector<8x16xf32> -> vector<8x64xf32>
    %160 = tpu.concatenate %90, %159 in 0 : vector<8x64xf32>, vector<8x64xf32> -> vector<16x64xf32>
    %c0_61 = arith.constant 0 : index
    %c0_62 = arith.constant 0 : index
    %c0_63 = arith.constant 0 : index
    %161 = vector.load %arg8[%c0_61, %c0_62, %c0_63] : memref<3x64x64xf32, #tpu.memory_space<vmem>>, vector<1x64x64xf32>
    %162 = vector.shape_cast %161 : vector<1x64x64xf32> to vector<64x64xf32>
    %cst_64 = arith.constant dense<0.000000e+00> : vector<16x64xf32>
    %163 = tpu.matmul %160, %162, %cst_64 {dimension_numbers = #tpu.dot_dimension_numbers<[1], [0], [0], [1], [0, 0, 1, 1], [], []>} : vector<16x64xf32>, vector<64x64xf32>, vector<16x64xf32> -> vector<16x64xf32>
    %c0_65 = arith.constant 0 : index
    %c0_66 = arith.constant 0 : index
    %c0_67 = arith.constant 0 : index
    %164 = vector.load %arg9[%c0_65, %c0_66, %c0_67] : memref<3x1x64xf32, #tpu.memory_space<vmem>>, vector<1x1x64xf32>
    %165 = vector.shape_cast %164 : vector<1x1x64xf32> to vector<1x64xf32>
    %166 = vector.broadcast %165 : vector<1x64xf32> to vector<16x64xf32>
    %167 = arith.addf %163, %166 : vector<16x64xf32>
    %168 = arith.addf %0, %167 : vector<16x64xf32>
    %c0_68 = arith.constant 0 : index
    %c0_69 = arith.constant 0 : index
    %c0_70 = arith.constant 0 : index
    %169 = vector.load %arg14[%c0_68, %c0_69, %c0_70] : memref<3x1x64xf32, #tpu.memory_space<vmem>>, vector<1x1x64xf32>
    %170 = vector.shape_cast %169 : vector<1x1x64xf32> to vector<1x64xf32>
    %c0_71 = arith.constant 0 : index
    %c0_72 = arith.constant 0 : index
    %c0_73 = arith.constant 0 : index
    %171 = vector.load %arg15[%c0_71, %c0_72, %c0_73] : memref<3x1x64xf32, #tpu.memory_space<vmem>>, vector<1x1x64xf32>
    %172 = vector.shape_cast %171 : vector<1x1x64xf32> to vector<1x64xf32>
    %cst_74 = arith.constant dense<0.000000e+00> : vector<16xf32>
    %173 = vector.multi_reduction <add>, %168, %cst_74 [1] : vector<16x64xf32> to vector<16xf32>
    %174 = vector.shape_cast %173 : vector<16xf32> to vector<16x1xf32>
    %cst_75 = arith.constant 6.400000e+01 : f32
    %175 = vector.broadcast %cst_75 : f32 to vector<16x1xf32>
    %176 = arith.divf %174, %175 : vector<16x1xf32>
    %177 = vector.broadcast %176 : vector<16x1xf32> to vector<16x64xf32>
    %178 = arith.subf %168, %177 : vector<16x64xf32>
    %179 = arith.mulf %178, %178 : vector<16x64xf32>
    %cst_76 = arith.constant dense<0.000000e+00> : vector<16xf32>
    %180 = vector.multi_reduction <add>, %179, %cst_76 [1] : vector<16x64xf32> to vector<16xf32>
    %181 = vector.shape_cast %180 : vector<16xf32> to vector<16x1xf32>
    %cst_77 = arith.constant 6.400000e+01 : f32
    %182 = vector.broadcast %cst_77 : f32 to vector<16x1xf32>
    %183 = arith.divf %181, %182 : vector<16x1xf32>
    %184 = vector.broadcast %176 : vector<16x1xf32> to vector<16x64xf32>
    %185 = arith.subf %168, %184 : vector<16x64xf32>
    %cst_78 = arith.constant 9.99999974E-6 : f32
    %186 = vector.broadcast %cst_78 : f32 to vector<16x1xf32>
    %187 = arith.addf %183, %186 : vector<16x1xf32>
    %188 = math.rsqrt %187 : vector<16x1xf32>
    %189 = vector.broadcast %188 : vector<16x1xf32> to vector<16x64xf32>
    %190 = arith.mulf %185, %189 : vector<16x64xf32>
    %191 = vector.broadcast %170 : vector<1x64xf32> to vector<16x64xf32>
    %192 = arith.mulf %190, %191 : vector<16x64xf32>
    %193 = vector.broadcast %172 : vector<1x64xf32> to vector<16x64xf32>
    %194 = arith.addf %192, %193 : vector<16x64xf32>
    %c0_79 = arith.constant 0 : index
    %c0_80 = arith.constant 0 : index
    %c0_81 = arith.constant 0 : index
    %195 = vector.load %arg10[%c0_79, %c0_80, %c0_81] : memref<3x64x256xf32, #tpu.memory_space<vmem>>, vector<1x64x256xf32>
    %196 = vector.shape_cast %195 : vector<1x64x256xf32> to vector<64x256xf32>
    %cst_82 = arith.constant dense<0.000000e+00> : vector<16x256xf32>
    %197 = tpu.matmul %194, %196, %cst_82 {dimension_numbers = #tpu.dot_dimension_numbers<[1], [0], [0], [1], [0, 0, 1, 1], [], []>} : vector<16x64xf32>, vector<64x256xf32>, vector<16x256xf32> -> vector<16x256xf32>
    %c0_83 = arith.constant 0 : index
    %c0_84 = arith.constant 0 : index
    %c0_85 = arith.constant 0 : index
    %198 = vector.load %arg11[%c0_83, %c0_84, %c0_85] : memref<3x1x256xf32, #tpu.memory_space<vmem>>, vector<1x1x256xf32>
    %199 = vector.shape_cast %198 : vector<1x1x256xf32> to vector<1x256xf32>
    %200 = vector.broadcast %199 : vector<1x256xf32> to vector<16x256xf32>
    %201 = arith.addf %197, %200 : vector<16x256xf32>
    %cst_86 = arith.constant 0.000000e+00 : f32
    %202 = vector.broadcast %cst_86 : f32 to vector<16x256xf32>
    %203 = arith.maximumf %201, %202 : vector<16x256xf32>
    %c0_87 = arith.constant 0 : index
    %c0_88 = arith.constant 0 : index
    %c0_89 = arith.constant 0 : index
    %204 = vector.load %arg12[%c0_87, %c0_88, %c0_89] : memref<3x256x64xf32, #tpu.memory_space<vmem>>, vector<1x256x64xf32>
    %205 = vector.shape_cast %204 : vector<1x256x64xf32> to vector<256x64xf32>
    %cst_90 = arith.constant dense<0.000000e+00> : vector<16x64xf32>
    %206 = tpu.matmul %203, %205, %cst_90 {dimension_numbers = #tpu.dot_dimension_numbers<[1], [0], [0], [1], [0, 0, 1, 1], [], []>} : vector<16x256xf32>, vector<256x64xf32>, vector<16x64xf32> -> vector<16x64xf32>
    %c0_91 = arith.constant 0 : index
    %c0_92 = arith.constant 0 : index
    %c0_93 = arith.constant 0 : index
    %207 = vector.load %arg13[%c0_91, %c0_92, %c0_93] : memref<3x1x64xf32, #tpu.memory_space<vmem>>, vector<1x1x64xf32>
    %208 = vector.shape_cast %207 : vector<1x1x64xf32> to vector<1x64xf32>
    %209 = vector.broadcast %208 : vector<1x64xf32> to vector<16x64xf32>
    %210 = arith.addf %206, %209 : vector<16x64xf32>
    %211 = arith.addf %194, %210 : vector<16x64xf32>
    %c0_94 = arith.constant 0 : index
    %c0_95 = arith.constant 0 : index
    %c0_96 = arith.constant 0 : index
    %212 = vector.load %arg16[%c0_94, %c0_95, %c0_96] : memref<3x1x64xf32, #tpu.memory_space<vmem>>, vector<1x1x64xf32>
    %213 = vector.shape_cast %212 : vector<1x1x64xf32> to vector<1x64xf32>
    %c0_97 = arith.constant 0 : index
    %c0_98 = arith.constant 0 : index
    %c0_99 = arith.constant 0 : index
    %214 = vector.load %arg17[%c0_97, %c0_98, %c0_99] : memref<3x1x64xf32, #tpu.memory_space<vmem>>, vector<1x1x64xf32>
    %215 = vector.shape_cast %214 : vector<1x1x64xf32> to vector<1x64xf32>
    %cst_100 = arith.constant dense<0.000000e+00> : vector<16xf32>
    %216 = vector.multi_reduction <add>, %211, %cst_100 [1] : vector<16x64xf32> to vector<16xf32>
    %217 = vector.shape_cast %216 : vector<16xf32> to vector<16x1xf32>
    %cst_101 = arith.constant 6.400000e+01 : f32
    %218 = vector.broadcast %cst_101 : f32 to vector<16x1xf32>
    %219 = arith.divf %217, %218 : vector<16x1xf32>
    %220 = vector.broadcast %219 : vector<16x1xf32> to vector<16x64xf32>
    %221 = arith.subf %211, %220 : vector<16x64xf32>
    %222 = arith.mulf %221, %221 : vector<16x64xf32>
    %cst_102 = arith.constant dense<0.000000e+00> : vector<16xf32>
    %223 = vector.multi_reduction <add>, %222, %cst_102 [1] : vector<16x64xf32> to vector<16xf32>
    %224 = vector.shape_cast %223 : vector<16xf32> to vector<16x1xf32>
    %cst_103 = arith.constant 6.400000e+01 : f32
    %225 = vector.broadcast %cst_103 : f32 to vector<16x1xf32>
    %226 = arith.divf %224, %225 : vector<16x1xf32>
    %227 = vector.broadcast %219 : vector<16x1xf32> to vector<16x64xf32>
    %228 = arith.subf %211, %227 : vector<16x64xf32>
    %cst_104 = arith.constant 9.99999974E-6 : f32
    %229 = vector.broadcast %cst_104 : f32 to vector<16x1xf32>
    %230 = arith.addf %226, %229 : vector<16x1xf32>
    %231 = math.rsqrt %230 : vector<16x1xf32>
    %232 = vector.broadcast %231 : vector<16x1xf32> to vector<16x64xf32>
    %233 = arith.mulf %228, %232 : vector<16x64xf32>
    %234 = vector.broadcast %213 : vector<1x64xf32> to vector<16x64xf32>
    %235 = arith.mulf %233, %234 : vector<16x64xf32>
    %236 = vector.broadcast %215 : vector<1x64xf32> to vector<16x64xf32>
    %237 = arith.addf %235, %236 : vector<16x64xf32>
    %c1 = arith.constant 1 : index
    %c0_105 = arith.constant 0 : index
    %c0_106 = arith.constant 0 : index
    %238 = vector.load %arg2[%c1, %c0_105, %c0_106] : memref<3x64x64xf32, #tpu.memory_space<vmem>>, vector<1x64x64xf32>
    %239 = vector.shape_cast %238 : vector<1x64x64xf32> to vector<64x64xf32>
    %cst_107 = arith.constant dense<0.000000e+00> : vector<16x64xf32>
    %240 = tpu.matmul %237, %239, %cst_107 {dimension_numbers = #tpu.dot_dimension_numbers<[1], [0], [0], [1], [0, 0, 1, 1], [], []>} : vector<16x64xf32>, vector<64x64xf32>, vector<16x64xf32> -> vector<16x64xf32>
    %c1_108 = arith.constant 1 : index
    %c0_109 = arith.constant 0 : index
    %c0_110 = arith.constant 0 : index
    %241 = vector.load %arg3[%c1_108, %c0_109, %c0_110] : memref<3x1x64xf32, #tpu.memory_space<vmem>>, vector<1x1x64xf32>
    %242 = vector.shape_cast %241 : vector<1x1x64xf32> to vector<1x64xf32>
    %243 = vector.broadcast %242 : vector<1x64xf32> to vector<16x64xf32>
    %244 = arith.addf %240, %243 : vector<16x64xf32>
    %c1_111 = arith.constant 1 : index
    %c0_112 = arith.constant 0 : index
    %c0_113 = arith.constant 0 : index
    %245 = vector.load %arg4[%c1_111, %c0_112, %c0_113] : memref<3x64x64xf32, #tpu.memory_space<vmem>>, vector<1x64x64xf32>
    %246 = vector.shape_cast %245 : vector<1x64x64xf32> to vector<64x64xf32>
    %cst_114 = arith.constant dense<0.000000e+00> : vector<16x64xf32>
    %247 = tpu.matmul %237, %246, %cst_114 {dimension_numbers = #tpu.dot_dimension_numbers<[1], [0], [0], [1], [0, 0, 1, 1], [], []>} : vector<16x64xf32>, vector<64x64xf32>, vector<16x64xf32> -> vector<16x64xf32>
    %c1_115 = arith.constant 1 : index
    %c0_116 = arith.constant 0 : index
    %c0_117 = arith.constant 0 : index
    %248 = vector.load %arg5[%c1_115, %c0_116, %c0_117] : memref<3x1x64xf32, #tpu.memory_space<vmem>>, vector<1x1x64xf32>
    %249 = vector.shape_cast %248 : vector<1x1x64xf32> to vector<1x64xf32>
    %250 = vector.broadcast %249 : vector<1x64xf32> to vector<16x64xf32>
    %251 = arith.addf %247, %250 : vector<16x64xf32>
    %c1_118 = arith.constant 1 : index
    %c0_119 = arith.constant 0 : index
    %c0_120 = arith.constant 0 : index
    %252 = vector.load %arg6[%c1_118, %c0_119, %c0_120] : memref<3x64x64xf32, #tpu.memory_space<vmem>>, vector<1x64x64xf32>
    %253 = vector.shape_cast %252 : vector<1x64x64xf32> to vector<64x64xf32>
    %cst_121 = arith.constant dense<0.000000e+00> : vector<16x64xf32>
    %254 = tpu.matmul %237, %253, %cst_121 {dimension_numbers = #tpu.dot_dimension_numbers<[1], [0], [0], [1], [0, 0, 1, 1], [], []>} : vector<16x64xf32>, vector<64x64xf32>, vector<16x64xf32> -> vector<16x64xf32>
    %c1_122 = arith.constant 1 : index
    %c0_123 = arith.constant 0 : index
    %c0_124 = arith.constant 0 : index
    %255 = vector.load %arg7[%c1_122, %c0_123, %c0_124] : memref<3x1x64xf32, #tpu.memory_space<vmem>>, vector<1x1x64xf32>
    %256 = vector.shape_cast %255 : vector<1x1x64xf32> to vector<1x64xf32>
    %257 = vector.broadcast %256 : vector<1x64xf32> to vector<16x64xf32>
    %258 = arith.addf %254, %257 : vector<16x64xf32>
    %259 = vector.extract_strided_slice %244 {offsets = [0, 0], sizes = [8, 16], strides = [1, 1]} : vector<16x64xf32> to vector<8x16xf32>
    %260 = vector.extract_strided_slice %251 {offsets = [0, 0], sizes = [8, 16], strides = [1, 1]} : vector<16x64xf32> to vector<8x16xf32>
    %261 = vector.extract_strided_slice %258 {offsets = [0, 0], sizes = [8, 16], strides = [1, 1]} : vector<16x64xf32> to vector<8x16xf32>
    %cst_125 = arith.constant dense<0.000000e+00> : vector<8x8xf32>
    %262 = tpu.matmul %259, %260, %cst_125 {dimension_numbers = #tpu.dot_dimension_numbers<[1], [1], [0], [0], [0, 0, 1, 0], [], []>} : vector<8x16xf32>, vector<8x16xf32>, vector<8x8xf32> -> vector<8x8xf32>
    %cst_126 = arith.constant 2.500000e-01 : f32
    %263 = vector.broadcast %cst_126 : f32 to vector<8x8xf32>
    %264 = arith.mulf %262, %263 : vector<8x8xf32>
    %cst_127 = arith.constant dense<0xFF800000> : vector<8xf32>
    %265 = vector.multi_reduction <maximumf>, %264, %cst_127 [1] : vector<8x8xf32> to vector<8xf32>
    %266 = vector.shape_cast %265 : vector<8xf32> to vector<8x1xf32>
    %267 = vector.broadcast %266 : vector<8x1xf32> to vector<8x8xf32>
    %268 = arith.subf %264, %267 : vector<8x8xf32>
    %269 = math.exp %268 : vector<8x8xf32>
    %cst_128 = arith.constant dense<0.000000e+00> : vector<8xf32>
    %270 = vector.multi_reduction <add>, %269, %cst_128 [1] : vector<8x8xf32> to vector<8xf32>
    %271 = vector.shape_cast %270 : vector<8xf32> to vector<8x1xf32>
    %272 = tpu.reciprocal %271 : vector<8x1xf32> -> vector<8x1xf32>
    %273 = vector.broadcast %272 : vector<8x1xf32> to vector<8x8xf32>
    %274 = arith.mulf %269, %273 : vector<8x8xf32>
    %cst_129 = arith.constant dense<0.000000e+00> : vector<8x16xf32>
    %275 = tpu.matmul %274, %261, %cst_129 {dimension_numbers = #tpu.dot_dimension_numbers<[1], [0], [0], [1], [0, 0, 1, 1], [], []>} : vector<8x8xf32>, vector<8x16xf32>, vector<8x16xf32> -> vector<8x16xf32>
    %276 = vector.extract_strided_slice %244 {offsets = [0, 16], sizes = [8, 16], strides = [1, 1]} : vector<16x64xf32> to vector<8x16xf32>
    %277 = vector.extract_strided_slice %251 {offsets = [0, 16], sizes = [8, 16], strides = [1, 1]} : vector<16x64xf32> to vector<8x16xf32>
    %278 = vector.extract_strided_slice %258 {offsets = [0, 16], sizes = [8, 16], strides = [1, 1]} : vector<16x64xf32> to vector<8x16xf32>
    %cst_130 = arith.constant dense<0.000000e+00> : vector<8x8xf32>
    %279 = tpu.matmul %276, %277, %cst_130 {dimension_numbers = #tpu.dot_dimension_numbers<[1], [1], [0], [0], [0, 0, 1, 0], [], []>} : vector<8x16xf32>, vector<8x16xf32>, vector<8x8xf32> -> vector<8x8xf32>
    %cst_131 = arith.constant 2.500000e-01 : f32
    %280 = vector.broadcast %cst_131 : f32 to vector<8x8xf32>
    %281 = arith.mulf %279, %280 : vector<8x8xf32>
    %cst_132 = arith.constant dense<0xFF800000> : vector<8xf32>
    %282 = vector.multi_reduction <maximumf>, %281, %cst_132 [1] : vector<8x8xf32> to vector<8xf32>
    %283 = vector.shape_cast %282 : vector<8xf32> to vector<8x1xf32>
    %284 = vector.broadcast %283 : vector<8x1xf32> to vector<8x8xf32>
    %285 = arith.subf %281, %284 : vector<8x8xf32>
    %286 = math.exp %285 : vector<8x8xf32>
    %cst_133 = arith.constant dense<0.000000e+00> : vector<8xf32>
    %287 = vector.multi_reduction <add>, %286, %cst_133 [1] : vector<8x8xf32> to vector<8xf32>
    %288 = vector.shape_cast %287 : vector<8xf32> to vector<8x1xf32>
    %289 = tpu.reciprocal %288 : vector<8x1xf32> -> vector<8x1xf32>
    %290 = vector.broadcast %289 : vector<8x1xf32> to vector<8x8xf32>
    %291 = arith.mulf %286, %290 : vector<8x8xf32>
    %cst_134 = arith.constant dense<0.000000e+00> : vector<8x16xf32>
    %292 = tpu.matmul %291, %278, %cst_134 {dimension_numbers = #tpu.dot_dimension_numbers<[1], [0], [0], [1], [0, 0, 1, 1], [], []>} : vector<8x8xf32>, vector<8x16xf32>, vector<8x16xf32> -> vector<8x16xf32>
    %293 = vector.extract_strided_slice %244 {offsets = [0, 32], sizes = [8, 16], strides = [1, 1]} : vector<16x64xf32> to vector<8x16xf32>
    %294 = vector.extract_strided_slice %251 {offsets = [0, 32], sizes = [8, 16], strides = [1, 1]} : vector<16x64xf32> to vector<8x16xf32>
    %295 = vector.extract_strided_slice %258 {offsets = [0, 32], sizes = [8, 16], strides = [1, 1]} : vector<16x64xf32> to vector<8x16xf32>
    %cst_135 = arith.constant dense<0.000000e+00> : vector<8x8xf32>
    %296 = tpu.matmul %293, %294, %cst_135 {dimension_numbers = #tpu.dot_dimension_numbers<[1], [1], [0], [0], [0, 0, 1, 0], [], []>} : vector<8x16xf32>, vector<8x16xf32>, vector<8x8xf32> -> vector<8x8xf32>
    %cst_136 = arith.constant 2.500000e-01 : f32
    %297 = vector.broadcast %cst_136 : f32 to vector<8x8xf32>
    %298 = arith.mulf %296, %297 : vector<8x8xf32>
    %cst_137 = arith.constant dense<0xFF800000> : vector<8xf32>
    %299 = vector.multi_reduction <maximumf>, %298, %cst_137 [1] : vector<8x8xf32> to vector<8xf32>
    %300 = vector.shape_cast %299 : vector<8xf32> to vector<8x1xf32>
    %301 = vector.broadcast %300 : vector<8x1xf32> to vector<8x8xf32>
    %302 = arith.subf %298, %301 : vector<8x8xf32>
    %303 = math.exp %302 : vector<8x8xf32>
    %cst_138 = arith.constant dense<0.000000e+00> : vector<8xf32>
    %304 = vector.multi_reduction <add>, %303, %cst_138 [1] : vector<8x8xf32> to vector<8xf32>
    %305 = vector.shape_cast %304 : vector<8xf32> to vector<8x1xf32>
    %306 = tpu.reciprocal %305 : vector<8x1xf32> -> vector<8x1xf32>
    %307 = vector.broadcast %306 : vector<8x1xf32> to vector<8x8xf32>
    %308 = arith.mulf %303, %307 : vector<8x8xf32>
    %cst_139 = arith.constant dense<0.000000e+00> : vector<8x16xf32>
    %309 = tpu.matmul %308, %295, %cst_139 {dimension_numbers = #tpu.dot_dimension_numbers<[1], [0], [0], [1], [0, 0, 1, 1], [], []>} : vector<8x8xf32>, vector<8x16xf32>, vector<8x16xf32> -> vector<8x16xf32>
    %310 = vector.extract_strided_slice %244 {offsets = [0, 48], sizes = [8, 16], strides = [1, 1]} : vector<16x64xf32> to vector<8x16xf32>
    %311 = vector.extract_strided_slice %251 {offsets = [0, 48], sizes = [8, 16], strides = [1, 1]} : vector<16x64xf32> to vector<8x16xf32>
    %312 = vector.extract_strided_slice %258 {offsets = [0, 48], sizes = [8, 16], strides = [1, 1]} : vector<16x64xf32> to vector<8x16xf32>
    %cst_140 = arith.constant dense<0.000000e+00> : vector<8x8xf32>
    %313 = tpu.matmul %310, %311, %cst_140 {dimension_numbers = #tpu.dot_dimension_numbers<[1], [1], [0], [0], [0, 0, 1, 0], [], []>} : vector<8x16xf32>, vector<8x16xf32>, vector<8x8xf32> -> vector<8x8xf32>
    %cst_141 = arith.constant 2.500000e-01 : f32
    %314 = vector.broadcast %cst_141 : f32 to vector<8x8xf32>
    %315 = arith.mulf %313, %314 : vector<8x8xf32>
    %cst_142 = arith.constant dense<0xFF800000> : vector<8xf32>
    %316 = vector.multi_reduction <maximumf>, %315, %cst_142 [1] : vector<8x8xf32> to vector<8xf32>
    %317 = vector.shape_cast %316 : vector<8xf32> to vector<8x1xf32>
    %318 = vector.broadcast %317 : vector<8x1xf32> to vector<8x8xf32>
    %319 = arith.subf %315, %318 : vector<8x8xf32>
    %320 = math.exp %319 : vector<8x8xf32>
    %cst_143 = arith.constant dense<0.000000e+00> : vector<8xf32>
    %321 = vector.multi_reduction <add>, %320, %cst_143 [1] : vector<8x8xf32> to vector<8xf32>
    %322 = vector.shape_cast %321 : vector<8xf32> to vector<8x1xf32>
    %323 = tpu.reciprocal %322 : vector<8x1xf32> -> vector<8x1xf32>
    %324 = vector.broadcast %323 : vector<8x1xf32> to vector<8x8xf32>
    %325 = arith.mulf %320, %324 : vector<8x8xf32>
    %cst_144 = arith.constant dense<0.000000e+00> : vector<8x16xf32>
    %326 = tpu.matmul %325, %312, %cst_144 {dimension_numbers = #tpu.dot_dimension_numbers<[1], [0], [0], [1], [0, 0, 1, 1], [], []>} : vector<8x8xf32>, vector<8x16xf32>, vector<8x16xf32> -> vector<8x16xf32>
    %327 = tpu.concatenate %275, %292, %309, %326 in 1 : vector<8x16xf32>, vector<8x16xf32>, vector<8x16xf32>, vector<8x16xf32> -> vector<8x64xf32>
    %328 = vector.extract_strided_slice %244 {offsets = [8, 0], sizes = [8, 16], strides = [1, 1]} : vector<16x64xf32> to vector<8x16xf32>
    %329 = vector.extract_strided_slice %251 {offsets = [8, 0], sizes = [8, 16], strides = [1, 1]} : vector<16x64xf32> to vector<8x16xf32>
    %330 = vector.extract_strided_slice %258 {offsets = [8, 0], sizes = [8, 16], strides = [1, 1]} : vector<16x64xf32> to vector<8x16xf32>
    %cst_145 = arith.constant dense<0.000000e+00> : vector<8x8xf32>
    %331 = tpu.matmul %328, %329, %cst_145 {dimension_numbers = #tpu.dot_dimension_numbers<[1], [1], [0], [0], [0, 0, 1, 0], [], []>} : vector<8x16xf32>, vector<8x16xf32>, vector<8x8xf32> -> vector<8x8xf32>
    %cst_146 = arith.constant 2.500000e-01 : f32
    %332 = vector.broadcast %cst_146 : f32 to vector<8x8xf32>
    %333 = arith.mulf %331, %332 : vector<8x8xf32>
    %cst_147 = arith.constant dense<0xFF800000> : vector<8xf32>
    %334 = vector.multi_reduction <maximumf>, %333, %cst_147 [1] : vector<8x8xf32> to vector<8xf32>
    %335 = vector.shape_cast %334 : vector<8xf32> to vector<8x1xf32>
    %336 = vector.broadcast %335 : vector<8x1xf32> to vector<8x8xf32>
    %337 = arith.subf %333, %336 : vector<8x8xf32>
    %338 = math.exp %337 : vector<8x8xf32>
    %cst_148 = arith.constant dense<0.000000e+00> : vector<8xf32>
    %339 = vector.multi_reduction <add>, %338, %cst_148 [1] : vector<8x8xf32> to vector<8xf32>
    %340 = vector.shape_cast %339 : vector<8xf32> to vector<8x1xf32>
    %341 = tpu.reciprocal %340 : vector<8x1xf32> -> vector<8x1xf32>
    %342 = vector.broadcast %341 : vector<8x1xf32> to vector<8x8xf32>
    %343 = arith.mulf %338, %342 : vector<8x8xf32>
    %cst_149 = arith.constant dense<0.000000e+00> : vector<8x16xf32>
    %344 = tpu.matmul %343, %330, %cst_149 {dimension_numbers = #tpu.dot_dimension_numbers<[1], [0], [0], [1], [0, 0, 1, 1], [], []>} : vector<8x8xf32>, vector<8x16xf32>, vector<8x16xf32> -> vector<8x16xf32>
    %345 = vector.extract_strided_slice %244 {offsets = [8, 16], sizes = [8, 16], strides = [1, 1]} : vector<16x64xf32> to vector<8x16xf32>
    %346 = vector.extract_strided_slice %251 {offsets = [8, 16], sizes = [8, 16], strides = [1, 1]} : vector<16x64xf32> to vector<8x16xf32>
    %347 = vector.extract_strided_slice %258 {offsets = [8, 16], sizes = [8, 16], strides = [1, 1]} : vector<16x64xf32> to vector<8x16xf32>
    %cst_150 = arith.constant dense<0.000000e+00> : vector<8x8xf32>
    %348 = tpu.matmul %345, %346, %cst_150 {dimension_numbers = #tpu.dot_dimension_numbers<[1], [1], [0], [0], [0, 0, 1, 0], [], []>} : vector<8x16xf32>, vector<8x16xf32>, vector<8x8xf32> -> vector<8x8xf32>
    %cst_151 = arith.constant 2.500000e-01 : f32
    %349 = vector.broadcast %cst_151 : f32 to vector<8x8xf32>
    %350 = arith.mulf %348, %349 : vector<8x8xf32>
    %cst_152 = arith.constant dense<0xFF800000> : vector<8xf32>
    %351 = vector.multi_reduction <maximumf>, %350, %cst_152 [1] : vector<8x8xf32> to vector<8xf32>
    %352 = vector.shape_cast %351 : vector<8xf32> to vector<8x1xf32>
    %353 = vector.broadcast %352 : vector<8x1xf32> to vector<8x8xf32>
    %354 = arith.subf %350, %353 : vector<8x8xf32>
    %355 = math.exp %354 : vector<8x8xf32>
    %cst_153 = arith.constant dense<0.000000e+00> : vector<8xf32>
    %356 = vector.multi_reduction <add>, %355, %cst_153 [1] : vector<8x8xf32> to vector<8xf32>
    %357 = vector.shape_cast %356 : vector<8xf32> to vector<8x1xf32>
    %358 = tpu.reciprocal %357 : vector<8x1xf32> -> vector<8x1xf32>
    %359 = vector.broadcast %358 : vector<8x1xf32> to vector<8x8xf32>
    %360 = arith.mulf %355, %359 : vector<8x8xf32>
    %cst_154 = arith.constant dense<0.000000e+00> : vector<8x16xf32>
    %361 = tpu.matmul %360, %347, %cst_154 {dimension_numbers = #tpu.dot_dimension_numbers<[1], [0], [0], [1], [0, 0, 1, 1], [], []>} : vector<8x8xf32>, vector<8x16xf32>, vector<8x16xf32> -> vector<8x16xf32>
    %362 = vector.extract_strided_slice %244 {offsets = [8, 32], sizes = [8, 16], strides = [1, 1]} : vector<16x64xf32> to vector<8x16xf32>
    %363 = vector.extract_strided_slice %251 {offsets = [8, 32], sizes = [8, 16], strides = [1, 1]} : vector<16x64xf32> to vector<8x16xf32>
    %364 = vector.extract_strided_slice %258 {offsets = [8, 32], sizes = [8, 16], strides = [1, 1]} : vector<16x64xf32> to vector<8x16xf32>
    %cst_155 = arith.constant dense<0.000000e+00> : vector<8x8xf32>
    %365 = tpu.matmul %362, %363, %cst_155 {dimension_numbers = #tpu.dot_dimension_numbers<[1], [1], [0], [0], [0, 0, 1, 0], [], []>} : vector<8x16xf32>, vector<8x16xf32>, vector<8x8xf32> -> vector<8x8xf32>
    %cst_156 = arith.constant 2.500000e-01 : f32
    %366 = vector.broadcast %cst_156 : f32 to vector<8x8xf32>
    %367 = arith.mulf %365, %366 : vector<8x8xf32>
    %cst_157 = arith.constant dense<0xFF800000> : vector<8xf32>
    %368 = vector.multi_reduction <maximumf>, %367, %cst_157 [1] : vector<8x8xf32> to vector<8xf32>
    %369 = vector.shape_cast %368 : vector<8xf32> to vector<8x1xf32>
    %370 = vector.broadcast %369 : vector<8x1xf32> to vector<8x8xf32>
    %371 = arith.subf %367, %370 : vector<8x8xf32>
    %372 = math.exp %371 : vector<8x8xf32>
    %cst_158 = arith.constant dense<0.000000e+00> : vector<8xf32>
    %373 = vector.multi_reduction <add>, %372, %cst_158 [1] : vector<8x8xf32> to vector<8xf32>
    %374 = vector.shape_cast %373 : vector<8xf32> to vector<8x1xf32>
    %375 = tpu.reciprocal %374 : vector<8x1xf32> -> vector<8x1xf32>
    %376 = vector.broadcast %375 : vector<8x1xf32> to vector<8x8xf32>
    %377 = arith.mulf %372, %376 : vector<8x8xf32>
    %cst_159 = arith.constant dense<0.000000e+00> : vector<8x16xf32>
    %378 = tpu.matmul %377, %364, %cst_159 {dimension_numbers = #tpu.dot_dimension_numbers<[1], [0], [0], [1], [0, 0, 1, 1], [], []>} : vector<8x8xf32>, vector<8x16xf32>, vector<8x16xf32> -> vector<8x16xf32>
    %379 = vector.extract_strided_slice %244 {offsets = [8, 48], sizes = [8, 16], strides = [1, 1]} : vector<16x64xf32> to vector<8x16xf32>
    %380 = vector.extract_strided_slice %251 {offsets = [8, 48], sizes = [8, 16], strides = [1, 1]} : vector<16x64xf32> to vector<8x16xf32>
    %381 = vector.extract_strided_slice %258 {offsets = [8, 48], sizes = [8, 16], strides = [1, 1]} : vector<16x64xf32> to vector<8x16xf32>
    %cst_160 = arith.constant dense<0.000000e+00> : vector<8x8xf32>
    %382 = tpu.matmul %379, %380, %cst_160 {dimension_numbers = #tpu.dot_dimension_numbers<[1], [1], [0], [0], [0, 0, 1, 0], [], []>} : vector<8x16xf32>, vector<8x16xf32>, vector<8x8xf32> -> vector<8x8xf32>
    %cst_161 = arith.constant 2.500000e-01 : f32
    %383 = vector.broadcast %cst_161 : f32 to vector<8x8xf32>
    %384 = arith.mulf %382, %383 : vector<8x8xf32>
    %cst_162 = arith.constant dense<0xFF800000> : vector<8xf32>
    %385 = vector.multi_reduction <maximumf>, %384, %cst_162 [1] : vector<8x8xf32> to vector<8xf32>
    %386 = vector.shape_cast %385 : vector<8xf32> to vector<8x1xf32>
    %387 = vector.broadcast %386 : vector<8x1xf32> to vector<8x8xf32>
    %388 = arith.subf %384, %387 : vector<8x8xf32>
    %389 = math.exp %388 : vector<8x8xf32>
    %cst_163 = arith.constant dense<0.000000e+00> : vector<8xf32>
    %390 = vector.multi_reduction <add>, %389, %cst_163 [1] : vector<8x8xf32> to vector<8xf32>
    %391 = vector.shape_cast %390 : vector<8xf32> to vector<8x1xf32>
    %392 = tpu.reciprocal %391 : vector<8x1xf32> -> vector<8x1xf32>
    %393 = vector.broadcast %392 : vector<8x1xf32> to vector<8x8xf32>
    %394 = arith.mulf %389, %393 : vector<8x8xf32>
    %cst_164 = arith.constant dense<0.000000e+00> : vector<8x16xf32>
    %395 = tpu.matmul %394, %381, %cst_164 {dimension_numbers = #tpu.dot_dimension_numbers<[1], [0], [0], [1], [0, 0, 1, 1], [], []>} : vector<8x8xf32>, vector<8x16xf32>, vector<8x16xf32> -> vector<8x16xf32>
    %396 = tpu.concatenate %344, %361, %378, %395 in 1 : vector<8x16xf32>, vector<8x16xf32>, vector<8x16xf32>, vector<8x16xf32> -> vector<8x64xf32>
    %397 = tpu.concatenate %327, %396 in 0 : vector<8x64xf32>, vector<8x64xf32> -> vector<16x64xf32>
    %c1_165 = arith.constant 1 : index
    %c0_166 = arith.constant 0 : index
    %c0_167 = arith.constant 0 : index
    %398 = vector.load %arg8[%c1_165, %c0_166, %c0_167] : memref<3x64x64xf32, #tpu.memory_space<vmem>>, vector<1x64x64xf32>
    %399 = vector.shape_cast %398 : vector<1x64x64xf32> to vector<64x64xf32>
    %cst_168 = arith.constant dense<0.000000e+00> : vector<16x64xf32>
    %400 = tpu.matmul %397, %399, %cst_168 {dimension_numbers = #tpu.dot_dimension_numbers<[1], [0], [0], [1], [0, 0, 1, 1], [], []>} : vector<16x64xf32>, vector<64x64xf32>, vector<16x64xf32> -> vector<16x64xf32>
    %c1_169 = arith.constant 1 : index
    %c0_170 = arith.constant 0 : index
    %c0_171 = arith.constant 0 : index
    %401 = vector.load %arg9[%c1_169, %c0_170, %c0_171] : memref<3x1x64xf32, #tpu.memory_space<vmem>>, vector<1x1x64xf32>
    %402 = vector.shape_cast %401 : vector<1x1x64xf32> to vector<1x64xf32>
    %403 = vector.broadcast %402 : vector<1x64xf32> to vector<16x64xf32>
    %404 = arith.addf %400, %403 : vector<16x64xf32>
    %405 = arith.addf %237, %404 : vector<16x64xf32>
    %c1_172 = arith.constant 1 : index
    %c0_173 = arith.constant 0 : index
    %c0_174 = arith.constant 0 : index
    %406 = vector.load %arg14[%c1_172, %c0_173, %c0_174] : memref<3x1x64xf32, #tpu.memory_space<vmem>>, vector<1x1x64xf32>
    %407 = vector.shape_cast %406 : vector<1x1x64xf32> to vector<1x64xf32>
    %c1_175 = arith.constant 1 : index
    %c0_176 = arith.constant 0 : index
    %c0_177 = arith.constant 0 : index
    %408 = vector.load %arg15[%c1_175, %c0_176, %c0_177] : memref<3x1x64xf32, #tpu.memory_space<vmem>>, vector<1x1x64xf32>
    %409 = vector.shape_cast %408 : vector<1x1x64xf32> to vector<1x64xf32>
    %cst_178 = arith.constant dense<0.000000e+00> : vector<16xf32>
    %410 = vector.multi_reduction <add>, %405, %cst_178 [1] : vector<16x64xf32> to vector<16xf32>
    %411 = vector.shape_cast %410 : vector<16xf32> to vector<16x1xf32>
    %cst_179 = arith.constant 6.400000e+01 : f32
    %412 = vector.broadcast %cst_179 : f32 to vector<16x1xf32>
    %413 = arith.divf %411, %412 : vector<16x1xf32>
    %414 = vector.broadcast %413 : vector<16x1xf32> to vector<16x64xf32>
    %415 = arith.subf %405, %414 : vector<16x64xf32>
    %416 = arith.mulf %415, %415 : vector<16x64xf32>
    %cst_180 = arith.constant dense<0.000000e+00> : vector<16xf32>
    %417 = vector.multi_reduction <add>, %416, %cst_180 [1] : vector<16x64xf32> to vector<16xf32>
    %418 = vector.shape_cast %417 : vector<16xf32> to vector<16x1xf32>
    %cst_181 = arith.constant 6.400000e+01 : f32
    %419 = vector.broadcast %cst_181 : f32 to vector<16x1xf32>
    %420 = arith.divf %418, %419 : vector<16x1xf32>
    %421 = vector.broadcast %413 : vector<16x1xf32> to vector<16x64xf32>
    %422 = arith.subf %405, %421 : vector<16x64xf32>
    %cst_182 = arith.constant 9.99999974E-6 : f32
    %423 = vector.broadcast %cst_182 : f32 to vector<16x1xf32>
    %424 = arith.addf %420, %423 : vector<16x1xf32>
    %425 = math.rsqrt %424 : vector<16x1xf32>
    %426 = vector.broadcast %425 : vector<16x1xf32> to vector<16x64xf32>
    %427 = arith.mulf %422, %426 : vector<16x64xf32>
    %428 = vector.broadcast %407 : vector<1x64xf32> to vector<16x64xf32>
    %429 = arith.mulf %427, %428 : vector<16x64xf32>
    %430 = vector.broadcast %409 : vector<1x64xf32> to vector<16x64xf32>
    %431 = arith.addf %429, %430 : vector<16x64xf32>
    %c1_183 = arith.constant 1 : index
    %c0_184 = arith.constant 0 : index
    %c0_185 = arith.constant 0 : index
    %432 = vector.load %arg10[%c1_183, %c0_184, %c0_185] : memref<3x64x256xf32, #tpu.memory_space<vmem>>, vector<1x64x256xf32>
    %433 = vector.shape_cast %432 : vector<1x64x256xf32> to vector<64x256xf32>
    %cst_186 = arith.constant dense<0.000000e+00> : vector<16x256xf32>
    %434 = tpu.matmul %431, %433, %cst_186 {dimension_numbers = #tpu.dot_dimension_numbers<[1], [0], [0], [1], [0, 0, 1, 1], [], []>} : vector<16x64xf32>, vector<64x256xf32>, vector<16x256xf32> -> vector<16x256xf32>
    %c1_187 = arith.constant 1 : index
    %c0_188 = arith.constant 0 : index
    %c0_189 = arith.constant 0 : index
    %435 = vector.load %arg11[%c1_187, %c0_188, %c0_189] : memref<3x1x256xf32, #tpu.memory_space<vmem>>, vector<1x1x256xf32>
    %436 = vector.shape_cast %435 : vector<1x1x256xf32> to vector<1x256xf32>
    %437 = vector.broadcast %436 : vector<1x256xf32> to vector<16x256xf32>
    %438 = arith.addf %434, %437 : vector<16x256xf32>
    %cst_190 = arith.constant 0.000000e+00 : f32
    %439 = vector.broadcast %cst_190 : f32 to vector<16x256xf32>
    %440 = arith.maximumf %438, %439 : vector<16x256xf32>
    %c1_191 = arith.constant 1 : index
    %c0_192 = arith.constant 0 : index
    %c0_193 = arith.constant 0 : index
    %441 = vector.load %arg12[%c1_191, %c0_192, %c0_193] : memref<3x256x64xf32, #tpu.memory_space<vmem>>, vector<1x256x64xf32>
    %442 = vector.shape_cast %441 : vector<1x256x64xf32> to vector<256x64xf32>
    %cst_194 = arith.constant dense<0.000000e+00> : vector<16x64xf32>
    %443 = tpu.matmul %440, %442, %cst_194 {dimension_numbers = #tpu.dot_dimension_numbers<[1], [0], [0], [1], [0, 0, 1, 1], [], []>} : vector<16x256xf32>, vector<256x64xf32>, vector<16x64xf32> -> vector<16x64xf32>
    %c1_195 = arith.constant 1 : index
    %c0_196 = arith.constant 0 : index
    %c0_197 = arith.constant 0 : index
    %444 = vector.load %arg13[%c1_195, %c0_196, %c0_197] : memref<3x1x64xf32, #tpu.memory_space<vmem>>, vector<1x1x64xf32>
    %445 = vector.shape_cast %444 : vector<1x1x64xf32> to vector<1x64xf32>
    %446 = vector.broadcast %445 : vector<1x64xf32> to vector<16x64xf32>
    %447 = arith.addf %443, %446 : vector<16x64xf32>
    %448 = arith.addf %431, %447 : vector<16x64xf32>
    %c1_198 = arith.constant 1 : index
    %c0_199 = arith.constant 0 : index
    %c0_200 = arith.constant 0 : index
    %449 = vector.load %arg16[%c1_198, %c0_199, %c0_200] : memref<3x1x64xf32, #tpu.memory_space<vmem>>, vector<1x1x64xf32>
    %450 = vector.shape_cast %449 : vector<1x1x64xf32> to vector<1x64xf32>
    %c1_201 = arith.constant 1 : index
    %c0_202 = arith.constant 0 : index
    %c0_203 = arith.constant 0 : index
    %451 = vector.load %arg17[%c1_201, %c0_202, %c0_203] : memref<3x1x64xf32, #tpu.memory_space<vmem>>, vector<1x1x64xf32>
    %452 = vector.shape_cast %451 : vector<1x1x64xf32> to vector<1x64xf32>
    %cst_204 = arith.constant dense<0.000000e+00> : vector<16xf32>
    %453 = vector.multi_reduction <add>, %448, %cst_204 [1] : vector<16x64xf32> to vector<16xf32>
    %454 = vector.shape_cast %453 : vector<16xf32> to vector<16x1xf32>
    %cst_205 = arith.constant 6.400000e+01 : f32
    %455 = vector.broadcast %cst_205 : f32 to vector<16x1xf32>
    %456 = arith.divf %454, %455 : vector<16x1xf32>
    %457 = vector.broadcast %456 : vector<16x1xf32> to vector<16x64xf32>
    %458 = arith.subf %448, %457 : vector<16x64xf32>
    %459 = arith.mulf %458, %458 : vector<16x64xf32>
    %cst_206 = arith.constant dense<0.000000e+00> : vector<16xf32>
    %460 = vector.multi_reduction <add>, %459, %cst_206 [1] : vector<16x64xf32> to vector<16xf32>
    %461 = vector.shape_cast %460 : vector<16xf32> to vector<16x1xf32>
    %cst_207 = arith.constant 6.400000e+01 : f32
    %462 = vector.broadcast %cst_207 : f32 to vector<16x1xf32>
    %463 = arith.divf %461, %462 : vector<16x1xf32>
    %464 = vector.broadcast %456 : vector<16x1xf32> to vector<16x64xf32>
    %465 = arith.subf %448, %464 : vector<16x64xf32>
    %cst_208 = arith.constant 9.99999974E-6 : f32
    %466 = vector.broadcast %cst_208 : f32 to vector<16x1xf32>
    %467 = arith.addf %463, %466 : vector<16x1xf32>
    %468 = math.rsqrt %467 : vector<16x1xf32>
    %469 = vector.broadcast %468 : vector<16x1xf32> to vector<16x64xf32>
    %470 = arith.mulf %465, %469 : vector<16x64xf32>
    %471 = vector.broadcast %450 : vector<1x64xf32> to vector<16x64xf32>
    %472 = arith.mulf %470, %471 : vector<16x64xf32>
    %473 = vector.broadcast %452 : vector<1x64xf32> to vector<16x64xf32>
    %474 = arith.addf %472, %473 : vector<16x64xf32>
    %c2 = arith.constant 2 : index
    %c0_209 = arith.constant 0 : index
    %c0_210 = arith.constant 0 : index
    %475 = vector.load %arg2[%c2, %c0_209, %c0_210] : memref<3x64x64xf32, #tpu.memory_space<vmem>>, vector<1x64x64xf32>
    %476 = vector.shape_cast %475 : vector<1x64x64xf32> to vector<64x64xf32>
    %cst_211 = arith.constant dense<0.000000e+00> : vector<16x64xf32>
    %477 = tpu.matmul %474, %476, %cst_211 {dimension_numbers = #tpu.dot_dimension_numbers<[1], [0], [0], [1], [0, 0, 1, 1], [], []>} : vector<16x64xf32>, vector<64x64xf32>, vector<16x64xf32> -> vector<16x64xf32>
    %c2_212 = arith.constant 2 : index
    %c0_213 = arith.constant 0 : index
    %c0_214 = arith.constant 0 : index
    %478 = vector.load %arg3[%c2_212, %c0_213, %c0_214] : memref<3x1x64xf32, #tpu.memory_space<vmem>>, vector<1x1x64xf32>
    %479 = vector.shape_cast %478 : vector<1x1x64xf32> to vector<1x64xf32>
    %480 = vector.broadcast %479 : vector<1x64xf32> to vector<16x64xf32>
    %481 = arith.addf %477, %480 : vector<16x64xf32>
    %c2_215 = arith.constant 2 : index
    %c0_216 = arith.constant 0 : index
    %c0_217 = arith.constant 0 : index
    %482 = vector.load %arg4[%c2_215, %c0_216, %c0_217] : memref<3x64x64xf32, #tpu.memory_space<vmem>>, vector<1x64x64xf32>
    %483 = vector.shape_cast %482 : vector<1x64x64xf32> to vector<64x64xf32>
    %cst_218 = arith.constant dense<0.000000e+00> : vector<16x64xf32>
    %484 = tpu.matmul %474, %483, %cst_218 {dimension_numbers = #tpu.dot_dimension_numbers<[1], [0], [0], [1], [0, 0, 1, 1], [], []>} : vector<16x64xf32>, vector<64x64xf32>, vector<16x64xf32> -> vector<16x64xf32>
    %c2_219 = arith.constant 2 : index
    %c0_220 = arith.constant 0 : index
    %c0_221 = arith.constant 0 : index
    %485 = vector.load %arg5[%c2_219, %c0_220, %c0_221] : memref<3x1x64xf32, #tpu.memory_space<vmem>>, vector<1x1x64xf32>
    %486 = vector.shape_cast %485 : vector<1x1x64xf32> to vector<1x64xf32>
    %487 = vector.broadcast %486 : vector<1x64xf32> to vector<16x64xf32>
    %488 = arith.addf %484, %487 : vector<16x64xf32>
    %c2_222 = arith.constant 2 : index
    %c0_223 = arith.constant 0 : index
    %c0_224 = arith.constant 0 : index
    %489 = vector.load %arg6[%c2_222, %c0_223, %c0_224] : memref<3x64x64xf32, #tpu.memory_space<vmem>>, vector<1x64x64xf32>
    %490 = vector.shape_cast %489 : vector<1x64x64xf32> to vector<64x64xf32>
    %cst_225 = arith.constant dense<0.000000e+00> : vector<16x64xf32>
    %491 = tpu.matmul %474, %490, %cst_225 {dimension_numbers = #tpu.dot_dimension_numbers<[1], [0], [0], [1], [0, 0, 1, 1], [], []>} : vector<16x64xf32>, vector<64x64xf32>, vector<16x64xf32> -> vector<16x64xf32>
    %c2_226 = arith.constant 2 : index
    %c0_227 = arith.constant 0 : index
    %c0_228 = arith.constant 0 : index
    %492 = vector.load %arg7[%c2_226, %c0_227, %c0_228] : memref<3x1x64xf32, #tpu.memory_space<vmem>>, vector<1x1x64xf32>
    %493 = vector.shape_cast %492 : vector<1x1x64xf32> to vector<1x64xf32>
    %494 = vector.broadcast %493 : vector<1x64xf32> to vector<16x64xf32>
    %495 = arith.addf %491, %494 : vector<16x64xf32>
    %496 = vector.extract_strided_slice %481 {offsets = [0, 0], sizes = [8, 16], strides = [1, 1]} : vector<16x64xf32> to vector<8x16xf32>
    %497 = vector.extract_strided_slice %488 {offsets = [0, 0], sizes = [8, 16], strides = [1, 1]} : vector<16x64xf32> to vector<8x16xf32>
    %498 = vector.extract_strided_slice %495 {offsets = [0, 0], sizes = [8, 16], strides = [1, 1]} : vector<16x64xf32> to vector<8x16xf32>
    %cst_229 = arith.constant dense<0.000000e+00> : vector<8x8xf32>
    %499 = tpu.matmul %496, %497, %cst_229 {dimension_numbers = #tpu.dot_dimension_numbers<[1], [1], [0], [0], [0, 0, 1, 0], [], []>} : vector<8x16xf32>, vector<8x16xf32>, vector<8x8xf32> -> vector<8x8xf32>
    %cst_230 = arith.constant 2.500000e-01 : f32
    %500 = vector.broadcast %cst_230 : f32 to vector<8x8xf32>
    %501 = arith.mulf %499, %500 : vector<8x8xf32>
    %cst_231 = arith.constant dense<0xFF800000> : vector<8xf32>
    %502 = vector.multi_reduction <maximumf>, %501, %cst_231 [1] : vector<8x8xf32> to vector<8xf32>
    %503 = vector.shape_cast %502 : vector<8xf32> to vector<8x1xf32>
    %504 = vector.broadcast %503 : vector<8x1xf32> to vector<8x8xf32>
    %505 = arith.subf %501, %504 : vector<8x8xf32>
    %506 = math.exp %505 : vector<8x8xf32>
    %cst_232 = arith.constant dense<0.000000e+00> : vector<8xf32>
    %507 = vector.multi_reduction <add>, %506, %cst_232 [1] : vector<8x8xf32> to vector<8xf32>
    %508 = vector.shape_cast %507 : vector<8xf32> to vector<8x1xf32>
    %509 = tpu.reciprocal %508 : vector<8x1xf32> -> vector<8x1xf32>
    %510 = vector.broadcast %509 : vector<8x1xf32> to vector<8x8xf32>
    %511 = arith.mulf %506, %510 : vector<8x8xf32>
    %cst_233 = arith.constant dense<0.000000e+00> : vector<8x16xf32>
    %512 = tpu.matmul %511, %498, %cst_233 {dimension_numbers = #tpu.dot_dimension_numbers<[1], [0], [0], [1], [0, 0, 1, 1], [], []>} : vector<8x8xf32>, vector<8x16xf32>, vector<8x16xf32> -> vector<8x16xf32>
    %513 = vector.extract_strided_slice %481 {offsets = [0, 16], sizes = [8, 16], strides = [1, 1]} : vector<16x64xf32> to vector<8x16xf32>
    %514 = vector.extract_strided_slice %488 {offsets = [0, 16], sizes = [8, 16], strides = [1, 1]} : vector<16x64xf32> to vector<8x16xf32>
    %515 = vector.extract_strided_slice %495 {offsets = [0, 16], sizes = [8, 16], strides = [1, 1]} : vector<16x64xf32> to vector<8x16xf32>
    %cst_234 = arith.constant dense<0.000000e+00> : vector<8x8xf32>
    %516 = tpu.matmul %513, %514, %cst_234 {dimension_numbers = #tpu.dot_dimension_numbers<[1], [1], [0], [0], [0, 0, 1, 0], [], []>} : vector<8x16xf32>, vector<8x16xf32>, vector<8x8xf32> -> vector<8x8xf32>
    %cst_235 = arith.constant 2.500000e-01 : f32
    %517 = vector.broadcast %cst_235 : f32 to vector<8x8xf32>
    %518 = arith.mulf %516, %517 : vector<8x8xf32>
    %cst_236 = arith.constant dense<0xFF800000> : vector<8xf32>
    %519 = vector.multi_reduction <maximumf>, %518, %cst_236 [1] : vector<8x8xf32> to vector<8xf32>
    %520 = vector.shape_cast %519 : vector<8xf32> to vector<8x1xf32>
    %521 = vector.broadcast %520 : vector<8x1xf32> to vector<8x8xf32>
    %522 = arith.subf %518, %521 : vector<8x8xf32>
    %523 = math.exp %522 : vector<8x8xf32>
    %cst_237 = arith.constant dense<0.000000e+00> : vector<8xf32>
    %524 = vector.multi_reduction <add>, %523, %cst_237 [1] : vector<8x8xf32> to vector<8xf32>
    %525 = vector.shape_cast %524 : vector<8xf32> to vector<8x1xf32>
    %526 = tpu.reciprocal %525 : vector<8x1xf32> -> vector<8x1xf32>
    %527 = vector.broadcast %526 : vector<8x1xf32> to vector<8x8xf32>
    %528 = arith.mulf %523, %527 : vector<8x8xf32>
    %cst_238 = arith.constant dense<0.000000e+00> : vector<8x16xf32>
    %529 = tpu.matmul %528, %515, %cst_238 {dimension_numbers = #tpu.dot_dimension_numbers<[1], [0], [0], [1], [0, 0, 1, 1], [], []>} : vector<8x8xf32>, vector<8x16xf32>, vector<8x16xf32> -> vector<8x16xf32>
    %530 = vector.extract_strided_slice %481 {offsets = [0, 32], sizes = [8, 16], strides = [1, 1]} : vector<16x64xf32> to vector<8x16xf32>
    %531 = vector.extract_strided_slice %488 {offsets = [0, 32], sizes = [8, 16], strides = [1, 1]} : vector<16x64xf32> to vector<8x16xf32>
    %532 = vector.extract_strided_slice %495 {offsets = [0, 32], sizes = [8, 16], strides = [1, 1]} : vector<16x64xf32> to vector<8x16xf32>
    %cst_239 = arith.constant dense<0.000000e+00> : vector<8x8xf32>
    %533 = tpu.matmul %530, %531, %cst_239 {dimension_numbers = #tpu.dot_dimension_numbers<[1], [1], [0], [0], [0, 0, 1, 0], [], []>} : vector<8x16xf32>, vector<8x16xf32>, vector<8x8xf32> -> vector<8x8xf32>
    %cst_240 = arith.constant 2.500000e-01 : f32
    %534 = vector.broadcast %cst_240 : f32 to vector<8x8xf32>
    %535 = arith.mulf %533, %534 : vector<8x8xf32>
    %cst_241 = arith.constant dense<0xFF800000> : vector<8xf32>
    %536 = vector.multi_reduction <maximumf>, %535, %cst_241 [1] : vector<8x8xf32> to vector<8xf32>
    %537 = vector.shape_cast %536 : vector<8xf32> to vector<8x1xf32>
    %538 = vector.broadcast %537 : vector<8x1xf32> to vector<8x8xf32>
    %539 = arith.subf %535, %538 : vector<8x8xf32>
    %540 = math.exp %539 : vector<8x8xf32>
    %cst_242 = arith.constant dense<0.000000e+00> : vector<8xf32>
    %541 = vector.multi_reduction <add>, %540, %cst_242 [1] : vector<8x8xf32> to vector<8xf32>
    %542 = vector.shape_cast %541 : vector<8xf32> to vector<8x1xf32>
    %543 = tpu.reciprocal %542 : vector<8x1xf32> -> vector<8x1xf32>
    %544 = vector.broadcast %543 : vector<8x1xf32> to vector<8x8xf32>
    %545 = arith.mulf %540, %544 : vector<8x8xf32>
    %cst_243 = arith.constant dense<0.000000e+00> : vector<8x16xf32>
    %546 = tpu.matmul %545, %532, %cst_243 {dimension_numbers = #tpu.dot_dimension_numbers<[1], [0], [0], [1], [0, 0, 1, 1], [], []>} : vector<8x8xf32>, vector<8x16xf32>, vector<8x16xf32> -> vector<8x16xf32>
    %547 = vector.extract_strided_slice %481 {offsets = [0, 48], sizes = [8, 16], strides = [1, 1]} : vector<16x64xf32> to vector<8x16xf32>
    %548 = vector.extract_strided_slice %488 {offsets = [0, 48], sizes = [8, 16], strides = [1, 1]} : vector<16x64xf32> to vector<8x16xf32>
    %549 = vector.extract_strided_slice %495 {offsets = [0, 48], sizes = [8, 16], strides = [1, 1]} : vector<16x64xf32> to vector<8x16xf32>
    %cst_244 = arith.constant dense<0.000000e+00> : vector<8x8xf32>
    %550 = tpu.matmul %547, %548, %cst_244 {dimension_numbers = #tpu.dot_dimension_numbers<[1], [1], [0], [0], [0, 0, 1, 0], [], []>} : vector<8x16xf32>, vector<8x16xf32>, vector<8x8xf32> -> vector<8x8xf32>
    %cst_245 = arith.constant 2.500000e-01 : f32
    %551 = vector.broadcast %cst_245 : f32 to vector<8x8xf32>
    %552 = arith.mulf %550, %551 : vector<8x8xf32>
    %cst_246 = arith.constant dense<0xFF800000> : vector<8xf32>
    %553 = vector.multi_reduction <maximumf>, %552, %cst_246 [1] : vector<8x8xf32> to vector<8xf32>
    %554 = vector.shape_cast %553 : vector<8xf32> to vector<8x1xf32>
    %555 = vector.broadcast %554 : vector<8x1xf32> to vector<8x8xf32>
    %556 = arith.subf %552, %555 : vector<8x8xf32>
    %557 = math.exp %556 : vector<8x8xf32>
    %cst_247 = arith.constant dense<0.000000e+00> : vector<8xf32>
    %558 = vector.multi_reduction <add>, %557, %cst_247 [1] : vector<8x8xf32> to vector<8xf32>
    %559 = vector.shape_cast %558 : vector<8xf32> to vector<8x1xf32>
    %560 = tpu.reciprocal %559 : vector<8x1xf32> -> vector<8x1xf32>
    %561 = vector.broadcast %560 : vector<8x1xf32> to vector<8x8xf32>
    %562 = arith.mulf %557, %561 : vector<8x8xf32>
    %cst_248 = arith.constant dense<0.000000e+00> : vector<8x16xf32>
    %563 = tpu.matmul %562, %549, %cst_248 {dimension_numbers = #tpu.dot_dimension_numbers<[1], [0], [0], [1], [0, 0, 1, 1], [], []>} : vector<8x8xf32>, vector<8x16xf32>, vector<8x16xf32> -> vector<8x16xf32>
    %564 = tpu.concatenate %512, %529, %546, %563 in 1 : vector<8x16xf32>, vector<8x16xf32>, vector<8x16xf32>, vector<8x16xf32> -> vector<8x64xf32>
    %565 = vector.extract_strided_slice %481 {offsets = [8, 0], sizes = [8, 16], strides = [1, 1]} : vector<16x64xf32> to vector<8x16xf32>
    %566 = vector.extract_strided_slice %488 {offsets = [8, 0], sizes = [8, 16], strides = [1, 1]} : vector<16x64xf32> to vector<8x16xf32>
    %567 = vector.extract_strided_slice %495 {offsets = [8, 0], sizes = [8, 16], strides = [1, 1]} : vector<16x64xf32> to vector<8x16xf32>
    %cst_249 = arith.constant dense<0.000000e+00> : vector<8x8xf32>
    %568 = tpu.matmul %565, %566, %cst_249 {dimension_numbers = #tpu.dot_dimension_numbers<[1], [1], [0], [0], [0, 0, 1, 0], [], []>} : vector<8x16xf32>, vector<8x16xf32>, vector<8x8xf32> -> vector<8x8xf32>
    %cst_250 = arith.constant 2.500000e-01 : f32
    %569 = vector.broadcast %cst_250 : f32 to vector<8x8xf32>
    %570 = arith.mulf %568, %569 : vector<8x8xf32>
    %cst_251 = arith.constant dense<0xFF800000> : vector<8xf32>
    %571 = vector.multi_reduction <maximumf>, %570, %cst_251 [1] : vector<8x8xf32> to vector<8xf32>
    %572 = vector.shape_cast %571 : vector<8xf32> to vector<8x1xf32>
    %573 = vector.broadcast %572 : vector<8x1xf32> to vector<8x8xf32>
    %574 = arith.subf %570, %573 : vector<8x8xf32>
    %575 = math.exp %574 : vector<8x8xf32>
    %cst_252 = arith.constant dense<0.000000e+00> : vector<8xf32>
    %576 = vector.multi_reduction <add>, %575, %cst_252 [1] : vector<8x8xf32> to vector<8xf32>
    %577 = vector.shape_cast %576 : vector<8xf32> to vector<8x1xf32>
    %578 = tpu.reciprocal %577 : vector<8x1xf32> -> vector<8x1xf32>
    %579 = vector.broadcast %578 : vector<8x1xf32> to vector<8x8xf32>
    %580 = arith.mulf %575, %579 : vector<8x8xf32>
    %cst_253 = arith.constant dense<0.000000e+00> : vector<8x16xf32>
    %581 = tpu.matmul %580, %567, %cst_253 {dimension_numbers = #tpu.dot_dimension_numbers<[1], [0], [0], [1], [0, 0, 1, 1], [], []>} : vector<8x8xf32>, vector<8x16xf32>, vector<8x16xf32> -> vector<8x16xf32>
    %582 = vector.extract_strided_slice %481 {offsets = [8, 16], sizes = [8, 16], strides = [1, 1]} : vector<16x64xf32> to vector<8x16xf32>
    %583 = vector.extract_strided_slice %488 {offsets = [8, 16], sizes = [8, 16], strides = [1, 1]} : vector<16x64xf32> to vector<8x16xf32>
    %584 = vector.extract_strided_slice %495 {offsets = [8, 16], sizes = [8, 16], strides = [1, 1]} : vector<16x64xf32> to vector<8x16xf32>
    %cst_254 = arith.constant dense<0.000000e+00> : vector<8x8xf32>
    %585 = tpu.matmul %582, %583, %cst_254 {dimension_numbers = #tpu.dot_dimension_numbers<[1], [1], [0], [0], [0, 0, 1, 0], [], []>} : vector<8x16xf32>, vector<8x16xf32>, vector<8x8xf32> -> vector<8x8xf32>
    %cst_255 = arith.constant 2.500000e-01 : f32
    %586 = vector.broadcast %cst_255 : f32 to vector<8x8xf32>
    %587 = arith.mulf %585, %586 : vector<8x8xf32>
    %cst_256 = arith.constant dense<0xFF800000> : vector<8xf32>
    %588 = vector.multi_reduction <maximumf>, %587, %cst_256 [1] : vector<8x8xf32> to vector<8xf32>
    %589 = vector.shape_cast %588 : vector<8xf32> to vector<8x1xf32>
    %590 = vector.broadcast %589 : vector<8x1xf32> to vector<8x8xf32>
    %591 = arith.subf %587, %590 : vector<8x8xf32>
    %592 = math.exp %591 : vector<8x8xf32>
    %cst_257 = arith.constant dense<0.000000e+00> : vector<8xf32>
    %593 = vector.multi_reduction <add>, %592, %cst_257 [1] : vector<8x8xf32> to vector<8xf32>
    %594 = vector.shape_cast %593 : vector<8xf32> to vector<8x1xf32>
    %595 = tpu.reciprocal %594 : vector<8x1xf32> -> vector<8x1xf32>
    %596 = vector.broadcast %595 : vector<8x1xf32> to vector<8x8xf32>
    %597 = arith.mulf %592, %596 : vector<8x8xf32>
    %cst_258 = arith.constant dense<0.000000e+00> : vector<8x16xf32>
    %598 = tpu.matmul %597, %584, %cst_258 {dimension_numbers = #tpu.dot_dimension_numbers<[1], [0], [0], [1], [0, 0, 1, 1], [], []>} : vector<8x8xf32>, vector<8x16xf32>, vector<8x16xf32> -> vector<8x16xf32>
    %599 = vector.extract_strided_slice %481 {offsets = [8, 32], sizes = [8, 16], strides = [1, 1]} : vector<16x64xf32> to vector<8x16xf32>
    %600 = vector.extract_strided_slice %488 {offsets = [8, 32], sizes = [8, 16], strides = [1, 1]} : vector<16x64xf32> to vector<8x16xf32>
    %601 = vector.extract_strided_slice %495 {offsets = [8, 32], sizes = [8, 16], strides = [1, 1]} : vector<16x64xf32> to vector<8x16xf32>
    %cst_259 = arith.constant dense<0.000000e+00> : vector<8x8xf32>
    %602 = tpu.matmul %599, %600, %cst_259 {dimension_numbers = #tpu.dot_dimension_numbers<[1], [1], [0], [0], [0, 0, 1, 0], [], []>} : vector<8x16xf32>, vector<8x16xf32>, vector<8x8xf32> -> vector<8x8xf32>
    %cst_260 = arith.constant 2.500000e-01 : f32
    %603 = vector.broadcast %cst_260 : f32 to vector<8x8xf32>
    %604 = arith.mulf %602, %603 : vector<8x8xf32>
    %cst_261 = arith.constant dense<0xFF800000> : vector<8xf32>
    %605 = vector.multi_reduction <maximumf>, %604, %cst_261 [1] : vector<8x8xf32> to vector<8xf32>
    %606 = vector.shape_cast %605 : vector<8xf32> to vector<8x1xf32>
    %607 = vector.broadcast %606 : vector<8x1xf32> to vector<8x8xf32>
    %608 = arith.subf %604, %607 : vector<8x8xf32>
    %609 = math.exp %608 : vector<8x8xf32>
    %cst_262 = arith.constant dense<0.000000e+00> : vector<8xf32>
    %610 = vector.multi_reduction <add>, %609, %cst_262 [1] : vector<8x8xf32> to vector<8xf32>
    %611 = vector.shape_cast %610 : vector<8xf32> to vector<8x1xf32>
    %612 = tpu.reciprocal %611 : vector<8x1xf32> -> vector<8x1xf32>
    %613 = vector.broadcast %612 : vector<8x1xf32> to vector<8x8xf32>
    %614 = arith.mulf %609, %613 : vector<8x8xf32>
    %cst_263 = arith.constant dense<0.000000e+00> : vector<8x16xf32>
    %615 = tpu.matmul %614, %601, %cst_263 {dimension_numbers = #tpu.dot_dimension_numbers<[1], [0], [0], [1], [0, 0, 1, 1], [], []>} : vector<8x8xf32>, vector<8x16xf32>, vector<8x16xf32> -> vector<8x16xf32>
    %616 = vector.extract_strided_slice %481 {offsets = [8, 48], sizes = [8, 16], strides = [1, 1]} : vector<16x64xf32> to vector<8x16xf32>
    %617 = vector.extract_strided_slice %488 {offsets = [8, 48], sizes = [8, 16], strides = [1, 1]} : vector<16x64xf32> to vector<8x16xf32>
    %618 = vector.extract_strided_slice %495 {offsets = [8, 48], sizes = [8, 16], strides = [1, 1]} : vector<16x64xf32> to vector<8x16xf32>
    %cst_264 = arith.constant dense<0.000000e+00> : vector<8x8xf32>
    %619 = tpu.matmul %616, %617, %cst_264 {dimension_numbers = #tpu.dot_dimension_numbers<[1], [1], [0], [0], [0, 0, 1, 0], [], []>} : vector<8x16xf32>, vector<8x16xf32>, vector<8x8xf32> -> vector<8x8xf32>
    %cst_265 = arith.constant 2.500000e-01 : f32
    %620 = vector.broadcast %cst_265 : f32 to vector<8x8xf32>
    %621 = arith.mulf %619, %620 : vector<8x8xf32>
    %cst_266 = arith.constant dense<0xFF800000> : vector<8xf32>
    %622 = vector.multi_reduction <maximumf>, %621, %cst_266 [1] : vector<8x8xf32> to vector<8xf32>
    %623 = vector.shape_cast %622 : vector<8xf32> to vector<8x1xf32>
    %624 = vector.broadcast %623 : vector<8x1xf32> to vector<8x8xf32>
    %625 = arith.subf %621, %624 : vector<8x8xf32>
    %626 = math.exp %625 : vector<8x8xf32>
    %cst_267 = arith.constant dense<0.000000e+00> : vector<8xf32>
    %627 = vector.multi_reduction <add>, %626, %cst_267 [1] : vector<8x8xf32> to vector<8xf32>
    %628 = vector.shape_cast %627 : vector<8xf32> to vector<8x1xf32>
    %629 = tpu.reciprocal %628 : vector<8x1xf32> -> vector<8x1xf32>
    %630 = vector.broadcast %629 : vector<8x1xf32> to vector<8x8xf32>
    %631 = arith.mulf %626, %630 : vector<8x8xf32>
    %cst_268 = arith.constant dense<0.000000e+00> : vector<8x16xf32>
    %632 = tpu.matmul %631, %618, %cst_268 {dimension_numbers = #tpu.dot_dimension_numbers<[1], [0], [0], [1], [0, 0, 1, 1], [], []>} : vector<8x8xf32>, vector<8x16xf32>, vector<8x16xf32> -> vector<8x16xf32>
    %633 = tpu.concatenate %581, %598, %615, %632 in 1 : vector<8x16xf32>, vector<8x16xf32>, vector<8x16xf32>, vector<8x16xf32> -> vector<8x64xf32>
    %634 = tpu.concatenate %564, %633 in 0 : vector<8x64xf32>, vector<8x64xf32> -> vector<16x64xf32>
    %c2_269 = arith.constant 2 : index
    %c0_270 = arith.constant 0 : index
    %c0_271 = arith.constant 0 : index
    %635 = vector.load %arg8[%c2_269, %c0_270, %c0_271] : memref<3x64x64xf32, #tpu.memory_space<vmem>>, vector<1x64x64xf32>
    %636 = vector.shape_cast %635 : vector<1x64x64xf32> to vector<64x64xf32>
    %cst_272 = arith.constant dense<0.000000e+00> : vector<16x64xf32>
    %637 = tpu.matmul %634, %636, %cst_272 {dimension_numbers = #tpu.dot_dimension_numbers<[1], [0], [0], [1], [0, 0, 1, 1], [], []>} : vector<16x64xf32>, vector<64x64xf32>, vector<16x64xf32> -> vector<16x64xf32>
    %c2_273 = arith.constant 2 : index
    %c0_274 = arith.constant 0 : index
    %c0_275 = arith.constant 0 : index
    %638 = vector.load %arg9[%c2_273, %c0_274, %c0_275] : memref<3x1x64xf32, #tpu.memory_space<vmem>>, vector<1x1x64xf32>
    %639 = vector.shape_cast %638 : vector<1x1x64xf32> to vector<1x64xf32>
    %640 = vector.broadcast %639 : vector<1x64xf32> to vector<16x64xf32>
    %641 = arith.addf %637, %640 : vector<16x64xf32>
    %642 = arith.addf %474, %641 : vector<16x64xf32>
    %c2_276 = arith.constant 2 : index
    %c0_277 = arith.constant 0 : index
    %c0_278 = arith.constant 0 : index
    %643 = vector.load %arg14[%c2_276, %c0_277, %c0_278] : memref<3x1x64xf32, #tpu.memory_space<vmem>>, vector<1x1x64xf32>
    %644 = vector.shape_cast %643 : vector<1x1x64xf32> to vector<1x64xf32>
    %c2_279 = arith.constant 2 : index
    %c0_280 = arith.constant 0 : index
    %c0_281 = arith.constant 0 : index
    %645 = vector.load %arg15[%c2_279, %c0_280, %c0_281] : memref<3x1x64xf32, #tpu.memory_space<vmem>>, vector<1x1x64xf32>
    %646 = vector.shape_cast %645 : vector<1x1x64xf32> to vector<1x64xf32>
    %cst_282 = arith.constant dense<0.000000e+00> : vector<16xf32>
    %647 = vector.multi_reduction <add>, %642, %cst_282 [1] : vector<16x64xf32> to vector<16xf32>
    %648 = vector.shape_cast %647 : vector<16xf32> to vector<16x1xf32>
    %cst_283 = arith.constant 6.400000e+01 : f32
    %649 = vector.broadcast %cst_283 : f32 to vector<16x1xf32>
    %650 = arith.divf %648, %649 : vector<16x1xf32>
    %651 = vector.broadcast %650 : vector<16x1xf32> to vector<16x64xf32>
    %652 = arith.subf %642, %651 : vector<16x64xf32>
    %653 = arith.mulf %652, %652 : vector<16x64xf32>
    %cst_284 = arith.constant dense<0.000000e+00> : vector<16xf32>
    %654 = vector.multi_reduction <add>, %653, %cst_284 [1] : vector<16x64xf32> to vector<16xf32>
    %655 = vector.shape_cast %654 : vector<16xf32> to vector<16x1xf32>
    %cst_285 = arith.constant 6.400000e+01 : f32
    %656 = vector.broadcast %cst_285 : f32 to vector<16x1xf32>
    %657 = arith.divf %655, %656 : vector<16x1xf32>
    %658 = vector.broadcast %650 : vector<16x1xf32> to vector<16x64xf32>
    %659 = arith.subf %642, %658 : vector<16x64xf32>
    %cst_286 = arith.constant 9.99999974E-6 : f32
    %660 = vector.broadcast %cst_286 : f32 to vector<16x1xf32>
    %661 = arith.addf %657, %660 : vector<16x1xf32>
    %662 = math.rsqrt %661 : vector<16x1xf32>
    %663 = vector.broadcast %662 : vector<16x1xf32> to vector<16x64xf32>
    %664 = arith.mulf %659, %663 : vector<16x64xf32>
    %665 = vector.broadcast %644 : vector<1x64xf32> to vector<16x64xf32>
    %666 = arith.mulf %664, %665 : vector<16x64xf32>
    %667 = vector.broadcast %646 : vector<1x64xf32> to vector<16x64xf32>
    %668 = arith.addf %666, %667 : vector<16x64xf32>
    %c2_287 = arith.constant 2 : index
    %c0_288 = arith.constant 0 : index
    %c0_289 = arith.constant 0 : index
    %669 = vector.load %arg10[%c2_287, %c0_288, %c0_289] : memref<3x64x256xf32, #tpu.memory_space<vmem>>, vector<1x64x256xf32>
    %670 = vector.shape_cast %669 : vector<1x64x256xf32> to vector<64x256xf32>
    %cst_290 = arith.constant dense<0.000000e+00> : vector<16x256xf32>
    %671 = tpu.matmul %668, %670, %cst_290 {dimension_numbers = #tpu.dot_dimension_numbers<[1], [0], [0], [1], [0, 0, 1, 1], [], []>} : vector<16x64xf32>, vector<64x256xf32>, vector<16x256xf32> -> vector<16x256xf32>
    %c2_291 = arith.constant 2 : index
    %c0_292 = arith.constant 0 : index
    %c0_293 = arith.constant 0 : index
    %672 = vector.load %arg11[%c2_291, %c0_292, %c0_293] : memref<3x1x256xf32, #tpu.memory_space<vmem>>, vector<1x1x256xf32>
    %673 = vector.shape_cast %672 : vector<1x1x256xf32> to vector<1x256xf32>
    %674 = vector.broadcast %673 : vector<1x256xf32> to vector<16x256xf32>
    %675 = arith.addf %671, %674 : vector<16x256xf32>
    %cst_294 = arith.constant 0.000000e+00 : f32
    %676 = vector.broadcast %cst_294 : f32 to vector<16x256xf32>
    %677 = arith.maximumf %675, %676 : vector<16x256xf32>
    %c2_295 = arith.constant 2 : index
    %c0_296 = arith.constant 0 : index
    %c0_297 = arith.constant 0 : index
    %678 = vector.load %arg12[%c2_295, %c0_296, %c0_297] : memref<3x256x64xf32, #tpu.memory_space<vmem>>, vector<1x256x64xf32>
    %679 = vector.shape_cast %678 : vector<1x256x64xf32> to vector<256x64xf32>
    %cst_298 = arith.constant dense<0.000000e+00> : vector<16x64xf32>
    %680 = tpu.matmul %677, %679, %cst_298 {dimension_numbers = #tpu.dot_dimension_numbers<[1], [0], [0], [1], [0, 0, 1, 1], [], []>} : vector<16x256xf32>, vector<256x64xf32>, vector<16x64xf32> -> vector<16x64xf32>
    %c2_299 = arith.constant 2 : index
    %c0_300 = arith.constant 0 : index
    %c0_301 = arith.constant 0 : index
    %681 = vector.load %arg13[%c2_299, %c0_300, %c0_301] : memref<3x1x64xf32, #tpu.memory_space<vmem>>, vector<1x1x64xf32>
    %682 = vector.shape_cast %681 : vector<1x1x64xf32> to vector<1x64xf32>
    %683 = vector.broadcast %682 : vector<1x64xf32> to vector<16x64xf32>
    %684 = arith.addf %680, %683 : vector<16x64xf32>
    %685 = arith.addf %668, %684 : vector<16x64xf32>
    %c2_302 = arith.constant 2 : index
    %c0_303 = arith.constant 0 : index
    %c0_304 = arith.constant 0 : index
    %686 = vector.load %arg16[%c2_302, %c0_303, %c0_304] : memref<3x1x64xf32, #tpu.memory_space<vmem>>, vector<1x1x64xf32>
    %687 = vector.shape_cast %686 : vector<1x1x64xf32> to vector<1x64xf32>
    %c2_305 = arith.constant 2 : index
    %c0_306 = arith.constant 0 : index
    %c0_307 = arith.constant 0 : index
    %688 = vector.load %arg17[%c2_305, %c0_306, %c0_307] : memref<3x1x64xf32, #tpu.memory_space<vmem>>, vector<1x1x64xf32>
    %689 = vector.shape_cast %688 : vector<1x1x64xf32> to vector<1x64xf32>
    %cst_308 = arith.constant dense<0.000000e+00> : vector<16xf32>
    %690 = vector.multi_reduction <add>, %685, %cst_308 [1] : vector<16x64xf32> to vector<16xf32>
    %691 = vector.shape_cast %690 : vector<16xf32> to vector<16x1xf32>
    %cst_309 = arith.constant 6.400000e+01 : f32
    %692 = vector.broadcast %cst_309 : f32 to vector<16x1xf32>
    %693 = arith.divf %691, %692 : vector<16x1xf32>
    %694 = vector.broadcast %693 : vector<16x1xf32> to vector<16x64xf32>
    %695 = arith.subf %685, %694 : vector<16x64xf32>
    %696 = arith.mulf %695, %695 : vector<16x64xf32>
    %cst_310 = arith.constant dense<0.000000e+00> : vector<16xf32>
    %697 = vector.multi_reduction <add>, %696, %cst_310 [1] : vector<16x64xf32> to vector<16xf32>
    %698 = vector.shape_cast %697 : vector<16xf32> to vector<16x1xf32>
    %cst_311 = arith.constant 6.400000e+01 : f32
    %699 = vector.broadcast %cst_311 : f32 to vector<16x1xf32>
    %700 = arith.divf %698, %699 : vector<16x1xf32>
    %701 = vector.broadcast %693 : vector<16x1xf32> to vector<16x64xf32>
    %702 = arith.subf %685, %701 : vector<16x64xf32>
    %cst_312 = arith.constant 9.99999974E-6 : f32
    %703 = vector.broadcast %cst_312 : f32 to vector<16x1xf32>
    %704 = arith.addf %700, %703 : vector<16x1xf32>
    %705 = math.rsqrt %704 : vector<16x1xf32>
    %706 = vector.broadcast %705 : vector<16x1xf32> to vector<16x64xf32>
    %707 = arith.mulf %702, %706 : vector<16x64xf32>
    %708 = vector.broadcast %687 : vector<1x64xf32> to vector<16x64xf32>
    %709 = arith.mulf %707, %708 : vector<16x64xf32>
    %710 = vector.broadcast %689 : vector<1x64xf32> to vector<16x64xf32>
    %711 = arith.addf %709, %710 : vector<16x64xf32>
    %712 = vector.extract_strided_slice %711 {offsets = [7, 0], sizes = [1, 64], strides = [1, 1]} : vector<16x64xf32> to vector<1x64xf32>
    %713 = vector.extract_strided_slice %711 {offsets = [15, 0], sizes = [1, 64], strides = [1, 1]} : vector<16x64xf32> to vector<1x64xf32>
    %714 = tpu.concatenate %712, %713 in 0 : vector<1x64xf32>, vector<1x64xf32> -> vector<2x64xf32>
    %c0_313 = arith.constant 0 : index
    %c0_314 = arith.constant 0 : index
    %715 = vector.load %arg18[%c0_313, %c0_314] : memref<64x1xf32, #tpu.memory_space<vmem>>, vector<64x1xf32>
    %cst_315 = arith.constant dense<0.000000e+00> : vector<2x1xf32>
    %716 = tpu.matmul %714, %715, %cst_315 {dimension_numbers = #tpu.dot_dimension_numbers<[1], [0], [0], [1], [0, 0, 1, 1], [], []>} : vector<2x64xf32>, vector<64x1xf32>, vector<2x1xf32> -> vector<2x1xf32>
    %c0_316 = arith.constant 0 : index
    %c0_317 = arith.constant 0 : index
    %717 = vector.load %arg19[%c0_316, %c0_317] : memref<1x1xf32, #tpu.memory_space<vmem>>, vector<1x1xf32>
    %718 = vector.broadcast %717 : vector<1x1xf32> to vector<2x1xf32>
    %719 = arith.addf %716, %718 : vector<2x1xf32>
    %c0_318 = arith.constant 0 : index
    %c0_319 = arith.constant 0 : index
    %720 = vector.load %arg20[%c0_318, %c0_319] : memref<2x1xf32, #tpu.memory_space<vmem>>, vector<2x1xf32>
    tpu.vector_store %arg20[%c0_318, %c0_319], %719 {strides = array<i32>} : memref<2x1xf32, #tpu.memory_space<vmem>>, vector<2x1xf32>,
    return
  }
  func.func @transform_0(%arg0: i32) -> (i32, i32) {
    %c0_i32 = arith.constant 0 : i32
    %c0_i32_0 = arith.constant 0 : i32
    %c0_i32_1 = arith.constant 0 : i32
    return %c0_i32, %c0_i32_0 : i32, i32
  }
  func.func @transform_1(%arg0: i32) -> (i32, i32, i32) {
    %c0_i32 = arith.constant 0 : i32
    %c0_i32_0 = arith.constant 0 : i32
    %c0_i32_1 = arith.constant 0 : i32
    %c0_i32_2 = arith.constant 0 : i32
    return %c0_i32, %c0_i32_0, %c0_i32_1 : i32, i32, i32
  }
  func.func @transform_2(%arg0: i32) -> (i32, i32, i32) {
    %c0_i32 = arith.constant 0 : i32
    %c0_i32_0 = arith.constant 0 : i32
    %c0_i32_1 = arith.constant 0 : i32
    %c0_i32_2 = arith.constant 0 : i32
    return %c0_i32, %c0_i32_0, %c0_i32_1 : i32, i32, i32
  }
  func.func @transform_3(%arg0: i32) -> (i32, i32, i32) {
    %c0_i32 = arith.constant 0 : i32
    %c0_i32_0 = arith.constant 0 : i32
    %c0_i32_1 = arith.constant 0 : i32
    %c0_i32_2 = arith.constant 0 : i32
    return %c0_i32, %c0_i32_0, %c0_i32_1 : i32, i32, i32
  }
  func.func @transform_4(%arg0: i32) -> (i32, i32, i32) {
    %c0_i32 = arith.constant 0 : i32
    %c0_i32_0 = arith.constant 0 : i32
    %c0_i32_1 = arith.constant 0 : i32
    %c0_i32_2 = arith.constant 0 : i32
    return %c0_i32, %c0_i32_0, %c0_i32_1 : i32, i32, i32
  }
  func.func @transform_5(%arg0: i32) -> (i32, i32, i32) {
    %c0_i32 = arith.constant 0 : i32
    %c0_i32_0 = arith.constant 0 : i32
    %c0_i32_1 = arith.constant 0 : i32
    %c0_i32_2 = arith.constant 0 : i32
    return %c0_i32, %c0_i32_0, %c0_i32_1 : i32, i32, i32
  }
  func.func @transform_6(%arg0: i32) -> (i32, i32, i32) {
    %c0_i32 = arith.constant 0 : i32
    %c0_i32_0 = arith.constant 0 : i32
    %c0_i32_1 = arith.constant 0 : i32
    %c0_i32_2 = arith.constant 0 : i32
    return %c0_i32, %c0_i32_0, %c0_i32_1 : i32, i32, i32
  }
  func.func @transform_7(%arg0: i32) -> (i32, i32, i32) {
    %c0_i32 = arith.constant 0 : i32
    %c0_i32_0 = arith.constant 0 : i32
    %c0_i32_1 = arith.constant 0 : i32
    %c0_i32_2 = arith.constant 0 : i32
    return %c0_i32, %c0_i32_0, %c0_i32_1 : i32, i32, i32
  }
  func.func @transform_8(%arg0: i32) -> (i32, i32, i32) {
    %c0_i32 = arith.constant 0 : i32
    %c0_i32_0 = arith.constant 0 : i32
    %c0_i32_1 = arith.constant 0 : i32
    %c0_i32_2 = arith.constant 0 : i32
    return %c0_i32, %c0_i32_0, %c0_i32_1 : i32, i32, i32
  }
  func.func @transform_9(%arg0: i32) -> (i32, i32, i32) {
    %c0_i32 = arith.constant 0 : i32
    %c0_i32_0 = arith.constant 0 : i32
    %c0_i32_1 = arith.constant 0 : i32
    %c0_i32_2 = arith.constant 0 : i32
    return %c0_i32, %c0_i32_0, %c0_i32_1 : i32, i32, i32
  }
  func.func @transform_10(%arg0: i32) -> (i32, i32, i32) {
    %c0_i32 = arith.constant 0 : i32
    %c0_i32_0 = arith.constant 0 : i32
    %c0_i32_1 = arith.constant 0 : i32
    %c0_i32_2 = arith.constant 0 : i32
    return %c0_i32, %c0_i32_0, %c0_i32_1 : i32, i32, i32
  }
  func.func @transform_11(%arg0: i32) -> (i32, i32, i32) {
    %c0_i32 = arith.constant 0 : i32
    %c0_i32_0 = arith.constant 0 : i32
    %c0_i32_1 = arith.constant 0 : i32
    %c0_i32_2 = arith.constant 0 : i32
    return %c0_i32, %c0_i32_0, %c0_i32_1 : i32, i32, i32
  }
  func.func @transform_12(%arg0: i32) -> (i32, i32, i32) {
    %c0_i32 = arith.constant 0 : i32
    %c0_i32_0 = arith.constant 0 : i32
    %c0_i32_1 = arith.constant 0 : i32
    %c0_i32_2 = arith.constant 0 : i32
    return %c0_i32, %c0_i32_0, %c0_i32_1 : i32, i32, i32
  }
  func.func @transform_13(%arg0: i32) -> (i32, i32, i32) {
    %c0_i32 = arith.constant 0 : i32
    %c0_i32_0 = arith.constant 0 : i32
    %c0_i32_1 = arith.constant 0 : i32
    %c0_i32_2 = arith.constant 0 : i32
    return %c0_i32, %c0_i32_0, %c0_i32_1 : i32, i32, i32
  }
  func.func @transform_14(%arg0: i32) -> (i32, i32, i32) {
    %c0_i32 = arith.constant 0 : i32
    %c0_i32_0 = arith.constant 0 : i32
    %c0_i32_1 = arith.constant 0 : i32
    %c0_i32_2 = arith.constant 0 : i32
    return %c0_i32, %c0_i32_0, %c0_i32_1 : i32, i32, i32
  }
  func.func @transform_15(%arg0: i32) -> (i32, i32, i32) {
    %c0_i32 = arith.constant 0 : i32
    %c0_i32_0 = arith.constant 0 : i32
    %c0_i32_1 = arith.constant 0 : i32
    %c0_i32_2 = arith.constant 0 : i32
    return %c0_i32, %c0_i32_0, %c0_i32_1 : i32, i32, i32
  }
  func.func @transform_16(%arg0: i32) -> (i32, i32, i32) {
    %c0_i32 = arith.constant 0 : i32
    %c0_i32_0 = arith.constant 0 : i32
    %c0_i32_1 = arith.constant 0 : i32
    %c0_i32_2 = arith.constant 0 : i32
    return %c0_i32, %c0_i32_0, %c0_i32_1 : i32, i32, i32
  }
  func.func @transform_17(%arg0: i32) -> (i32, i32) {
    %c0_i32 = arith.constant 0 : i32
    %c0_i32_0 = arith.constant 0 : i32
    %c0_i32_1 = arith.constant 0 : i32
    return %c0_i32, %c0_i32_0 : i32, i32
  }
  func.func @transform_18(%arg0: i32) -> (i32, i32) {
    %c0_i32 = arith.constant 0 : i32
    %c0_i32_0 = arith.constant 0 : i32
    %c0_i32_1 = arith.constant 0 : i32
    return %c0_i32, %c0_i32_0 : i32, i32
  }
  func.func @transform_19(%arg0: i32) -> (i32, i32) {
    %c0_i32 = arith.constant 0 : i32
    %c0_i32_0 = arith.constant 0 : i32
    %c0_i32_1 = arith.constant 0 : i32
    return %c0_i32, %c0_i32_0 : i32, i32
  }
}

</mosaic_0001>

<bundles_post_ra>
// kernel: tpu_custom_call.1
= control target key start
LH: loop header
LB: loop body
LE: loop exit
PB: predicated region body
PF: predicated region fallthrough
CT: control target
= control target key end

     0   :  { %vm81_vm0 = vcmask 523264   ;;  %v7600_v26 = vmov 0.0   ;;  %vm7601_vm1 = vmmov 0   ;;  %vm343_vm2 = vcmask 130048   ;;  %s9238_s23 = smov 112   ;;  %s9236_s24 = smov 96   ;;  %s9204_s1 = inlined_call_operand.vmem [shape: f32[3,64,64], index: 1, kind: input, shape index: {}]   ;;  %s9205_s0 = inlined_call_operand.vmem [shape: f32[16,64], index: 0, kind: input, shape index: {}]   ;;  %s9206_s3 = inlined_call_operand.vmem [shape: f32[3,64,64], index: 3, kind: input, shape index: {}]   ;;  %s9207_s5 = inlined_call_operand.vmem [shape: f32[3,64,64], index: 5, kind: input, shape index: {}]   ;;  %s9208_s4 = inlined_call_operand.vmem [shape: f32[3,1,64], index: 4, kind: input, shape index: {}]   ;;  %s9209_s2 = inlined_call_operand.vmem [shape: f32[3,1,64], index: 2, kind: input, shape index: {}]   ;;  %s9210_s6 = inlined_call_operand.vmem [shape: f32[3,1,64], index: 6, kind: input, shape index: {}]   ;;  %s9211_s7 = inlined_call_operand.vmem [shape: f32[3,64,64], index: 7, kind: input, shape index: {}]   ;;  %s9212_s8 = inlined_call_operand.vmem [shape: f32[3,1,64], index: 8, kind: input, shape index: {}]   ;;  %s9213_s9 = inlined_call_operand.vmem [shape: f32[3,64,256], index: 9, kind: input, shape index: {}]   ;;  %s9214_s11 = inlined_call_operand.vmem [shape: f32[3,256,64], index: 11, kind: input, shape index: {}]   ;;  %s9215_s13 = inlined_call_operand.vmem [shape: f32[3,1,64], index: 13, kind: input, shape index: {}]   ;;  %s9216_s14 = inlined_call_operand.vmem [shape: f32[3,1,64], index: 14, kind: input, shape index: {}]   ;;  %s9217_s10 = inlined_call_operand.vmem [shape: f32[3,1,256], index: 10, kind: input, shape index: {}]   ;;  %s9218_s12 = inlined_call_operand.vmem [shape: f32[3,1,64], index: 12, kind: input, shape index: {}]   ;;  %s9219_s15 = inlined_call_operand.vmem [shape: f32[3,1,64], index: 15, kind: input, shape index: {}]   ;;  %s9220_s16 = inlined_call_operand.vmem [shape: f32[3,1,64], index: 16, kind: input, shape index: {}]   ;;  %s9221_s17 = inlined_call_operand.vmem [shape: f32[64,1], index: 17, kind: input, shape index: {}]   ;;  %s9222_s18 = inlined_call_operand.<no memory space> [shape: f32[1,1], index: 18, kind: input, shape index: {}]   ;;  %s9223_s19 = inlined_call_operand.vmem [shape: f32[2,1], index: 19, kind: output, shape index: {}]  }
   0x1   :  { %9240 = sst [smem:[#allocation3_spill]] %s9204_s1  ;;  %v6338_v30 = vld [vmem:[%s9208_s4] ss:$0 sm:$0xff]  ;;  %vm421_vm3 = vcmask 64512   ;;  %s9230_s30 = smov 32   ;;  %vm1018_vm4 = vcmask 261120  }
   0x2   :  { %9241 = sst [smem:[#allocation4_spill]] %s9205_s0  ;;  %v6335_v32 = vld [vmem:[%s9209_s2] ss:$0 sm:$0xff]  ;;  %s9228_s28 = smov 48   ;;  %vm1020_vm5 = vcmask 392192   ;;  %vm6239_vm6 = vcmask 1040384  }
   0x3   :  { %9242 = sst [smem:[#allocation5_spill]] %s9206_s3  ;;  %v6341_v37 = vld [vmem:[%s9210_s6] ss:$0 sm:$0xff]  ;;  %s9232_s3 = smov 16   ;;  %vm6329_vm7 = vcmask 1024  }
   0x4   :  { %9243 = sst [smem:[#allocation6_spill]] %s9207_s5  ;;  %s9234_s5 = smov 80  }
   0x5   :  { %9244 = sst [smem:[#allocation7_spill]] %s9222_s18  ;;  %s9250_s29 = smov 80  }
   0x6   :  { %9245 = sst [smem:[#allocation8_spill]] %s9223_s19  ;;  %s9251_s27 = smov 16  }
   0x7   :  { %s9246_s20 = sld [smem:[#allocation3_spill]] }
   0x8   :  { %s9247_s25 = sld [smem:[#allocation4_spill]] }
   0x9   :  { %s9248_s26 = sld [smem:[#allocation5_spill]] }
   0xa   :  { %s9249_s1 = sld [smem:[#allocation6_spill]] }
   0xd   :  { %v73_v0 = vld [vmem:[%s9246_s20 + $0x38] sm:$0xff]  ;;  %v72_v1 = vld [vmem:[%s9246_s20 + $0x30] sm:$0xff]  ;;  %v71_v2 = vld [vmem:[%s9246_s20 + $0x28] sm:$0xff] }
   0xe   :  { %6985 = vmatprep.subr.mxu1 %v73_v0  ;;  %v7720_v3 = vld [vmem:[%s9247_s25] sm:$0xff]  ;;  %v69_v5 = vld [vmem:[%s9246_s20 + $0x18] sm:$0xff]  ;;  %v68_v6 = vld [vmem:[%s9246_s20 + $0x10] sm:$0xff] }
   0xf   :  { %6986 = vmatpush3.msra.mxu1 %v73_v0  ;;  %7001 = vmatprep.mubr.msk.f32.mxu1 %vm81_vm0, %v7720_v3  ;;  %v70_v4 = vld [vmem:[%s9246_s20 + $0x20] sm:$0xff]  ;;  %v67_v7 = vld [vmem:[%s9246_s20 + $0x8] sm:$0xff]  ;;  %v170_v10 = vld [vmem:[%s9248_s26 + $0x38] sm:$0xff] }
  0x10   :  { %6987 = vmatprep.subr.mxu1 %v72_v1  ;;  %7039 = vmatprep.mubr.msk.f32.mxu0 %vm81_vm0, %v7720_v3  ;;  %v66_v8 = vld [vmem:[%s9246_s20] sm:$0xff]  ;;  %v7744_v9 = vld [vmem:[%s9247_s25 + $0x8] sm:$0xff]  ;;  %v169_v11 = vld [vmem:[%s9248_s26 + $0x30] sm:$0xff]  ;;  %s9253_s25 = smov 48  }
  0x11   :  { %6988 = vmatpush3.msra.mxu1 %v72_v1  ;;  %v168_v12 = vld [vmem:[%s9248_s26 + $0x28] sm:$0xff]  ;;  %v167_v13 = vld [vmem:[%s9248_s26 + $0x20] sm:$0xff]  ;;  %v166_v14 = vld [vmem:[%s9248_s26 + $0x18] sm:$0xff] }
  0x12   :  { %6989 = vmatprep.subr.mxu1 %v71_v2  ;;  %v165_v15 = vld [vmem:[%s9248_s26 + $0x10] sm:$0xff]  ;;  %v164_v16 = vld [vmem:[%s9248_s26 + $0x8] sm:$0xff]  ;;  %v163_v17 = vld [vmem:[%s9248_s26] sm:$0xff] }
  0x13   :  { %6990 = vmatpush3.msra.mxu1 %v71_v2  ;;  %v260_v18 = vld [vmem:[%s9249_s1 + $0x38] sm:$0xff]  ;;  %v259_v19 = vld [vmem:[%s9249_s1 + $0x30] sm:$0xff]  ;;  %v258_v20 = vld [vmem:[%s9249_s1 + $0x28] sm:$0xff] }
  0x14   :  { %6991 = vmatprep.subr.mxu1 %v70_v4  ;;  %7023 = vmatprep.subr.mxu0 %v260_v18  ;;  %v257_v21 = vld [vmem:[%s9249_s1 + $0x20] sm:$0xff]  ;;  %v256_v22 = vld [vmem:[%s9249_s1 + $0x18] sm:$0xff]  ;;  %v255_v23 = vld [vmem:[%s9249_s1 + $0x10] sm:$0xff] }
  0x15   :  { %6992 = vmatpush3.msra.mxu1 %v70_v4  ;;  %7024 = vmatpush3.msra.mxu0 %v260_v18  ;;  %v254_v24 = vld [vmem:[%s9249_s1 + $0x8] sm:$0xff]  ;;  %v253_v25 = vld [vmem:[%s9249_s1] sm:$0xff] }
  0x16   :  { %6993 = vmatprep.subr.mxu1 %v69_v5  ;;  %7025 = vmatprep.subr.mxu0 %v259_v19 }
  0x17   :  { %6994 = vmatpush3.msra.mxu1 %v69_v5  ;;  %7026 = vmatpush3.msra.mxu0 %v259_v19 }
  0x18   :  { %6995 = vmatprep.subr.mxu1 %v68_v6  ;;  %7027 = vmatprep.subr.mxu0 %v258_v20 }
  0x19   :  { %6996 = vmatpush3.msra.mxu1 %v68_v6  ;;  %7028 = vmatpush3.msra.mxu0 %v258_v20 }
  0x1a   :  { %6997 = vmatprep.subr.mxu1 %v67_v7  ;;  %7029 = vmatprep.subr.mxu0 %v257_v21 }
  0x1b   :  { %6998 = vmatpush3.msra.mxu1 %v67_v7  ;;  %7030 = vmatpush3.msra.mxu0 %v257_v21 }
  0x1c   :  { %6999 = vmatprep.subr.mxu1 %v66_v8  ;;  %7031 = vmatprep.subr.mxu0 %v256_v22 }
  0x1d   :  { %7000 = vmatpush3.msra.mxu1 %v66_v8  ;;  %7032 = vmatpush3.msra.mxu0 %v256_v22 }
  0x1e   :  { %7002 = vmatmul.mubr.msk.f32.vlgmr.msra.gmra.mxu1 %vm81_vm0, %v7744_v9  ;;  %7004 = vmatprep.subr.mxu1 %v170_v10 }
  0x1f   :  { %7005 = vmatpush3.msra.mxu1 %v170_v10  ;;  %7020 = vmatprep.mubr.msk.f32.mxu1 %vm81_vm0, %v7720_v3 }
  0x20   :  { %7006 = vmatprep.subr.mxu1 %v169_v11  ;;  %7033 = vmatprep.subr.mxu0 %v255_v23 }
  0x21   :  { %7007 = vmatpush3.msra.mxu1 %v169_v11  ;;  %7034 = vmatpush3.msra.mxu0 %v255_v23 }
  0x22   :  { %7008 = vmatprep.subr.mxu1 %v168_v12  ;;  %7035 = vmatprep.subr.mxu0 %v254_v24 }
  0x23   :  { %7009 = vmatpush3.msra.mxu1 %v168_v12  ;;  %7036 = vmatpush3.msra.mxu0 %v254_v24 }
  0x24   :  { %7010 = vmatprep.subr.mxu1 %v167_v13  ;;  %7037 = vmatprep.subr.mxu0 %v253_v25 }
  0x25   :  { %7011 = vmatpush3.msra.mxu1 %v167_v13  ;;  %7038 = vmatpush3.msra.mxu0 %v253_v25 }
  0x26   :  { %7012 = vmatprep.subr.mxu1 %v166_v14  ;;  %7040 = vmatmul.mubr.msk.f32.vlgmr.msra.gmra.mxu0 %vm81_vm0, %v7744_v9 }
  0x27   :  { %7013 = vmatpush3.msra.mxu1 %v166_v14  ;;  %7042 = vmatprep.subr.mxu0 %v7600_v26 }
  0x28   :  { %7014 = vmatprep.subr.mxu1 %v165_v15  ;;  %7044 = vmatprep.mubr.msk.f32.mxu0 %vm7601_vm1, %v7600_v26 }
  0x29   :  { %7015 = vmatpush3.msra.mxu1 %v165_v15 }
  0x2a   :  { %7016 = vmatprep.subr.mxu1 %v164_v16 }
  0x2b   :  { %7017 = vmatpush3.msra.mxu1 %v164_v16 }
  0x2c   :  { %7018 = vmatprep.subr.mxu1 %v163_v17 }
  0x2d   :  { %7019 = vmatpush3.msra.mxu1 %v163_v17 }
  0x2e   :  { %7021 = vmatmul.mubr.msk.f32.vlgmr.msra.gmra.mxu1 %vm81_vm0, %v7744_v9  ;;  %7047 = vmatprep.subr.mxu1 %v7600_v26 }
  0x2f   :  { %7049 = vmatprep.mubr.msk.f32.mxu1 %vm7601_vm1, %v7600_v26 }
  0xde   :  { %v7003_v27 = vpop.f32.mrf.mxu1 }
  0xdf   :  { %v160_v36 = vadd.f32 %v7003_v27, %v6335_v32 }
  0xe0   :  { %v154_v28 = vpop.f32.mrf.mxu1 }
  0xe1   :  { %v155_v34 = vadd.f32 %v6335_v32, %v154_v28 }
  0xe6   :  { %v7041_v38 = vpop.f32.mrf.mxu0 }
  0xe7   :  { %v7831_v39 = vadd.f32 %v7041_v38, %v6341_v37 }
  0xe8   :  { %v334_v40 = vpop.f32.mrf.mxu0 }
  0xe9   :  { %v7833_v41 = vadd.f32 %v6341_v37, %v334_v40 }
  0xeb   :  { %7048 = vmatpush3.msra.mxu1 %v7833_v41 }
  0xec   :  { %7052 = vmatprep.subr.mxu1 %v7600_v26 }
  0xee   :  { %v7022_v29 = vpop.f32.mrf.mxu1 }
  0xef   :  { %v250_v35 = vadd.f32 %v7022_v29, %v6338_v30 }
  0xf0   :  { %v244_v31 = vpop.f32.mrf.mxu1 }
  0xf1   :  { %v245_v33 = vadd.f32 %v6338_v30, %v244_v31 }
  0xf3   :  { %508 = vrot.lane.b32.xlu1 %v245_v33, %s9238_s23  ;;  %7043 = vmatpush3.xpose.msk.msra.mxu0 %vm343_vm2, %v245_v33 }
  0xf4   :  { %7062 = vmatprep.subr.mxu0 %v7600_v26 }
  0xf6   :  { %7045 = vmatmul.mubr.msk.f32.vlgmr.msra.gmra.mxu0 %vm343_vm2, %v155_v34 }
  0xf7   :  { %506 = vrot.lane.b32.xlu1 %v155_v34, %s9238_s23  ;;  %7064 = vmatprep.mubr.msk.f32.mxu0 %vm7601_vm1, %v7600_v26 }
  0xfb   :  { %673 = vrot.lane.b32.xlu1 %v155_v34, %s9236_s24 }
  0xff   :  { %841 = vrot.lane.b32.xlu1 %v245_v33, %s9234_s5 }
 0x103   :  { %839 = vrot.lane.b32.xlu1 %v155_v34, %s9234_s5 }
 0x107   :  { %1185 = vrot.lane.b32.xlu1 %v250_v35, %s9238_s23 }
 0x10b   :  { %1183 = vrot.lane.b32.xlu1 %v160_v36, %s9238_s23 }
 0x10f   :  { %1352 = vrot.lane.b32.xlu1 %v250_v35, %s9236_s24 }
 0x113   :  { %1518 = vrot.lane.b32.xlu1 %v250_v35, %s9234_s5 }
 0x165   :  { %v509_v51 = vpop.permute.xlu1 %508 }
 0x169   :  { %v507_v52 = vpop.permute.xlu1 %506 }
 0x16d   :  { %v674_v53 = vpop.permute.xlu1 %673 }
 0x171   :  { %v842_v54 = vpop.permute.xlu1 %841 }
 0x175   :  { %v840_v55 = vpop.permute.xlu1 %839 }
 0x179   :  { %v1186_v58 = vpop.permute.xlu1 %1185 }
 0x17d   :  { %v1184_v59 = vpop.permute.xlu1 %1183 }
 0x181   :  { %v1353_v62 = vpop.permute.xlu1 %1352 }
 0x185   :  { %v1519_v0 = vpop.permute.xlu1 %1518 }
 0x1b6   :  { %v416_v42 = vpop.f32.mrf.mxu0 }
 0x1b7   :  { %v420_v43 = vmul.f32 0.25, %v416_v42 }
 0x1b8   :  { %v7046_v44 = vpop.f32.mrf.mxu0 }
 0x1b9   :  { %v422_v45 = vsel %vm421_vm3, %v420_v43, -inf }
 0x1ba   :  { %423 = vmax.xlane.f32.xlu0 %v422_v45 }
 0x243   :  { %v424_v46 = vpop.xlane.xlu0 %423 }
 0x244   :  { %v425_v47 = vsub.f32 %v420_v43, %v424_v46 }
 0x246   :  { %v426_v48 = vmul.f32 1.442695, %v425_v47 }
 0x248   :  { %7480 = vpow2.f32 %v426_v48 }
 0x255   :  { %v7481_v49 = vpop.eup %7480 }
 0x256   :  { %v428_v50 = vsel %vm421_vm3, %v7481_v49, 0.0 }
 0x257   :  { %429 = vadd.xlane.f32.xlu0 %v428_v50 }
 0x26d   :  { %675 = vrot.lane.b32.xlu0 %v245_v33, %s9236_s24 }
 0x271   :  { %1350 = vrot.lane.b32.xlu0 %v160_v36, %s9236_s24 }
 0x275   :  { %1516 = vrot.lane.b32.xlu0 %v160_v36, %s9234_s5 }
 0x2e0   :  { %v430_v56 = vpop.xlane.xlu0 %429 }
 0x2e1   :  { %7482 = vrcp.f32 %v430_v56 }
 0x2e4   :  { %v676_v57 = vpop.permute.xlu0 %675 }
 0x2e5   :  { %7063 = vmatpush3.xpose.msk.msra.mxu0 %vm343_vm2, %v676_v57 }
 0x2e6   :  { %7072 = vmatprep.subr.mxu0 %v7600_v26 }
 0x2e8   :  { %7065 = vmatmul.mubr.msk.f32.vlgmr.msra.gmra.mxu0 %vm343_vm2, %v674_v53  ;;  %v1351_v63 = vpop.permute.xlu0 %1350 }
 0x2e9   :  { %7073 = vmatpush3.xpose.msk.msra.mxu0 %vm343_vm2, %v842_v54  ;;  %7074 = vmatprep.mubr.msk.f32.mxu0 %vm7601_vm1, %v7600_v26 }
 0x2ea   :  { %7082 = vmatprep.subr.mxu0 %v7600_v26 }
 0x2ec   :  { %7075 = vmatmul.mubr.msk.f32.vlgmr.msra.gmra.mxu0 %vm343_vm2, %v840_v55  ;;  %v1517_v1 = vpop.permute.xlu0 %1516 }
 0x2ed   :  { %7083 = vmatpush3.xpose.msk.msra.mxu0 %vm343_vm2, %v250_v35  ;;  %7084 = vmatprep.mubr.msk.f32.mxu0 %vm7601_vm1, %v7600_v26 }
 0x2ee   :  { %v7483_v60 = vpop.eup %7482  ;;  %7092 = vmatprep.subr.mxu0 %v7600_v26 }
 0x2ef   :  { %v432_v61 = vmul.f32 %v7483_v60, %v7481_v49 }
 0x2f0   :  { %7085 = vmatmul.mubr.msk.f32.vlgmr.msra.gmra.mxu0 %vm343_vm2, %v160_v36 }
 0x2f1   :  { %7050 = vmatmul.mubr.msk.f32.vlgmr.msra.gmra.mxu1 %vm421_vm3, %v432_v61  ;;  %7093 = vmatpush3.xpose.msk.msra.mxu0 %vm343_vm2, %v1186_v58 }
 0x2f2   :  { %7053 = vmatpush3.xpose.msk.msra.mxu1 %vm343_vm2, %v509_v51  ;;  %7094 = vmatprep.mubr.msk.f32.mxu0 %vm7601_vm1, %v7600_v26 }
 0x2f3   :  { %7054 = vmatprep.mubr.msk.f32.mxu1 %vm7601_vm1, %v7600_v26  ;;  %7102 = vmatprep.subr.mxu0 %v7600_v26 }
 0x2f4   :  { %7095 = vmatmul.mubr.msk.f32.vlgmr.msra.gmra.mxu0 %vm343_vm2, %v1184_v59  ;;  %7057 = vmatprep.subr.mxu1 %v7600_v26 }
 0x2f5   :  { %7055 = vmatmul.mubr.msk.f32.vlgmr.msra.gmra.mxu1 %vm343_vm2, %v507_v52  ;;  %7103 = vmatpush3.xpose.msk.msra.mxu0 %vm343_vm2, %v1353_v62 }
 0x2f6   :  { %7104 = vmatprep.mubr.msk.f32.mxu0 %vm7601_vm1, %v7600_v26  ;;  %7112 = vmatprep.subr.mxu0 %v7600_v26 }
 0x2f7   :  { %7059 = vmatprep.mubr.msk.f32.mxu1 %vm7601_vm1, %v7600_v26 }
 0x2f8   :  { %7105 = vmatmul.mubr.msk.f32.vlgmr.msra.gmra.mxu0 %vm343_vm2, %v1351_v63 }
 0x2f9   :  { %7113 = vmatpush3.xpose.msk.msra.mxu0 %vm343_vm2, %v1519_v0  ;;  %7114 = vmatprep.mubr.msk.f32.mxu0 %vm7601_vm1, %v7600_v26 }
 0x2fc   :  { %7115 = vmatmul.mubr.msk.f32.vlgmr.msra.gmra.mxu0 %vm343_vm2, %v1517_v1 }
 0x3a8   :  { %v747_v2 = vpop.f32.mrf.mxu0 }
 0x3a9   :  { %v751_v4 = vmul.f32 0.25, %v747_v2 }
 0x3aa   :  { %v7066_v5 = vpop.f32.mrf.mxu0 }
 0x3ab   :  { %v752_v6 = vsel %vm421_vm3, %v751_v4, -inf }
 0x3ac   :  { %753 = vmax.xlane.f32.xlu0 %v752_v6  ;;  %v913_v7 = vpop.f32.mrf.mxu0 }
 0x3ad   :  { %v917_v8 = vmul.f32 0.25, %v913_v7 }
 0x3ae   :  { %v7076_v10 = vpop.f32.mrf.mxu0 }
 0x3af   :  { %v918_v11 = vsel %vm421_vm3, %v917_v8, -inf }
 0x3b0   :  { %919 = vmax.xlane.f32.xlu0 %v918_v11  ;;  %v1094_v12 = vpop.f32.mrf.mxu0 }
 0x3b1   :  { %v7879_v13 = vpop.f32.mrf.mxu1  ;;  %v1098_v23 = vmul.f32 0.25, %v1094_v12 }
 0x3b2   :  { %v7086_v14 = vpop.f32.mrf.mxu0 }
 0x3b3   :  { %v7051_v15 = vpop.f32.mrf.mxu1  ;;  %v1099_v30 = vsel %vm421_vm3, %v1098_v23, -inf }
 0x3b4   :  { %v1257_v16 = vpop.f32.mrf.mxu0 }
 0x3b5   :  { %v1261_v17 = vmul.f32 0.25, %v1257_v16  ;;  %v580_v18 = vpop.f32.mrf.mxu1 }
 0x3b6   :  { %v7881_v19 = vmul.f32 0.25, %v580_v18  ;;  %v7096_v20 = vpop.f32.mrf.mxu0 }
 0x3b7   :  { %v7056_v21 = vpop.f32.mrf.mxu1  ;;  %v1262_v22 = vsel %vm421_vm3, %v1261_v17, -inf }
 0x3b8   :  { %1263 = vmax.xlane.f32.xlu0 %v1262_v22  ;;  %v1424_v24 = vpop.f32.mrf.mxu0  ;;  %v585_v25 = vsel %vm421_vm3, %v7881_v19, -inf }
 0x3b9   :  { %586 = vmax.xlane.f32.xlu1 %v585_v25  ;;  %v1428_v28 = vmul.f32 0.25, %v1424_v24 }
 0x3ba   :  { %v7106_v27 = vpop.f32.mrf.mxu0 }
 0x3bb   :  { %v1429_v34 = vsel %vm421_vm3, %v1428_v28, -inf }
 0x3bc   :  { %v1590_v29 = vpop.f32.mrf.mxu0 }
 0x3bd   :  { %v1594_v31 = vmul.f32 0.25, %v1590_v29  ;;  %1100 = vmax.xlane.f32.xlu1 %v1099_v30 }
 0x3be   :  { %v7116_v32 = vpop.f32.mrf.mxu0 }
 0x3bf   :  { %v1595_v33 = vsel %vm421_vm3, %v1594_v31, -inf }
 0x3c0   :  { %1596 = vmax.xlane.f32.xlu0 %v1595_v33 }
 0x3c1   :  { %1430 = vmax.xlane.f32.xlu1 %v1429_v34 }
 0x435   :  { %v754_v35 = vpop.xlane.xlu0 %753 }
 0x436   :  { %v755_v36 = vsub.f32 %v751_v4, %v754_v35 }
 0x438   :  { %v756_v37 = vmul.f32 1.442695, %v755_v36 }
 0x439   :  { %v920_v38 = vpop.xlane.xlu0 %919 }
 0x43a   :  { %7484 = vpow2.f32 %v756_v37  ;;  %v921_v40 = vsub.f32 %v917_v8, %v920_v38  ;;  %v1704_v37 = vld [vmem:[%s9211_s7 + $0x38] sm:$0xff]  ;;  %v1703_v38 = vld [vmem:[%s9211_s7 + $0x30] sm:$0xff] }
 0x43b   :  { %7122 = vmatprep.subr.mxu0 %v1704_v37 }
 0x43c   :  { %v922_v42 = vmul.f32 1.442695, %v921_v40  ;;  %7123 = vmatpush3.msra.mxu0 %v1704_v37  ;;  %v1702_v40 = vld [vmem:[%s9211_s7 + $0x28] sm:$0xff] }
 0x43d   :  { %7124 = vmatprep.subr.mxu0 %v1703_v38  ;;  %v1845_v37 = vld [vmem:[%s9213_s9 + $0x28] sm:$0xff] }
 0x43e   :  { %7486 = vpow2.f32 %v922_v42  ;;  %7125 = vmatpush3.msra.mxu0 %v1703_v38  ;;  %v1844_v38 = vld [vmem:[%s9213_s9 + $0x20] sm:$0xff] }
 0x43f   :  { %7126 = vmatprep.subr.mxu0 %v1702_v40 }
 0x440   :  { %7127 = vmatpush3.msra.mxu0 %v1702_v40  ;;  %v1843_v40 = vld [vmem:[%s9213_s9 + $0x18] sm:$0xff] }
 0x441   :  { %v1264_v43 = vpop.xlane.xlu0 %1263 }
 0x442   :  { %v1265_v44 = vsub.f32 %v1261_v17, %v1264_v43  ;;  %v587_v45 = vpop.xlane.xlu1 %586  ;;  %v1701_v43 = vld [vmem:[%s9211_s7 + $0x20] sm:$0xff] }
 0x443   :  { %v588_v5 = vsub.f32 %v7881_v19, %v587_v45  ;;  %7128 = vmatprep.subr.mxu0 %v1701_v43 }
 0x444   :  { %v1266_v46 = vmul.f32 1.442695, %v1265_v44  ;;  %7129 = vmatpush3.msra.mxu0 %v1701_v43  ;;  %v1841_v43 = vld [vmem:[%s9213_s9 + $0x8] sm:$0xff] }
 0x445   :  { %v589_v6 = vmul.f32 1.442695, %v588_v5 }
 0x446   :  { %7488 = vpow2.f32 %v1266_v46  ;;  %v1101_v47 = vpop.xlane.xlu1 %1100  ;;  %v1700_v46 = vld [vmem:[%s9211_s7 + $0x18] sm:$0xff] }
 0x447   :  { %v7889_v48 = vpop.eup %7484  ;;  %v1102_v49 = vsub.f32 %v1098_v23, %v1101_v47  ;;  %v1699_v47 = vld [vmem:[%s9211_s7 + $0x10] sm:$0xff]  ;;  %7130 = vmatprep.subr.mxu0 %v1700_v46 }
 0x448   :  { %v758_v50 = vsel %vm421_vm3, %v7889_v48, 0.0  ;;  %7131 = vmatpush3.msra.mxu0 %v1700_v46  ;;  %v1970_v46 = vld [vmem:[%s9214_s11 + $0x78] sm:$0xff] }
 0x449   :  { %v1103_v51 = vmul.f32 1.442695, %v1102_v49  ;;  %759 = vadd.xlane.f32.xlu0 %v758_v50  ;;  %v1597_v52 = vpop.xlane.xlu0 %1596  ;;  %7132 = vmatprep.subr.mxu0 %v1699_v47  ;;  %v1698_v50 = vld [vmem:[%s9211_s7 + $0x8] sm:$0xff] }
 0x44a   :  { %v1598_v53 = vsub.f32 %v1594_v31, %v1597_v52  ;;  %v1431_v54 = vpop.xlane.xlu1 %1430  ;;  %7133 = vmatpush3.msra.mxu0 %v1699_v47  ;;  %v1985_v47 = vld [vmem:[%s9214_s11 + $0xf0] sm:$0xff] }
 0x44b   :  { %v7893_v55 = vpop.eup %7486  ;;  %7490 = vpow2.f32 %v1103_v51  ;;  %v1432_v56 = vsub.f32 %v1428_v28, %v1431_v54  ;;  %v1697_v51 = vld [vmem:[%s9211_s7] sm:$0xff]  ;;  %7134 = vmatprep.subr.mxu0 %v1698_v50 }
 0x44c   :  { %v1599_v57 = vmul.f32 1.442695, %v1598_v53  ;;  %v924_v58 = vsel %vm421_vm3, %v7893_v55, 0.0  ;;  %7135 = vmatpush3.msra.mxu0 %v1698_v50  ;;  %v1968_v50 = vld [vmem:[%s9214_s11 + $0x68] sm:$0xff] }
 0x44d   :  { %v1433_v59 = vmul.f32 1.442695, %v1432_v56  ;;  %925 = vadd.xlane.f32.xlu1 %v924_v58  ;;  %7136 = vmatprep.subr.mxu0 %v1697_v51 }
 0x44e   :  { %7492 = vpow2.f32 %v1599_v57  ;;  %7137 = vmatpush3.msra.mxu0 %v1697_v51  ;;  %v1983_v51 = vld [vmem:[%s9214_s11 + $0xe0] sm:$0xff] }
 0x44f   :  { %7494 = vpow2.f32 %v1433_v59 }
 0x450   :  { %7496 = vpow2.f32 %v589_v6 }
 0x453   :  { %v7897_v60 = vpop.eup %7488 }
 0x454   :  { %v1268_v61 = vsel %vm421_vm3, %v7897_v60, 0.0 }
 0x455   :  { %1269 = vadd.xlane.f32.xlu1 %v1268_v61 }
 0x458   :  { %v7491_v62 = vpop.eup %7490 }
 0x459   :  { %v1105_v63 = vsel %vm421_vm3, %v7491_v62, 0.0 }
 0x45a   :  { %1106 = vadd.xlane.f32.xlu0 %v1105_v63 }
 0x45b   :  { %v7902_v0 = vpop.eup %7492 }
 0x45c   :  { %v7904_v1 = vpop.eup %7494  ;;  %v1601_v2 = vsel %vm421_vm3, %v7902_v0, 0.0 }
 0x45d   :  { %1602 = vadd.xlane.f32.xlu1 %v1601_v2  ;;  %v1435_v4 = vsel %vm421_vm3, %v7904_v1, 0.0  ;;  %v7497_v7 = vpop.eup %7496 }
 0x45e   :  { %1436 = vadd.xlane.f32.xlu0 %v1435_v4  ;;  %v591_v8 = vsel %vm421_vm3, %v7497_v7, 0.0 }
 0x46e   :  { %763 = vrot.lane.b32.xlu1 %v7833_v41, %s9236_s24 }
 0x474   :  { %597 = vrot.lane.b32.xlu0 %v7833_v41, %s9238_s23 }
 0x478   :  { %1274 = vrot.lane.b32.xlu0 %v7831_v39, %s9238_s23 }
 0x47c   :  { %1606 = vrot.lane.b32.xlu0 %v7831_v39, %s9234_s5 }
 0x492   :  { %592 = vadd.xlane.f32.xlu1 %v591_v8 }
 0x4a3   :  { %929 = vrot.lane.b32.xlu1 %v7833_v41, %s9234_s5 }
 0x4a7   :  { %1440 = vrot.lane.b32.xlu1 %v7831_v39, %s9236_s24 }
 0x4d2   :  { %v760_v10 = vpop.xlane.xlu0 %759 }
 0x4d6   :  { %v926_v15 = vpop.xlane.xlu1 %925 }
 0x4de   :  { %v1270_v16 = vpop.xlane.xlu1 %1269 }
 0x4e3   :  { %v1107_v11 = vpop.xlane.xlu0 %1106 }
 0x4e6   :  { %v1603_v17 = vpop.xlane.xlu1 %1602 }
 0x4e7   :  { %v1437_v12 = vpop.xlane.xlu0 %1436 }
 0x4ea   :  { %v764_v18 = vpop.permute.xlu1 %763 }
 0x4eb   :  { %v598_v14 = vpop.permute.xlu0 %597 }
 0x4ec   :  { %7058 = vmatpush3.msra.mxu1 %v598_v14 }
 0x4ed   :  { %7067 = vmatprep.subr.mxu1 %v7600_v26 }
 0x4ef   :  { %v1275_v30 = vpop.permute.xlu0 %1274 }
 0x4f3   :  { %v1607_v35 = vpop.permute.xlu0 %1606 }
 0x51b   :  { %v593_v19 = vpop.xlane.xlu1 %592 }
 0x51c   :  { %7498 = vrcp.f32 %v593_v19 }
 0x51d   :  { %7500 = vrcp.f32 %v760_v10 }
 0x51e   :  { %7502 = vrcp.f32 %v926_v15 }
 0x51f   :  { %7504 = vrcp.f32 %v1107_v11  ;;  %v930_v24 = vpop.permute.xlu1 %929 }
 0x520   :  { %7506 = vrcp.f32 %v1270_v16 }
 0x521   :  { %7508 = vrcp.f32 %v1437_v12 }
 0x522   :  { %7510 = vrcp.f32 %v1603_v17 }
 0x529   :  { %v7499_v41 = vpop.eup %7498 }
 0x52a   :  { %v595_v20 = vmul.f32 %v7499_v41, %v7497_v7  ;;  %v7501_v21 = vpop.eup %7500 }
 0x52b   :  { %v762_v22 = vmul.f32 %v7501_v21, %v7889_v48  ;;  %v7503_v23 = vpop.eup %7502 }
 0x52c   :  { %7060 = vmatmul.mubr.msk.f32.vlgmr.msra.gmra.mxu1 %vm421_vm3, %v595_v20  ;;  %v928_v25 = vmul.f32 %v7503_v23, %v7893_v55  ;;  %v7505_v27 = vpop.eup %7504 }
 0x52d   :  { %7068 = vmatpush3.msra.mxu1 %v764_v18  ;;  %7069 = vmatprep.mubr.msk.f32.mxu1 %vm7601_vm1, %v7600_v26  ;;  %v1109_v28 = vmul.f32 %v7505_v27, %v7491_v62  ;;  %v7507_v29 = vpop.eup %7506 }
 0x52e   :  { %7077 = vmatprep.subr.mxu1 %v7600_v26  ;;  %v1272_v31 = vmul.f32 %v7507_v29, %v7897_v60  ;;  %v7509_v32 = vpop.eup %7508  ;;  %v1854_v29 = vld [vmem:[%s9213_s9 + $0x70] sm:$0xff] }
 0x52f   :  { %v1439_v33 = vmul.f32 %v7509_v32, %v7904_v1  ;;  %v7511_v34 = vpop.eup %7510  ;;  %v1851_v32 = vld [vmem:[%s9213_s9 + $0x58] sm:$0xff] }
 0x530   :  { %7070 = vmatmul.mubr.msk.f32.vlgmr.msra.gmra.mxu1 %vm421_vm3, %v762_v22  ;;  %v1605_v36 = vmul.f32 %v7511_v34, %v7902_v0  ;;  %v1848_v34 = vld [vmem:[%s9213_s9 + $0x40] sm:$0xff] }
 0x531   :  { %7078 = vmatpush3.msra.mxu1 %v930_v24  ;;  %7079 = vmatprep.mubr.msk.f32.mxu1 %vm7601_vm1, %v7600_v26 }
 0x532   :  { %7087 = vmatprep.subr.mxu1 %v7600_v26 }
 0x534   :  { %7080 = vmatmul.mubr.msk.f32.vlgmr.msra.gmra.mxu1 %vm421_vm3, %v928_v25 }
 0x535   :  { %7088 = vmatpush3.msra.mxu1 %v7831_v39  ;;  %7089 = vmatprep.mubr.msk.f32.mxu1 %vm7601_vm1, %v7600_v26  ;;  %v1441_v39 = vpop.permute.xlu1 %1440 }
 0x536   :  { %7097 = vmatprep.subr.mxu1 %v7600_v26 }
 0x538   :  { %7090 = vmatmul.mubr.msk.f32.vlgmr.msra.gmra.mxu1 %vm421_vm3, %v1109_v28  ;;  %v1855_v28 = vld [vmem:[%s9213_s9 + $0x78] sm:$0xff] }
 0x539   :  { %7098 = vmatpush3.msra.mxu1 %v1275_v30  ;;  %7099 = vmatprep.mubr.msk.f32.mxu1 %vm7601_vm1, %v7600_v26  ;;  %v1853_v30 = vld [vmem:[%s9213_s9 + $0x68] sm:$0xff] }
 0x53a   :  { %7107 = vmatprep.subr.mxu1 %v7600_v26 }
 0x53c   :  { %7100 = vmatmul.mubr.msk.f32.vlgmr.msra.gmra.mxu1 %vm421_vm3, %v1272_v31  ;;  %v1852_v31 = vld [vmem:[%s9213_s9 + $0x60] sm:$0xff] }
 0x53d   :  { %7108 = vmatpush3.msra.mxu1 %v1441_v39  ;;  %7109 = vmatprep.mubr.msk.f32.mxu1 %vm7601_vm1, %v7600_v26  ;;  %v1850_v39 = vld [vmem:[%s9213_s9 + $0x50] sm:$0xff] }
 0x53e   :  { %7117 = vmatprep.subr.mxu1 %v7600_v26 }
 0x540   :  { %7110 = vmatmul.mubr.msk.f32.vlgmr.msra.gmra.mxu1 %vm421_vm3, %v1439_v33  ;;  %v1849_v33 = vld [vmem:[%s9213_s9 + $0x48] sm:$0xff] }
 0x541   :  { %7118 = vmatpush3.msra.mxu1 %v1607_v35  ;;  %7119 = vmatprep.mubr.msk.f32.mxu1 %vm7601_vm1, %v7600_v26  ;;  %v1847_v35 = vld [vmem:[%s9213_s9 + $0x38] sm:$0xff] }
 0x542   :  { %1890 = vmatprep.subr.mxu1 %v1855_v28  ;;  %v1955_v28 = vld [vmem:[%s9214_s11] sm:$0xff] }
 0x544   :  { %7120 = vmatmul.mubr.msk.f32.vlgmr.msra.gmra.mxu1 %vm421_vm3, %v1605_v36  ;;  %v1846_v36 = vld [vmem:[%s9213_s9 + $0x30] sm:$0xff] }
 0x545   :  { %1938 = vmatprep.mubr.f32.mxu1 %v7600_v26  ;;  %1891 = vmatpush1.msra.mxu1 %v1854_v29  ;;  %v1858_v29 = vlaneseq }
 0x546   :  { %1892 = vmatprep.subr.mxu1 %v1853_v30 }
 0x547   :  { %1893 = vmatpush1.msra.mxu1 %v1852_v31  ;;  %v1859_v30 = vshrl.u32 %v1858_v29, 7 }
 0x548   :  { %1894 = vmatprep.subr.mxu1 %v1851_v32  ;;  %v1856_v32 = vld [vmem:[%s9217_s10] sm:$0x3] }
 0x549   :  { %1895 = vmatpush1.msra.mxu1 %v1850_v39  ;;  %v8167_v31 = vsub.s32 0, %v1859_v30  ;;  %v8172_v39 = vsub.s32 1, %v1859_v30 }
 0x54a   :  { %1896 = vmatprep.subr.mxu1 %v1849_v33 }
 0x54b   :  { %1897 = vmatpush1.msra.mxu1 %v1848_v34  ;;  %v1861_v33 = vrot.slane %v1856_v32, %v8167_v31  ;;  %v1865_v34 = vrot.slane %v1856_v32, %v8172_v39 }
 0x54c   :  { %1898 = vmatprep.subr.mxu1 %v1847_v35 }
 0x54d   :  { %1899 = vmatpush1.msra.mxu1 %v1846_v36 }
 0x54e   :  { %1900 = vmatprep.subr.mxu1 %v1845_v37 }
 0x54f   :  { %1901 = vmatpush1.msra.mxu1 %v1844_v38 }
 0x550   :  { %1902 = vmatprep.subr.mxu1 %v1843_v40 }
 0x5ec   :  { %v669_v42 = vpop.f32.mrf.mxu1 }
 0x5ed   :  { %1006 = vrot.lane.b32.xlu1 %v669_v42, %s9232_s3  ;;  %v1842_v42 = vld [vmem:[%s9213_s9 + $0x10] sm:$0xff] }
 0x5ee   :  { %v7061_v44 = vpop.f32.mrf.mxu1  ;;  %1903 = vmatpush1.msra.mxu1 %v1842_v42 }
 0x5ef   :  { %v1840_v44 = vld [vmem:[%s9213_s9] sm:$0xff]  ;;  %1904 = vmatprep.subr.mxu1 %v1841_v43 }
 0x5f0   :  { %v835_v45 = vpop.f32.mrf.mxu1  ;;  %1905 = vmatpush1.msra.mxu1 %v1840_v44 }
 0x5f1   :  { %1010 = vrot.lane.b32.xlu0 %v835_v45, %s9230_s30  ;;  %v1986_v45 = vld [vmem:[%s9214_s11 + $0xf8] sm:$0xff] }
 0x5f2   :  { %v7071_v48 = vpop.f32.mrf.mxu1  ;;  %6718 = vmatprep.subr.mxu0 %v1986_v45 }
 0x5f3   :  { %v1969_v48 = vld [vmem:[%s9214_s11 + $0x70] sm:$0xff] }
 0x5f4   :  { %v1001_v49 = vpop.f32.mrf.mxu1 }
 0x5f5   :  { %1014 = vrot.lane.b32.xlu0 %v1001_v49, %s9228_s28  ;;  %v1984_v49 = vld [vmem:[%s9214_s11 + $0xe8] sm:$0xff] }
 0x5f6   :  { %v7081_v52 = vpop.f32.mrf.mxu1 }
 0x5f7   :  { %v1967_v52 = vld [vmem:[%s9214_s11 + $0x60] sm:$0xff] }
 0x5f8   :  { %v1179_v53 = vpop.f32.mrf.mxu1 }
 0x5fa   :  { %v7091_v54 = vpop.f32.mrf.mxu1 }
 0x5fb   :  { %v1966_v54 = vld [vmem:[%s9214_s11 + $0x58] sm:$0xff] }
 0x5fc   :  { %v1346_v55 = vpop.f32.mrf.mxu1 }
 0x5fd   :  { %1683 = vrot.lane.b32.xlu1 %v1346_v55, %s9232_s3  ;;  %v1981_v55 = vld [vmem:[%s9214_s11 + $0xd0] sm:$0xff] }
 0x5fe   :  { %v7101_v56 = vpop.f32.mrf.mxu1 }
 0x5ff   :  { %v1965_v56 = vld [vmem:[%s9214_s11 + $0x50] sm:$0xff] }
 0x600   :  { %v1512_v57 = vpop.f32.mrf.mxu1 }
 0x601   :  { %1687 = vrot.lane.b32.xlu1 %v1512_v57, %s9230_s30  ;;  %v1980_v57 = vld [vmem:[%s9214_s11 + $0xc8] sm:$0xff] }
 0x602   :  { %v7111_v58 = vpop.f32.mrf.mxu1 }
 0x603   :  { %v1964_v58 = vld [vmem:[%s9214_s11 + $0x48] sm:$0xff] }
 0x604   :  { %v1678_v59 = vpop.f32.mrf.mxu1 }
 0x605   :  { %1691 = vrot.lane.b32.xlu0 %v1678_v59, %s9228_s28  ;;  %v1979_v59 = vld [vmem:[%s9214_s11 + $0xc0] sm:$0xff]  ;;  %s9252_s28 = smov 32  }
 0x606   :  { %v7121_v60 = vpop.f32.mrf.mxu1 }
 0x607   :  { %v1963_v60 = vld [vmem:[%s9214_s11 + $0x40] sm:$0xff] }
 0x65f   :  { %v1007_v61 = vpop.permute.xlu1 %1006 }
 0x660   :  { %v1017_v63 = vsel %vm343_vm2, %v7879_v13, %v1007_v61  ;;  %v6368_v13 = vld [vmem:[%s9212_s8] ss:$0 sm:$0xff]  ;;  %v1978_v61 = vld [vmem:[%s9214_s11 + $0xb8] sm:$0xff] }
 0x663   :  { %v1011_v62 = vpop.permute.xlu0 %1010 }
 0x664   :  { %v1019_v0 = vsel %vm1018_vm4, %v1017_v63, %v1011_v62  ;;  %v1962_v62 = vld [vmem:[%s9214_s11 + $0x38] sm:$0xff]  ;;  %v1977_v63 = vld [vmem:[%s9214_s11 + $0xb0] sm:$0xff] }
 0x667   :  { %v1015_v1 = vpop.permute.xlu0 %1014 }
 0x668   :  { %v1021_v2 = vsel %vm1020_vm5, %v1019_v0, %v1015_v1  ;;  %v1961_v0 = vld [vmem:[%s9214_s11 + $0x30] sm:$0xff]  ;;  %v1976_v1 = vld [vmem:[%s9214_s11 + $0xa8] sm:$0xff] }
 0x669   :  { %7138 = vmatprep.mubr.msk.f32.mxu0 %vm81_vm0, %v1021_v2  ;;  %v1960_v2 = vld [vmem:[%s9214_s11 + $0x28] sm:$0xff] }
 0x66f   :  { %v1684_v4 = vpop.permute.xlu1 %1683 }
 0x670   :  { %v1694_v6 = vsel %vm343_vm2, %v1179_v53, %v1684_v4  ;;  %v1982_v53 = vld [vmem:[%s9214_s11 + $0xd8] sm:$0xff]  ;;  %v1975_v4 = vld [vmem:[%s9214_s11 + $0xa0] sm:$0xff] }
 0x673   :  { %v1688_v5 = vpop.permute.xlu1 %1687 }
 0x674   :  { %v1695_v7 = vsel %vm1018_vm4, %v1694_v6, %v1688_v5  ;;  %v1959_v5 = vld [vmem:[%s9214_s11 + $0x20] sm:$0xff] }
 0x677   :  { %v1692_v8 = vpop.permute.xlu0 %1691 }
 0x678   :  { %v1696_v10 = vsel %vm1020_vm5, %v1695_v7, %v1692_v8 }
 0x679   :  { %7139 = vmatmul.mubr.msk.f32.vlgmr.msra.gmra.mxu0 %vm81_vm0, %v1696_v10 }
 0x67a   :  { %6719 = vmatpush3.msra.mxu0 %v1970_v46 }
 0x67b   :  { %6720 = vmatprep.subr.mxu0 %v1985_v47 }
 0x67c   :  { %6721 = vmatpush3.msra.mxu0 %v1969_v48 }
 0x67d   :  { %6722 = vmatprep.subr.mxu0 %v1984_v49 }
 0x67e   :  { %6723 = vmatpush3.msra.mxu0 %v1968_v50  ;;  %v6375_v50 = vld [vmem:[%s9218_s12] ss:$0 sm:$0xff] }
 0x67f   :  { %6724 = vmatprep.subr.mxu0 %v1983_v51 }
 0x680   :  { %6725 = vmatpush3.msra.mxu0 %v1967_v52 }
 0x681   :  { %6726 = vmatprep.subr.mxu0 %v1982_v53 }
 0x682   :  { %6727 = vmatpush3.msra.mxu0 %v1966_v54 }
 0x683   :  { %6728 = vmatprep.subr.mxu0 %v1981_v55 }
 0x684   :  { %6729 = vmatpush3.msra.mxu0 %v1965_v56 }
 0x685   :  { %6730 = vmatprep.subr.mxu0 %v1980_v57 }
 0x686   :  { %6731 = vmatpush3.msra.mxu0 %v1964_v58 }
 0x687   :  { %6732 = vmatprep.subr.mxu0 %v1979_v59 }
 0x688   :  { %6733 = vmatpush3.msra.mxu0 %v1963_v60 }
 0x689   :  { %6734 = vmatprep.subr.mxu0 %v1978_v61 }
 0x68a   :  { %6735 = vmatpush3.msra.mxu0 %v1962_v62 }
 0x68b   :  { %6736 = vmatprep.subr.mxu0 %v1977_v63 }
 0x68c   :  { %6737 = vmatpush3.msra.mxu0 %v1961_v0 }
 0x68d   :  { %6738 = vmatprep.subr.mxu0 %v1976_v1 }
 0x68e   :  { %6739 = vmatpush3.msra.mxu0 %v1960_v2 }
 0x68f   :  { %6740 = vmatprep.subr.mxu0 %v1975_v4 }
 0x690   :  { %6741 = vmatpush3.msra.mxu0 %v1959_v5 }
 0x739   :  { %v7140_v11 = vpop.f32.mrf.mxu0 }
 0x73a   :  { %v1790_v12 = vadd.f32 %v7140_v11, %v6368_v13 }
 0x73b   :  { %v1784_v14 = vpop.f32.mrf.mxu0 }
 0x73c   :  { %v1785_v15 = vadd.f32 %v6368_v13, %v1784_v14  ;;  %v1794_v16 = vadd.f32 %v1790_v12, %v7744_v9 }
 0x73e   :  { %v1800_v17 = vsel %vm81_vm0, %v1794_v16, 0.0  ;;  %v1793_v18 = vadd.f32 %v1785_v15, %v7720_v3 }
 0x73f   :  { %1801 = vadd.xlane.f32.xlu0 %v1800_v17  ;;  %v6371_v17 = vld [vmem:[%s9215_s13] ss:$0 sm:$0xff] }
 0x740   :  { %v1797_v19 = vsel %vm81_vm0, %v1793_v18, 0.0 }
 0x741   :  { %1798 = vadd.xlane.f32.xlu1 %v1797_v19  ;;  %v6372_v19 = vld [vmem:[%s9216_s14] ss:$0 sm:$0xff] }
 0x7c8   :  { %v1802_v41 = vpop.xlane.xlu0 %1801 }
 0x7c9   :  { %v1805_v20 = vmul.f32 0.015625, %v1802_v41 }
 0x7ca   :  { %v1799_v21 = vpop.xlane.xlu1 %1798 }
 0x7cb   :  { %v8002_v22 = vsub.f32 %v1794_v16, %v1805_v20  ;;  %v1804_v23 = vmul.f32 0.015625, %v1799_v21 }
 0x7cd   :  { %v8004_v24 = vsub.f32 %v1793_v18, %v1804_v23  ;;  %v1809_v25 = vmul.f32 %v8002_v22, %v8002_v22  ;;  %v1958_v23 = vld [vmem:[%s9214_s11 + $0x18] sm:$0xff] }
 0x7cf   :  { %v1813_v9 = vsel %vm81_vm0, %v1809_v25, 0.0  ;;  %v1808_v3 = vmul.f32 %v8004_v24, %v8004_v24  ;;  %v1957_v25 = vld [vmem:[%s9214_s11 + $0x10] sm:$0xff] }
 0x7d0   :  { %1814 = vadd.xlane.f32.xlu1 %v1813_v9  ;;  %v1972_v9 = vld [vmem:[%s9214_s11 + $0x88] sm:$0xff] }
 0x7d1   :  { %v1810_v27 = vsel %vm81_vm0, %v1808_v3, 0.0  ;;  %v1956_v3 = vld [vmem:[%s9214_s11 + $0x8] sm:$0xff] }
 0x7d2   :  { %1811 = vadd.xlane.f32.xlu0 %v1810_v27  ;;  %v1971_v27 = vld [vmem:[%s9214_s11 + $0x80] sm:$0xff] }
 0x859   :  { %v1815_v6 = vpop.xlane.xlu1 %1814 }
 0x85a   :  { %v1817_v7 = vmul.f32 0.015625, %v1815_v6 }
 0x85b   :  { %v1812_v8 = vpop.xlane.xlu0 %1811 }
 0x85c   :  { %v1819_v10 = vadd.f32 1e-05, %v1817_v7  ;;  %v1816_v13 = vmul.f32 0.015625, %v1812_v8 }
 0x85e   :  { %7512 = vrsqrt.f32 %v1819_v10  ;;  %v1818_v11 = vadd.f32 1e-05, %v1816_v13  ;;  %v6385_v10 = vld [vmem:[%s9246_s20 + $0x78] sm:$0xff] }
 0x85f   :  { %v6409_v13 = vld [vmem:[%s9249_s1 + $0x78] sm:$0xff]  ;;  %7141 = vmatprep.subr.mxu1 %v6385_v10 }
 0x860   :  { %7514 = vrsqrt.f32 %v1818_v11  ;;  %v6384_v11 = vld [vmem:[%s9246_s20 + $0x70] sm:$0xff] }
 0x86b   :  { %v7513_v12 = vpop.eup %7512 }
 0x86c   :  { %v1823_v16 = vmul.f32 %v7513_v12, %v8002_v22  ;;  %v1974_v22 = vld [vmem:[%s9214_s11 + $0x98] sm:$0xff]  ;;  %v6408_v12 = vld [vmem:[%s9249_s1 + $0x70] sm:$0xff] }
 0x86d   :  { %v7515_v14 = vpop.eup %7514  ;;  %6742 = vmatprep.subr.mxu0 %v1974_v22  ;;  %v6403_v22 = vld [vmem:[%s9249_s1 + $0x48] sm:$0xff] }
 0x86e   :  { %v1822_v15 = vmul.f32 %v7515_v14, %v8004_v24  ;;  %v1831_v20 = vmul.f32 %v6371_v17, %v1823_v16  ;;  %6743 = vmatpush3.msra.mxu0 %v1958_v23  ;;  %v1973_v24 = vld [vmem:[%s9214_s11 + $0x90] sm:$0xff]  ;;  %v6383_v14 = vld [vmem:[%s9246_s20 + $0x68] sm:$0xff]  ;;  %v6382_v16 = vld [vmem:[%s9246_s20 + $0x60] sm:$0xff] }
 0x86f   :  { %6744 = vmatprep.subr.mxu0 %v1973_v24  ;;  %v6378_v23 = vld [vmem:[%s9246_s20 + $0x40] sm:$0xff] }
 0x870   :  { %v1830_v18 = vmul.f32 %v6371_v17, %v1822_v15  ;;  %v1839_v21 = vadd.f32 %v6372_v19, %v1831_v20  ;;  %6745 = vmatpush3.msra.mxu0 %v1957_v25  ;;  %v6407_v15 = vld [vmem:[%s9249_s1 + $0x68] sm:$0xff]  ;;  %v6406_v17 = vld [vmem:[%s9249_s1 + $0x60] sm:$0xff]  ;;  %v6404_v20 = vld [vmem:[%s9249_s1 + $0x50] sm:$0xff] }
 0x871   :  { %6746 = vmatprep.subr.mxu0 %v1972_v9  ;;  %v6402_v24 = vld [vmem:[%s9249_s1 + $0x40] sm:$0xff]  ;;  %v6397_v25 = vld [vmem:[%s9248_s26 + $0x78] sm:$0xff] }
 0x872   :  { %v1838_v41 = vadd.f32 %v6372_v19, %v1830_v18  ;;  %6747 = vmatpush3.msra.mxu0 %v1956_v3  ;;  %v6381_v18 = vld [vmem:[%s9246_s20 + $0x58] sm:$0xff] }
 0x873   :  { %6748 = vmatprep.subr.mxu0 %v1971_v27  ;;  %v6405_v19 = vld [vmem:[%s9249_s1 + $0x58] sm:$0xff] }
 0x874   :  { %6373 = vmatmul.mubr.msk.f32.vlgmr.msra.gmra.mxu1 %vm81_vm0, %v1838_v41  ;;  %6749 = vmatpush3.msra.mxu0 %v1955_v28 }
 0x875   :  { %1944 = vmatprep.mubr.f32.mxu1 %v7600_v26  ;;  %7179 = vmatprep.subr.mxu0 %v6409_v13 }
 0x876   :  { %7142 = vmatpush3.msra.mxu1 %v6385_v10 }
 0x877   :  { %7143 = vmatprep.subr.mxu1 %v6384_v11 }
 0x878   :  { %6374 = vmatmul.mubr.msk.f32.gmra.mxu1 %vm81_vm0, %v1839_v21 }
 0x879   :  { %7144 = vmatpush3.msra.mxu1 %v6384_v11 }
 0x87a   :  { %7145 = vmatprep.subr.mxu1 %v6383_v14 }
 0x87b   :  { %7146 = vmatpush3.msra.mxu1 %v6383_v14 }
 0x87c   :  { %7147 = vmatprep.subr.mxu1 %v6382_v16 }
 0x87d   :  { %7148 = vmatpush3.msra.mxu1 %v6382_v16 }
 0x87e   :  { %7149 = vmatprep.subr.mxu1 %v6381_v18 }
 0x87f   :  { %7150 = vmatpush3.msra.mxu1 %v6381_v18 }
 0x934   :  { %v1940_v35 = vpop.f32.mrf.mxu1 }
 0x935   :  { %v1941_v36 = vadd.f32 %v1940_v35, %v1861_v33  ;;  %v6377_v35 = vld [vmem:[%s9220_s16] ss:$0 sm:$0xff] }
 0x936   :  { %v1942_v37 = vpop.f32.mrf.mxu1 }
 0x937   :  { %v1943_v38 = vadd.f32 %v1942_v37, %v1865_v34  ;;  %v1951_v43 = vmax.f32 %v1941_v36, 0.0 }
 0x938   :  { %v1946_v40 = vpop.f32.mrf.mxu1 }
 0x939   :  { %v1952_v42 = vmax.f32 %v1943_v38, 0.0  ;;  %v1947_v44 = vadd.f32 %v1946_v40, %v1861_v33  ;;  %v6376_v33 = vld [vmem:[%s9219_s15] ss:$0 sm:$0xff] }
 0x93a   :  { %v1948_v45 = vpop.f32.mrf.mxu1 }
 0x93b   :  { %v1949_v46 = vadd.f32 %v1948_v45, %v1865_v34  ;;  %2058 = vmatprep.mubr.f32.mxu0 %v1952_v42  ;;  %v1953_v48 = vmax.f32 %v1947_v44, 0.0  ;;  %v6396_v44 = vld [vmem:[%s9248_s26 + $0x70] sm:$0xff]  ;;  %v6395_v45 = vld [vmem:[%s9248_s26 + $0x68] sm:$0xff] }
 0x93c   :  { %2059 = vmatmul.mubr.f32.vlgmr.msra.gmra.mxu0 %v1951_v43 }
 0x93d   :  { %v1954_v47 = vmax.f32 %v1949_v46, 0.0  ;;  %7180 = vmatpush3.msra.mxu0 %v6409_v13  ;;  %v6394_v46 = vld [vmem:[%s9248_s26 + $0x60] sm:$0xff] }
 0x93e   :  { %7181 = vmatprep.subr.mxu0 %v6408_v12 }
 0x93f   :  { %2063 = vmatprep.mubr.f32.mxu0 %v1954_v47  ;;  %7182 = vmatpush3.msra.mxu0 %v6408_v12  ;;  %v6393_v47 = vld [vmem:[%s9248_s26 + $0x58] sm:$0xff] }
 0x940   :  { %2064 = vmatmul.mubr.f32.gmra.mxu0 %v1953_v48  ;;  %7183 = vmatprep.subr.mxu0 %v6407_v15  ;;  %v6392_v48 = vld [vmem:[%s9248_s26 + $0x50] sm:$0xff] }
 0x941   :  { %7184 = vmatpush3.msra.mxu0 %v6407_v15 }
 0x942   :  { %7185 = vmatprep.subr.mxu0 %v6406_v17 }
 0x943   :  { %7186 = vmatpush3.msra.mxu0 %v6406_v17 }
 0x944   :  { %7187 = vmatprep.subr.mxu0 %v6405_v19 }
 0x945   :  { %7188 = vmatpush3.msra.mxu0 %v6405_v19 }
 0x946   :  { %7189 = vmatprep.subr.mxu0 %v6404_v20 }
 0x947   :  { %7190 = vmatpush3.msra.mxu0 %v6404_v20 }
 0x948   :  { %7191 = vmatprep.subr.mxu0 %v6403_v22 }
 0x949   :  { %7192 = vmatpush3.msra.mxu0 %v6403_v22 }
 0x94a   :  { %7193 = vmatprep.subr.mxu0 %v6402_v24 }
 0x94b   :  { %7194 = vmatpush3.msra.mxu0 %v6402_v24 }
 0x94c   :  { %7218 = vmatprep.subr.mxu0 %v7600_v26 }
 0x9fc   :  { %v6750_v49 = vpop.f32.mrf.mxu0 }
 0x9fe   :  { %v6751_v51 = vpop.f32.mrf.mxu0 }
 0x9ff   :  { %v6752_v52 = vadd.f32 %v6751_v51, %v6750_v49  ;;  %v6391_v49 = vld [vmem:[%s9248_s26 + $0x48] sm:$0xff]  ;;  %v6387_v51 = vld [vmem:[%s9209_s2 + $0x1] ss:$0 sm:$0xff] }
 0xa00   :  { %v6753_v53 = vpop.f32.mrf.mxu0 }
 0xa01   :  { %v2061_v54 = vadd.f32 %v6752_v52, %v6375_v50  ;;  %v6411_v52 = vld [vmem:[%s9210_s6 + $0x1] ss:$0 sm:$0xff] }
 0xa02   :  { %v6754_v55 = vpop.f32.mrf.mxu0 }
 0xa03   :  { %v6755_v56 = vadd.f32 %v6754_v55, %v6753_v53  ;;  %v2069_v57 = vadd.f32 %v2061_v54, %v1838_v41  ;;  %v6380_v41 = vld [vmem:[%s9246_s20 + $0x50] sm:$0xff] }
 0xa04   :  { %7151 = vmatprep.subr.mxu1 %v6380_v41 }
 0xa05   :  { %v2066_v58 = vadd.f32 %v6755_v56, %v6375_v50  ;;  %v2073_v59 = vsel %vm81_vm0, %v2069_v57, 0.0  ;;  %7152 = vmatpush3.msra.mxu1 %v6380_v41  ;;  %v6390_v50 = vld [vmem:[%s9248_s26 + $0x40] sm:$0xff] }
 0xa06   :  { %2074 = vadd.xlane.f32.xlu0 %v2073_v59  ;;  %v6399_v59 = vld [vmem:[%s9208_s4 + $0x1] ss:$0 sm:$0xff] }
 0xa07   :  { %v2070_v60 = vadd.f32 %v2066_v58, %v1839_v21  ;;  %v6379_v21 = vld [vmem:[%s9246_s20 + $0x48] sm:$0xff] }
 0xa08   :  { %7153 = vmatprep.subr.mxu1 %v6379_v21 }
 0xa09   :  { %v2076_v61 = vsel %vm81_vm0, %v2070_v60, 0.0  ;;  %7154 = vmatpush3.msra.mxu1 %v6379_v21 }
 0xa0a   :  { %2077 = vadd.xlane.f32.xlu1 %v2076_v61  ;;  %7155 = vmatprep.subr.mxu1 %v6378_v23 }
 0xa0b   :  { %7156 = vmatpush3.msra.mxu1 %v6378_v23 }
 0xa0c   :  { %7160 = vmatprep.subr.mxu1 %v6397_v25 }
 0xa8f   :  { %v2075_v62 = vpop.xlane.xlu0 %2074 }
 0xa90   :  { %v2079_v63 = vmul.f32 0.015625, %v2075_v62 }
 0xa92   :  { %v8181_v0 = vsub.f32 %v2069_v57, %v2079_v63 }
 0xa93   :  { %v2078_v1 = vpop.xlane.xlu1 %2077 }
 0xa94   :  { %v2080_v2 = vmul.f32 0.015625, %v2078_v1  ;;  %v2083_v4 = vmul.f32 %v8181_v0, %v8181_v0 }
 0xa96   :  { %v8185_v5 = vsub.f32 %v2070_v60, %v2080_v2  ;;  %v2085_v6 = vsel %vm81_vm0, %v2083_v4, 0.0 }
 0xa97   :  { %2086 = vadd.xlane.f32.xlu0 %v2085_v6 }
 0xa98   :  { %v2084_v7 = vmul.f32 %v8185_v5, %v8185_v5 }
 0xa9a   :  { %v2088_v8 = vsel %vm81_vm0, %v2084_v7, 0.0 }
 0xa9b   :  { %2089 = vadd.xlane.f32.xlu1 %v2088_v8 }
 0xb20   :  { %v2087_v9 = vpop.xlane.xlu0 %2086 }
 0xb21   :  { %v2091_v3 = vmul.f32 0.015625, %v2087_v9 }
 0xb23   :  { %v2093_v27 = vadd.f32 1e-05, %v2091_v3 }
 0xb24   :  { %v2090_v28 = vpop.xlane.xlu1 %2089 }
 0xb25   :  { %7516 = vrsqrt.f32 %v2093_v27  ;;  %v2092_v29 = vmul.f32 0.015625, %v2090_v28 }
 0xb27   :  { %v2094_v30 = vadd.f32 1e-05, %v2092_v29 }
 0xb29   :  { %7518 = vrsqrt.f32 %v2094_v30 }
 0xb32   :  { %v7517_v32 = vpop.eup %7516 }
 0xb33   :  { %v2097_v34 = vmul.f32 %v7517_v32, %v8181_v0 }
 0xb35   :  { %v2105_v36 = vmul.f32 %v6376_v33, %v2097_v34 }
 0xb36   :  { %v7519_v37 = vpop.eup %7518 }
 0xb37   :  { %v2098_v38 = vmul.f32 %v7519_v37, %v8185_v5  ;;  %v8251_v40 = vadd.f32 %v6377_v35, %v2105_v36 }
 0xb39   :  { %v2106_v42 = vmul.f32 %v6376_v33, %v2098_v38  ;;  %7157 = vmatprep.mubr.msk.f32.mxu1 %vm81_vm0, %v8251_v40  ;;  %7195 = vmatprep.mubr.msk.f32.mxu0 %vm81_vm0, %v8251_v40 }
 0xb3b   :  { %v8257_v43 = vadd.f32 %v6377_v35, %v2106_v42 }
 0xb3d   :  { %7158 = vmatmul.mubr.msk.f32.vlgmr.msra.gmra.mxu1 %vm81_vm0, %v8257_v43  ;;  %7196 = vmatmul.mubr.msk.f32.vlgmr.msra.gmra.mxu0 %vm81_vm0, %v8257_v43 }
 0xb3e   :  { %7161 = vmatpush3.msra.mxu1 %v6397_v25  ;;  %7176 = vmatprep.mubr.msk.f32.mxu1 %vm81_vm0, %v8251_v40 }
 0xb3f   :  { %7162 = vmatprep.subr.mxu1 %v6396_v44  ;;  %7220 = vmatprep.mubr.msk.f32.mxu0 %vm7601_vm1, %v7600_v26 }
 0xb40   :  { %7163 = vmatpush3.msra.mxu1 %v6396_v44 }
 0xb41   :  { %7164 = vmatprep.subr.mxu1 %v6395_v45 }
 0xb42   :  { %7165 = vmatpush3.msra.mxu1 %v6395_v45 }
 0xb43   :  { %7166 = vmatprep.subr.mxu1 %v6394_v46 }
 0xb44   :  { %7167 = vmatpush3.msra.mxu1 %v6394_v46 }
 0xb45   :  { %7168 = vmatprep.subr.mxu1 %v6393_v47 }
 0xb46   :  { %7169 = vmatpush3.msra.mxu1 %v6393_v47 }
 0xb47   :  { %7170 = vmatprep.subr.mxu1 %v6392_v48 }
 0xb48   :  { %7171 = vmatpush3.msra.mxu1 %v6392_v48 }
 0xb49   :  { %7172 = vmatprep.subr.mxu1 %v6391_v49 }
 0xb4a   :  { %7173 = vmatpush3.msra.mxu1 %v6391_v49 }
 0xb4b   :  { %7174 = vmatprep.subr.mxu1 %v6390_v50 }
 0xb4c   :  { %7175 = vmatpush3.msra.mxu1 %v6390_v50 }
 0xb4d   :  { %7177 = vmatmul.mubr.msk.f32.vlgmr.msra.gmra.mxu1 %vm81_vm0, %v8257_v43  ;;  %7198 = vmatprep.subr.mxu1 %v7600_v26 }
 0xb4e   :  { %7200 = vmatprep.mubr.msk.f32.mxu1 %vm7601_vm1, %v7600_v26 }
 0xbfd   :  { %v7159_v53 = vpop.f32.mrf.mxu1  ;;  %v7197_v54 = vpop.f32.mrf.mxu0 }
 0xbfe   :  { %v8299_v55 = vadd.f32 %v7159_v53, %v6387_v51  ;;  %v8301_v56 = vadd.f32 %v7197_v54, %v6411_v52 }
 0xbff   :  { %v2204_v57 = vpop.f32.mrf.mxu1  ;;  %v2388_v0 = vpop.f32.mrf.mxu0 }
 0xc00   :  { %v2205_v58 = vadd.f32 %v6387_v51, %v2204_v57  ;;  %v8309_v1 = vadd.f32 %v6411_v52, %v2388_v0 }
 0xc02   :  { %2558 = vrot.lane.b32.xlu1 %v2205_v58, %s9238_s23 }
 0xc0d   :  { %v7178_v60 = vpop.f32.mrf.mxu1 }
 0xc0e   :  { %v2302_v61 = vadd.f32 %v7178_v60, %v6399_v59 }
 0xc0f   :  { %v2296_v62 = vpop.f32.mrf.mxu1 }
 0xc10   :  { %v2297_v63 = vadd.f32 %v6399_v59, %v2296_v62 }
 0xc12   :  { %7199 = vmatpush3.xpose.msk.msra.mxu1 %vm343_vm2, %v2297_v63 }
 0xc13   :  { %7203 = vmatprep.subr.mxu1 %v7600_v26 }
 0xc15   :  { %7201 = vmatmul.mubr.msk.f32.vlgmr.msra.gmra.mxu1 %vm343_vm2, %v2205_v58 }
 0xc16   :  { %7204 = vmatpush3.msra.mxu1 %v8309_v1  ;;  %7205 = vmatprep.mubr.msk.f32.mxu1 %vm7601_vm1, %v7600_v26 }
 0xc17   :  { %7208 = vmatprep.subr.mxu1 %v7600_v26 }
 0xc74   :  { %v2559_v12 = vpop.permute.xlu1 %2558 }
 0xcd5   :  { %v2469_v2 = vpop.f32.mrf.mxu1 }
 0xcd6   :  { %v2473_v4 = vmul.f32 0.25, %v2469_v2 }
 0xcd7   :  { %v7202_v5 = vpop.f32.mrf.mxu1 }
 0xcd8   :  { %v2474_v6 = vsel %vm421_vm3, %v2473_v4, -inf }
 0xcd9   :  { %2475 = vmax.xlane.f32.xlu0 %v2474_v6 }
 0xcef   :  { %2560 = vrot.lane.b32.xlu0 %v2297_v63, %s9238_s23 }
 0xcf3   :  { %2725 = vrot.lane.b32.xlu0 %v2205_v58, %s9236_s24 }
 0xcf7   :  { %2891 = vrot.lane.b32.xlu0 %v2205_v58, %s9250_s29 }
 0xcfb   :  { %3233 = vrot.lane.b32.xlu0 %v8299_v55, %s9238_s23 }
 0xcff   :  { %3400 = vrot.lane.b32.xlu0 %v8299_v55, %s9236_s24 }
 0xd03   :  { %3566 = vrot.lane.b32.xlu0 %v8299_v55, %s9250_s29 }
 0xd62   :  { %v2476_v7 = vpop.xlane.xlu0 %2475 }
 0xd63   :  { %v2477_v8 = vsub.f32 %v2473_v4, %v2476_v7 }
 0xd65   :  { %v2478_v10 = vmul.f32 1.442695, %v2477_v8 }
 0xd66   :  { %v2561_v14 = vpop.permute.xlu0 %2560 }
 0xd67   :  { %7520 = vpow2.f32 %v2478_v10 }
 0xd6a   :  { %v2726_v16 = vpop.permute.xlu0 %2725 }
 0xd6e   :  { %v2892_v19 = vpop.permute.xlu0 %2891 }
 0xd72   :  { %v3234_v21 = vpop.permute.xlu0 %3233 }
 0xd74   :  { %v7521_v13 = vpop.eup %7520 }
 0xd75   :  { %v2480_v11 = vsel %vm421_vm3, %v7521_v13, 0.0 }
 0xd76   :  { %2481 = vadd.xlane.f32.xlu1 %v2480_v11  ;;  %v3401_v24 = vpop.permute.xlu0 %3400 }
 0xd7a   :  { %v3567_v9 = vpop.permute.xlu0 %3566 }
 0xd87   :  { %2727 = vrot.lane.b32.xlu1 %v2297_v63, %s9236_s24 }
 0xd8b   :  { %2893 = vrot.lane.b32.xlu1 %v2297_v63, %s9250_s29 }
 0xd8f   :  { %3235 = vrot.lane.b32.xlu1 %v2302_v61, %s9238_s23 }
 0xd93   :  { %3402 = vrot.lane.b32.xlu1 %v2302_v61, %s9236_s24 }
 0xd97   :  { %3568 = vrot.lane.b32.xlu1 %v2302_v61, %s9250_s29 }
 0xdff   :  { %v2482_v15 = vpop.xlane.xlu1 %2481 }
 0xe00   :  { %7522 = vrcp.f32 %v2482_v15 }
 0xe03   :  { %v2728_v17 = vpop.permute.xlu1 %2727 }
 0xe04   :  { %7219 = vmatpush3.xpose.msk.msra.mxu0 %vm343_vm2, %v2728_v17 }
 0xe05   :  { %7228 = vmatprep.subr.mxu0 %v7600_v26 }
 0xe07   :  { %v2894_v18 = vpop.permute.xlu1 %2893  ;;  %7221 = vmatmul.mubr.msk.f32.vlgmr.msra.gmra.mxu0 %vm343_vm2, %v2726_v16 }
 0xe08   :  { %7229 = vmatpush3.xpose.msk.msra.mxu0 %vm343_vm2, %v2894_v18  ;;  %7230 = vmatprep.mubr.msk.f32.mxu0 %vm7601_vm1, %v7600_v26 }
 0xe09   :  { %7238 = vmatprep.subr.mxu0 %v7600_v26 }
 0xe0b   :  { %v3236_v41 = vpop.permute.xlu1 %3235  ;;  %7231 = vmatmul.mubr.msk.f32.vlgmr.msra.gmra.mxu0 %vm343_vm2, %v2892_v19 }
 0xe0c   :  { %7239 = vmatpush3.xpose.msk.msra.mxu0 %vm343_vm2, %v2302_v61  ;;  %7240 = vmatprep.mubr.msk.f32.mxu0 %vm7601_vm1, %v7600_v26 }
 0xe0d   :  { %v7523_v20 = vpop.eup %7522  ;;  %7248 = vmatprep.subr.mxu0 %v7600_v26 }
 0xe0e   :  { %v2484_v22 = vmul.f32 %v7523_v20, %v7521_v13 }
 0xe0f   :  { %7241 = vmatmul.mubr.msk.f32.vlgmr.msra.gmra.mxu0 %vm343_vm2, %v8299_v55  ;;  %v3403_v23 = vpop.permute.xlu1 %3402 }
 0xe10   :  { %7206 = vmatmul.mubr.msk.f32.vlgmr.msra.gmra.mxu1 %vm421_vm3, %v2484_v22  ;;  %7249 = vmatpush3.xpose.msk.msra.mxu0 %vm343_vm2, %v3236_v41 }
 0xe11   :  { %7209 = vmatpush3.xpose.msk.msra.mxu1 %vm343_vm2, %v2561_v14  ;;  %7250 = vmatprep.mubr.msk.f32.mxu0 %vm7601_vm1, %v7600_v26 }
 0xe12   :  { %7210 = vmatprep.mubr.msk.f32.mxu1 %vm7601_vm1, %v7600_v26  ;;  %7258 = vmatprep.subr.mxu0 %v7600_v26 }
 0xe13   :  { %7251 = vmatmul.mubr.msk.f32.vlgmr.msra.gmra.mxu0 %vm343_vm2, %v3234_v21  ;;  %7213 = vmatprep.subr.mxu1 %v7600_v26  ;;  %v3569_v25 = vpop.permute.xlu1 %3568 }
 0xe14   :  { %7211 = vmatmul.mubr.msk.f32.vlgmr.msra.gmra.mxu1 %vm343_vm2, %v2559_v12  ;;  %7259 = vmatpush3.xpose.msk.msra.mxu0 %vm343_vm2, %v3403_v23 }
 0xe15   :  { %7260 = vmatprep.mubr.msk.f32.mxu0 %vm7601_vm1, %v7600_v26  ;;  %7268 = vmatprep.subr.mxu0 %v7600_v26 }
 0xe16   :  { %7215 = vmatprep.mubr.msk.f32.mxu1 %vm7601_vm1, %v7600_v26 }
 0xe17   :  { %7261 = vmatmul.mubr.msk.f32.vlgmr.msra.gmra.mxu0 %vm343_vm2, %v3401_v24 }
 0xe18   :  { %7269 = vmatpush3.xpose.msk.msra.mxu0 %vm343_vm2, %v3569_v25  ;;  %7270 = vmatprep.mubr.msk.f32.mxu0 %vm7601_vm1, %v7600_v26 }
 0xe1b   :  { %7271 = vmatmul.mubr.msk.f32.vlgmr.msra.gmra.mxu0 %vm343_vm2, %v3567_v9 }
 0xec7   :  { %v2799_v3 = vpop.f32.mrf.mxu0 }
 0xec8   :  { %v2803_v27 = vmul.f32 0.25, %v2799_v3 }
 0xec9   :  { %v7222_v28 = vpop.f32.mrf.mxu0 }
 0xeca   :  { %v2804_v29 = vsel %vm421_vm3, %v2803_v27, -inf }
 0xecb   :  { %2805 = vmax.xlane.f32.xlu0 %v2804_v29  ;;  %v2965_v30 = vpop.f32.mrf.mxu0 }
 0xecc   :  { %v2969_v32 = vmul.f32 0.25, %v2965_v30 }
 0xecd   :  { %v7232_v33 = vpop.f32.mrf.mxu0 }
 0xece   :  { %v2970_v34 = vsel %vm421_vm3, %v2969_v32, -inf }
 0xecf   :  { %2971 = vmax.xlane.f32.xlu0 %v2970_v34  ;;  %v3144_v35 = vpop.f32.mrf.mxu0 }
 0xed0   :  { %v8370_v36 = vpop.f32.mrf.mxu1  ;;  %v3148_v50 = vmul.f32 0.25, %v3144_v35 }
 0xed1   :  { %v7242_v37 = vpop.f32.mrf.mxu0 }
 0xed2   :  { %v7207_v38 = vpop.f32.mrf.mxu1  ;;  %v3149_v57 = vsel %vm421_vm3, %v3148_v50, -inf }
 0xed3   :  { %v3307_v42 = vpop.f32.mrf.mxu0 }
 0xed4   :  { %v3311_v44 = vmul.f32 0.25, %v3307_v42  ;;  %v2632_v45 = vpop.f32.mrf.mxu1 }
 0xed5   :  { %v8372_v46 = vmul.f32 0.25, %v2632_v45  ;;  %v7252_v47 = vpop.f32.mrf.mxu0 }
 0xed6   :  { %v7212_v48 = vpop.f32.mrf.mxu1  ;;  %v3312_v49 = vsel %vm421_vm3, %v3311_v44, -inf }
 0xed7   :  { %3313 = vmax.xlane.f32.xlu0 %v3312_v49  ;;  %v3474_v51 = vpop.f32.mrf.mxu0  ;;  %v2637_v52 = vsel %vm421_vm3, %v8372_v46, -inf }
 0xed8   :  { %2638 = vmax.xlane.f32.xlu1 %v2637_v52  ;;  %v3478_v54 = vmul.f32 0.25, %v3474_v51 }
 0xed9   :  { %v7262_v53 = vpop.f32.mrf.mxu0 }
 0xeda   :  { %v3479_v61 = vsel %vm421_vm3, %v3478_v54, -inf }
 0xedb   :  { %v3640_v55 = vpop.f32.mrf.mxu0 }
 0xedc   :  { %v3644_v58 = vmul.f32 0.25, %v3640_v55  ;;  %3150 = vmax.xlane.f32.xlu1 %v3149_v57 }
 0xedd   :  { %v7272_v59 = vpop.f32.mrf.mxu0 }
 0xede   :  { %v3645_v60 = vsel %vm421_vm3, %v3644_v58, -inf }
 0xedf   :  { %3646 = vmax.xlane.f32.xlu0 %v3645_v60 }
 0xee0   :  { %3480 = vmax.xlane.f32.xlu1 %v3479_v61 }
 0xf54   :  { %v2806_v62 = vpop.xlane.xlu0 %2805 }
 0xf55   :  { %v2807_v63 = vsub.f32 %v2803_v27, %v2806_v62 }
 0xf57   :  { %v2808_v0 = vmul.f32 1.442695, %v2807_v63 }
 0xf58   :  { %v2972_v2 = vpop.xlane.xlu0 %2971 }
 0xf59   :  { %7524 = vpow2.f32 %v2808_v0  ;;  %v2973_v4 = vsub.f32 %v2969_v32, %v2972_v2 }
 0xf5b   :  { %v2974_v5 = vmul.f32 1.442695, %v2973_v4  ;;  %v6445_v4 = vld [vmem:[%s9211_s7 + $0x78] sm:$0xff] }
 0xf5c   :  { %7278 = vmatprep.subr.mxu0 %v6445_v4 }
 0xf5d   :  { %7526 = vpow2.f32 %v2974_v5  ;;  %v6444_v5 = vld [vmem:[%s9211_s7 + $0x70] sm:$0xff]  ;;  %7279 = vmatpush3.msra.mxu0 %v6445_v4  ;;  %v6461_v4 = vld [vmem:[%s9213_s9 + $0xb8] sm:$0xff] }
 0xf5e   :  { %7280 = vmatprep.subr.mxu0 %v6444_v5 }
 0xf5f   :  { %7281 = vmatpush3.msra.mxu0 %v6444_v5  ;;  %v6460_v5 = vld [vmem:[%s9213_s9 + $0xb0] sm:$0xff] }
 0xf60   :  { %v3314_v6 = vpop.xlane.xlu0 %3313 }
 0xf61   :  { %v3315_v7 = vsub.f32 %v3311_v44, %v3314_v6  ;;  %v2639_v8 = vpop.xlane.xlu1 %2638  ;;  %v6443_v6 = vld [vmem:[%s9211_s7 + $0x68] sm:$0xff] }
 0xf62   :  { %v2640_v30 = vsub.f32 %v8372_v46, %v2639_v8  ;;  %v6442_v8 = vld [vmem:[%s9211_s7 + $0x60] sm:$0xff]  ;;  %7282 = vmatprep.subr.mxu0 %v6443_v6 }
 0xf63   :  { %v3316_v10 = vmul.f32 1.442695, %v3315_v7  ;;  %7283 = vmatpush3.msra.mxu0 %v6443_v6  ;;  %v6459_v6 = vld [vmem:[%s9213_s9 + $0xa8] sm:$0xff] }
 0xf64   :  { %v2641_v32 = vmul.f32 1.442695, %v2640_v30  ;;  %7284 = vmatprep.subr.mxu0 %v6442_v8 }
 0xf65   :  { %7528 = vpow2.f32 %v3316_v10  ;;  %v3151_v13 = vpop.xlane.xlu1 %3150  ;;  %7285 = vmatpush3.msra.mxu0 %v6442_v8  ;;  %v6457_v8 = vld [vmem:[%s9213_s9 + $0x98] sm:$0xff] }
 0xf66   :  { %v8380_v11 = vpop.eup %7524  ;;  %v3152_v12 = vsub.f32 %v3148_v50, %v3151_v13 }
 0xf67   :  { %v2810_v14 = vsel %vm421_vm3, %v8380_v11, 0.0 }
 0xf68   :  { %v3153_v15 = vmul.f32 1.442695, %v3152_v12  ;;  %2811 = vadd.xlane.f32.xlu0 %v2810_v14  ;;  %v3647_v16 = vpop.xlane.xlu0 %3646  ;;  %v6440_v12 = vld [vmem:[%s9211_s7 + $0x50] sm:$0xff] }
 0xf69   :  { %v3648_v17 = vsub.f32 %v3644_v58, %v3647_v16  ;;  %v3481_v18 = vpop.xlane.xlu1 %3480  ;;  %v6439_v16 = vld [vmem:[%s9211_s7 + $0x48] sm:$0xff] }
 0xf6a   :  { %v8384_v19 = vpop.eup %7526  ;;  %7530 = vpow2.f32 %v3153_v15  ;;  %v3482_v41 = vsub.f32 %v3478_v54, %v3481_v18 }
 0xf6b   :  { %v3649_v20 = vmul.f32 1.442695, %v3648_v17  ;;  %v2976_v21 = vsel %vm421_vm3, %v8384_v19, 0.0  ;;  %v6438_v17 = vld [vmem:[%s9211_s7 + $0x40] sm:$0xff] }
 0xf6c   :  { %v3483_v22 = vmul.f32 1.442695, %v3482_v41  ;;  %2977 = vadd.xlane.f32.xlu1 %v2976_v21 }
 0xf6d   :  { %7532 = vpow2.f32 %v3649_v20 }
 0xf6e   :  { %7534 = vpow2.f32 %v3483_v22 }
 0xf6f   :  { %7536 = vpow2.f32 %v2641_v32 }
 0xf72   :  { %v8388_v23 = vpop.eup %7528 }
 0xf73   :  { %v3318_v24 = vsel %vm421_vm3, %v8388_v23, 0.0 }
 0xf74   :  { %3319 = vadd.xlane.f32.xlu1 %v3318_v24 }
 0xf77   :  { %v7531_v25 = vpop.eup %7530 }
 0xf78   :  { %v3155_v9 = vsel %vm421_vm3, %v7531_v25, 0.0 }
 0xf79   :  { %3156 = vadd.xlane.f32.xlu0 %v3155_v9 }
 0xf7a   :  { %v8393_v3 = vpop.eup %7532 }
 0xf7b   :  { %v8395_v27 = vpop.eup %7534  ;;  %v3651_v28 = vsel %vm421_vm3, %v8393_v3, 0.0 }
 0xf7c   :  { %3652 = vadd.xlane.f32.xlu1 %v3651_v28  ;;  %v3485_v29 = vsel %vm421_vm3, %v8395_v27, 0.0  ;;  %v7537_v33 = vpop.eup %7536 }
 0xf7d   :  { %3486 = vadd.xlane.f32.xlu0 %v3485_v29  ;;  %v2643_v34 = vsel %vm421_vm3, %v7537_v33, 0.0 }
 0xf8d   :  { %2815 = vrot.lane.b32.xlu1 %v8309_v1, %s9236_s24 }
 0xf93   :  { %2649 = vrot.lane.b32.xlu0 %v8309_v1, %s9238_s23 }
 0xf97   :  { %3324 = vrot.lane.b32.xlu0 %v8301_v56, %s9238_s23 }
 0xf9b   :  { %3656 = vrot.lane.b32.xlu0 %v8301_v56, %s9250_s29 }
 0xfb1   :  { %2644 = vadd.xlane.f32.xlu1 %v2643_v34 }
 0xfc2   :  { %2981 = vrot.lane.b32.xlu1 %v8309_v1, %s9250_s29 }
 0xfc6   :  { %3490 = vrot.lane.b32.xlu1 %v8301_v56, %s9236_s24 }
 0xff1   :  { %v2812_v35 = vpop.xlane.xlu0 %2811 }
 0xff5   :  { %v2978_v44 = vpop.xlane.xlu1 %2977 }
 0xffd   :  { %v3320_v45 = vpop.xlane.xlu1 %3319 }
0x1002   :  { %v3157_v37 = vpop.xlane.xlu0 %3156 }
0x1005   :  { %v3653_v46 = vpop.xlane.xlu1 %3652 }
0x1006   :  { %v3487_v38 = vpop.xlane.xlu0 %3486 }
0x1009   :  { %v2816_v47 = vpop.permute.xlu1 %2815 }
0x100a   :  { %v2650_v42 = vpop.permute.xlu0 %2649 }
0x100b   :  { %7214 = vmatpush3.msra.mxu1 %v2650_v42 }
0x100c   :  { %7223 = vmatprep.subr.mxu1 %v7600_v26 }
0x100e   :  { %v3325_v59 = vpop.permute.xlu0 %3324 }
0x1012   :  { %v3657_v0 = vpop.permute.xlu0 %3656 }
0x103a   :  { %v2645_v48 = vpop.xlane.xlu1 %2644 }
0x103b   :  { %7538 = vrcp.f32 %v2645_v48 }
0x103c   :  { %7540 = vrcp.f32 %v2812_v35 }
0x103d   :  { %7542 = vrcp.f32 %v2978_v44 }
0x103e   :  { %7544 = vrcp.f32 %v3157_v37  ;;  %v2982_v53 = vpop.permute.xlu1 %2981 }
0x103f   :  { %7546 = vrcp.f32 %v3320_v45 }
0x1040   :  { %7548 = vrcp.f32 %v3487_v38 }
0x1041   :  { %7550 = vrcp.f32 %v3653_v46 }
0x1048   :  { %v7539_v1 = vpop.eup %7538 }
0x1049   :  { %v2647_v49 = vmul.f32 %v7539_v1, %v7537_v33  ;;  %v7541_v50 = vpop.eup %7540 }
0x104a   :  { %v2814_v51 = vmul.f32 %v7541_v50, %v8380_v11  ;;  %v7543_v52 = vpop.eup %7542  ;;  %v6441_v11 = vld [vmem:[%s9211_s7 + $0x58] sm:$0xff] }
0x104b   :  { %7216 = vmatmul.mubr.msk.f32.vlgmr.msra.gmra.mxu1 %vm421_vm3, %v2647_v49  ;;  %v2980_v54 = vmul.f32 %v7543_v52, %v8384_v19  ;;  %v7545_v55 = vpop.eup %7544  ;;  %7286 = vmatprep.subr.mxu0 %v6441_v11 }
0x104c   :  { %7224 = vmatpush3.msra.mxu1 %v2816_v47  ;;  %7225 = vmatprep.mubr.msk.f32.mxu1 %vm7601_vm1, %v7600_v26  ;;  %v3159_v57 = vmul.f32 %v7545_v55, %v7531_v25  ;;  %v7547_v58 = vpop.eup %7546 }
0x104d   :  { %7233 = vmatprep.subr.mxu1 %v7600_v26  ;;  %v3322_v60 = vmul.f32 %v7547_v58, %v8388_v23  ;;  %v7549_v61 = vpop.eup %7548  ;;  %7287 = vmatpush3.msra.mxu0 %v6441_v11  ;;  %v6454_v11 = vld [vmem:[%s9213_s9 + $0x80] sm:$0xff] }
0x104e   :  { %v3489_v62 = vmul.f32 %v7549_v61, %v8395_v27  ;;  %v7551_v63 = vpop.eup %7550  ;;  %7288 = vmatprep.subr.mxu0 %v6440_v12  ;;  %v6467_v61 = vld [vmem:[%s9213_s9 + $0xe8] sm:$0xff] }
0x104f   :  { %7226 = vmatmul.mubr.msk.f32.vlgmr.msra.gmra.mxu1 %vm421_vm3, %v2814_v51  ;;  %v3655_v2 = vmul.f32 %v7551_v63, %v8393_v3  ;;  %7289 = vmatpush3.msra.mxu0 %v6440_v12  ;;  %v6464_v63 = vld [vmem:[%s9213_s9 + $0xd0] sm:$0xff]  ;;  %v6504_v12 = vld [vmem:[%s9214_s11 + $0x1f8] sm:$0xff] }
0x1050   :  { %7234 = vmatpush3.msra.mxu1 %v2982_v53  ;;  %7235 = vmatprep.mubr.msk.f32.mxu1 %vm7601_vm1, %v7600_v26 }
0x1051   :  { %7243 = vmatprep.subr.mxu1 %v7600_v26  ;;  %7290 = vmatprep.subr.mxu0 %v6439_v16 }
0x1052   :  { %7291 = vmatpush3.msra.mxu0 %v6439_v16  ;;  %v6487_v16 = vld [vmem:[%s9214_s11 + $0x170] sm:$0xff] }
0x1053   :  { %7236 = vmatmul.mubr.msk.f32.vlgmr.msra.gmra.mxu1 %vm421_vm3, %v2980_v54  ;;  %7292 = vmatprep.subr.mxu0 %v6438_v17 }
0x1054   :  { %7244 = vmatpush3.msra.mxu1 %v8301_v56  ;;  %7245 = vmatprep.mubr.msk.f32.mxu1 %vm7601_vm1, %v7600_v26  ;;  %v3491_v56 = vpop.permute.xlu1 %3490 }
0x1055   :  { %7253 = vmatprep.subr.mxu1 %v7600_v26  ;;  %7293 = vmatpush3.msra.mxu0 %v6438_v17  ;;  %v6502_v17 = vld [vmem:[%s9214_s11 + $0x1e8] sm:$0xff] }
0x1056   :  { %6828 = vmatprep.subr.mxu0 %v6504_v12 }
0x1057   :  { %7246 = vmatmul.mubr.msk.f32.vlgmr.msra.gmra.mxu1 %vm421_vm3, %v3159_v57 }
0x1058   :  { %7254 = vmatpush3.msra.mxu1 %v3325_v59  ;;  %7255 = vmatprep.mubr.msk.f32.mxu1 %vm7601_vm1, %v7600_v26  ;;  %v6469_v59 = vld [vmem:[%s9213_s9 + $0xf8] sm:$0xff] }
0x1059   :  { %7263 = vmatprep.subr.mxu1 %v7600_v26 }
0x105b   :  { %7256 = vmatmul.mubr.msk.f32.vlgmr.msra.gmra.mxu1 %vm421_vm3, %v3322_v60  ;;  %v6468_v60 = vld [vmem:[%s9213_s9 + $0xf0] sm:$0xff] }
0x105c   :  { %7264 = vmatpush3.msra.mxu1 %v3491_v56  ;;  %7265 = vmatprep.mubr.msk.f32.mxu1 %vm7601_vm1, %v7600_v26  ;;  %v6466_v56 = vld [vmem:[%s9213_s9 + $0xe0] sm:$0xff] }
0x105d   :  { %7273 = vmatprep.subr.mxu1 %v7600_v26 }
0x105f   :  { %7266 = vmatmul.mubr.msk.f32.vlgmr.msra.gmra.mxu1 %vm421_vm3, %v3489_v62  ;;  %v6465_v62 = vld [vmem:[%s9213_s9 + $0xd8] sm:$0xff] }
0x1060   :  { %7274 = vmatpush3.msra.mxu1 %v3657_v0  ;;  %7275 = vmatprep.mubr.msk.f32.mxu1 %vm7601_vm1, %v7600_v26  ;;  %v6463_v0 = vld [vmem:[%s9213_s9 + $0xc8] sm:$0xff] }
0x1061   :  { %3945 = vmatprep.subr.mxu1 %v6469_v59  ;;  %v6474_v59 = vld [vmem:[%s9214_s11 + $0x108] sm:$0xff] }
0x1063   :  { %7276 = vmatmul.mubr.msk.f32.vlgmr.msra.gmra.mxu1 %vm421_vm3, %v3655_v2  ;;  %v6462_v2 = vld [vmem:[%s9213_s9 + $0xc0] sm:$0xff] }
0x1064   :  { %3993 = vmatprep.mubr.f32.mxu1 %v7600_v26  ;;  %3946 = vmatpush1.msra.mxu1 %v6468_v60  ;;  %v6489_v60 = vld [vmem:[%s9214_s11 + $0x180] sm:$0xff] }
0x1065   :  { %3947 = vmatprep.subr.mxu1 %v6467_v61  ;;  %v6473_v61 = vld [vmem:[%s9214_s11 + $0x100] sm:$0xff] }
0x1066   :  { %3948 = vmatpush1.msra.mxu1 %v6466_v56  ;;  %v6470_v56 = vld [vmem:[%s9217_s10 + $0x2] sm:$0x3] }
0x1067   :  { %3949 = vmatprep.subr.mxu1 %v6465_v62  ;;  %v3916_v62 = vrot.slane %v6470_v56, %v8167_v31 }
0x1068   :  { %3950 = vmatpush1.msra.mxu1 %v6464_v63  ;;  %v3920_v63 = vrot.slane %v6470_v56, %v8172_v39 }
0x1069   :  { %3951 = vmatprep.subr.mxu1 %v6463_v0 }
0x106a   :  { %3952 = vmatpush1.msra.mxu1 %v6462_v2 }
0x106b   :  { %3953 = vmatprep.subr.mxu1 %v6461_v4 }
0x106c   :  { %3954 = vmatpush1.msra.mxu1 %v6460_v5 }
0x106d   :  { %3955 = vmatprep.subr.mxu1 %v6459_v6 }
0x110b   :  { %v2721_v7 = vpop.f32.mrf.mxu1 }
0x110c   :  { %3058 = vrot.lane.b32.xlu1 %v2721_v7, %s9251_s27  ;;  %v6458_v7 = vld [vmem:[%s9213_s9 + $0xa0] sm:$0xff] }
0x110d   :  { %v7217_v10 = vpop.f32.mrf.mxu1  ;;  %3956 = vmatpush1.msra.mxu1 %v6458_v7 }
0x110e   :  { %v6456_v10 = vld [vmem:[%s9213_s9 + $0x90] sm:$0xff]  ;;  %3957 = vmatprep.subr.mxu1 %v6457_v8 }
0x110f   :  { %v2887_v13 = vpop.f32.mrf.mxu1  ;;  %3958 = vmatpush1.msra.mxu1 %v6456_v10 }
0x1110   :  { %3062 = vrot.lane.b32.xlu0 %v2887_v13, %s9252_s28  ;;  %v6455_v13 = vld [vmem:[%s9213_s9 + $0x88] sm:$0xff] }
0x1111   :  { %v7227_v14 = vpop.f32.mrf.mxu1  ;;  %3959 = vmatprep.subr.mxu1 %v6455_v13 }
0x1112   :  { %3960 = vmatpush1.msra.mxu1 %v6454_v11  ;;  %v6488_v14 = vld [vmem:[%s9214_s11 + $0x178] sm:$0xff] }
0x1113   :  { %v3053_v15 = vpop.f32.mrf.mxu1 }
0x1114   :  { %3066 = vrot.lane.b32.xlu0 %v3053_v15, %s9253_s25  ;;  %v6503_v15 = vld [vmem:[%s9214_s11 + $0x1f0] sm:$0xff] }
0x1115   :  { %v7237_v18 = vpop.f32.mrf.mxu1 }
0x1116   :  { %v6486_v18 = vld [vmem:[%s9214_s11 + $0x168] sm:$0xff] }
0x1117   :  { %v3229_v19 = vpop.f32.mrf.mxu1 }
0x1119   :  { %v7247_v41 = vpop.f32.mrf.mxu1 }
0x111a   :  { %v6485_v41 = vld [vmem:[%s9214_s11 + $0x160] sm:$0xff] }
0x111b   :  { %v3396_v20 = vpop.f32.mrf.mxu1 }
0x111c   :  { %3733 = vrot.lane.b32.xlu1 %v3396_v20, %s9251_s27  ;;  %v6500_v20 = vld [vmem:[%s9214_s11 + $0x1d8] sm:$0xff] }
0x111d   :  { %v7257_v21 = vpop.f32.mrf.mxu1 }
0x111e   :  { %v6484_v21 = vld [vmem:[%s9214_s11 + $0x158] sm:$0xff] }
0x111f   :  { %v3562_v22 = vpop.f32.mrf.mxu1 }
0x1120   :  { %3737 = vrot.lane.b32.xlu1 %v3562_v22, %s9252_s28  ;;  %v6499_v22 = vld [vmem:[%s9214_s11 + $0x1d0] sm:$0xff] }
0x1121   :  { %v7267_v23 = vpop.f32.mrf.mxu1 }
0x1122   :  { %v6483_v23 = vld [vmem:[%s9214_s11 + $0x150] sm:$0xff] }
0x1123   :  { %v3728_v24 = vpop.f32.mrf.mxu1 }
0x1124   :  { %3741 = vrot.lane.b32.xlu0 %v3728_v24, %s9253_s25  ;;  %v6498_v24 = vld [vmem:[%s9214_s11 + $0x1c8] sm:$0xff] }
0x1125   :  { %v7277_v25 = vpop.f32.mrf.mxu1 }
0x1126   :  { %v6482_v25 = vld [vmem:[%s9214_s11 + $0x148] sm:$0xff] }
0x117e   :  { %v3059_v9 = vpop.permute.xlu1 %3058 }
0x117f   :  { %v3069_v27 = vsel %vm343_vm2, %v8370_v36, %v3059_v9  ;;  %v6447_v36 = vld [vmem:[%s9212_s8 + $0x1] ss:$0 sm:$0xff] }
0x1180   :  { %v6497_v9 = vld [vmem:[%s9214_s11 + $0x1c0] sm:$0xff] }
0x1182   :  { %v3063_v3 = vpop.permute.xlu0 %3062 }
0x1183   :  { %v3070_v28 = vsel %vm1018_vm4, %v3069_v27, %v3063_v3  ;;  %v6481_v3 = vld [vmem:[%s9214_s11 + $0x140] sm:$0xff]  ;;  %v6496_v27 = vld [vmem:[%s9214_s11 + $0x1b8] sm:$0xff] }
0x1186   :  { %v3067_v29 = vpop.permute.xlu0 %3066 }
0x1187   :  { %v3071_v30 = vsel %vm1020_vm5, %v3070_v28, %v3067_v29  ;;  %v6480_v28 = vld [vmem:[%s9214_s11 + $0x138] sm:$0xff]  ;;  %v6495_v29 = vld [vmem:[%s9214_s11 + $0x1b0] sm:$0xff] }
0x1188   :  { %7294 = vmatprep.mubr.msk.f32.mxu0 %vm81_vm0, %v3071_v30  ;;  %v6479_v30 = vld [vmem:[%s9214_s11 + $0x130] sm:$0xff] }
0x118e   :  { %v3734_v32 = vpop.permute.xlu1 %3733 }
0x118f   :  { %v3744_v34 = vsel %vm343_vm2, %v3229_v19, %v3734_v32  ;;  %v6501_v19 = vld [vmem:[%s9214_s11 + $0x1e0] sm:$0xff]  ;;  %v6494_v32 = vld [vmem:[%s9214_s11 + $0x1a8] sm:$0xff] }
0x1192   :  { %v3738_v33 = vpop.permute.xlu1 %3737 }
0x1193   :  { %v3745_v35 = vsel %vm1018_vm4, %v3744_v34, %v3738_v33  ;;  %v6478_v33 = vld [vmem:[%s9214_s11 + $0x128] sm:$0xff]  ;;  %v6493_v34 = vld [vmem:[%s9214_s11 + $0x1a0] sm:$0xff] }
0x1196   :  { %v3742_v37 = vpop.permute.xlu0 %3741 }
0x1197   :  { %v3746_v38 = vsel %vm1020_vm5, %v3745_v35, %v3742_v37  ;;  %v6477_v35 = vld [vmem:[%s9214_s11 + $0x120] sm:$0xff] }
0x1198   :  { %7295 = vmatmul.mubr.msk.f32.vlgmr.msra.gmra.mxu0 %vm81_vm0, %v3746_v38 }
0x1199   :  { %6829 = vmatpush3.msra.mxu0 %v6488_v14 }
0x119a   :  { %6830 = vmatprep.subr.mxu0 %v6503_v15 }
0x119b   :  { %6831 = vmatpush3.msra.mxu0 %v6487_v16  ;;  %v6506_v16 = vld [vmem:[%s9218_s12 + $0x1] ss:$0 sm:$0xff] }
0x119c   :  { %6832 = vmatprep.subr.mxu0 %v6502_v17 }
0x119d   :  { %6833 = vmatpush3.msra.mxu0 %v6486_v18 }
0x119e   :  { %6834 = vmatprep.subr.mxu0 %v6501_v19 }
0x119f   :  { %6835 = vmatpush3.msra.mxu0 %v6485_v41 }
0x11a0   :  { %6836 = vmatprep.subr.mxu0 %v6500_v20 }
0x11a1   :  { %6837 = vmatpush3.msra.mxu0 %v6484_v21 }
0x11a2   :  { %6838 = vmatprep.subr.mxu0 %v6499_v22 }
0x11a3   :  { %6839 = vmatpush3.msra.mxu0 %v6483_v23 }
0x11a4   :  { %6840 = vmatprep.subr.mxu0 %v6498_v24 }
0x11a5   :  { %6841 = vmatpush3.msra.mxu0 %v6482_v25 }
0x11a6   :  { %6842 = vmatprep.subr.mxu0 %v6497_v9 }
0x11a7   :  { %6843 = vmatpush3.msra.mxu0 %v6481_v3 }
0x11a8   :  { %6844 = vmatprep.subr.mxu0 %v6496_v27 }
0x11a9   :  { %6845 = vmatpush3.msra.mxu0 %v6480_v28 }
0x11aa   :  { %6846 = vmatprep.subr.mxu0 %v6495_v29 }
0x11ab   :  { %6847 = vmatpush3.msra.mxu0 %v6479_v30 }
0x11ac   :  { %6848 = vmatprep.subr.mxu0 %v6494_v32 }
0x11ad   :  { %6849 = vmatpush3.msra.mxu0 %v6478_v33 }
0x11ae   :  { %6850 = vmatprep.subr.mxu0 %v6493_v34 }
0x11af   :  { %6851 = vmatpush3.msra.mxu0 %v6477_v35 }
0x1258   :  { %v7296_v42 = vpop.f32.mrf.mxu0 }
0x1259   :  { %v3842_v44 = vadd.f32 %v7296_v42, %v6447_v36 }
0x125a   :  { %v3836_v45 = vpop.f32.mrf.mxu0 }
0x125b   :  { %v3837_v46 = vadd.f32 %v6447_v36, %v3836_v45  ;;  %v3846_v47 = vadd.f32 %v3842_v44, %v8257_v43 }
0x125d   :  { %v3854_v48 = vsel %vm81_vm0, %v3846_v47, 0.0  ;;  %v3845_v1 = vadd.f32 %v3837_v46, %v8251_v40 }
0x125e   :  { %3855 = vadd.xlane.f32.xlu0 %v3854_v48 }
0x125f   :  { %v3851_v49 = vsel %vm81_vm0, %v3845_v1, 0.0 }
0x1260   :  { %3852 = vadd.xlane.f32.xlu1 %v3851_v49  ;;  %v6452_v49 = vld [vmem:[%s9215_s13 + $0x1] ss:$0 sm:$0xff] }
0x12e7   :  { %v3856_v50 = vpop.xlane.xlu0 %3855 }
0x12e8   :  { %v3858_v51 = vmul.f32 0.015625, %v3856_v50 }
0x12e9   :  { %v3853_v52 = vpop.xlane.xlu1 %3852 }
0x12ea   :  { %v8493_v53 = vsub.f32 %v3846_v47, %v3858_v51  ;;  %v3857_v54 = vmul.f32 0.015625, %v3853_v52  ;;  %v6453_v51 = vld [vmem:[%s9216_s14 + $0x1] ss:$0 sm:$0xff] }
0x12ec   :  { %v8495_v55 = vsub.f32 %v3845_v1, %v3857_v54  ;;  %v3862_v57 = vmul.f32 %v8493_v53, %v8493_v53 }
0x12ee   :  { %v3866_v43 = vsel %vm81_vm0, %v3862_v57, 0.0  ;;  %v3861_v40 = vmul.f32 %v8495_v55, %v8495_v55 }
0x12ef   :  { %3867 = vadd.xlane.f32.xlu1 %v3866_v43  ;;  %v6491_v43 = vld [vmem:[%s9214_s11 + $0x190] sm:$0xff] }
0x12f0   :  { %v3863_v58 = vsel %vm81_vm0, %v3861_v40, 0.0  ;;  %v6475_v40 = vld [vmem:[%s9214_s11 + $0x110] sm:$0xff] }
0x12f1   :  { %3864 = vadd.xlane.f32.xlu0 %v3863_v58  ;;  %v6490_v58 = vld [vmem:[%s9214_s11 + $0x188] sm:$0xff] }
0x1378   :  { %v3868_v37 = vpop.xlane.xlu1 %3867 }
0x1379   :  { %v3870_v38 = vmul.f32 0.015625, %v3868_v37 }
0x137a   :  { %v3865_v36 = vpop.xlane.xlu0 %3864 }
0x137b   :  { %v3872_v42 = vadd.f32 1e-05, %v3870_v38  ;;  %v3869_v44 = vmul.f32 0.015625, %v3865_v36  ;;  %v6518_v38 = vld [vmem:[%s9246_s20 + $0xb8] sm:$0xff] }
0x137c   :  { %v6542_v36 = vld [vmem:[%s9249_s1 + $0xb8] sm:$0xff]  ;;  %7297 = vmatprep.subr.mxu1 %v6518_v38 }
0x137d   :  { %7552 = vrsqrt.f32 %v3872_v42  ;;  %v3871_v45 = vadd.f32 1e-05, %v3869_v44  ;;  %v6517_v42 = vld [vmem:[%s9246_s20 + $0xb0] sm:$0xff] }
0x137e   :  { %v6541_v44 = vld [vmem:[%s9249_s1 + $0xb0] sm:$0xff] }
0x137f   :  { %7554 = vrsqrt.f32 %v3871_v45  ;;  %v6516_v45 = vld [vmem:[%s9246_s20 + $0xa8] sm:$0xff] }
0x138a   :  { %v7553_v46 = vpop.eup %7552 }
0x138b   :  { %v3876_v1 = vmul.f32 %v7553_v46, %v8493_v53  ;;  %v6492_v53 = vld [vmem:[%s9214_s11 + $0x198] sm:$0xff]  ;;  %v6540_v46 = vld [vmem:[%s9249_s1 + $0xa8] sm:$0xff] }
0x138c   :  { %v7555_v47 = vpop.eup %7554  ;;  %6852 = vmatprep.subr.mxu0 %v6492_v53  ;;  %v6535_v53 = vld [vmem:[%s9249_s1 + $0x80] sm:$0xff] }
0x138d   :  { %v3875_v48 = vmul.f32 %v7555_v47, %v8495_v55  ;;  %v3884_v54 = vmul.f32 %v6452_v49, %v3876_v1  ;;  %v6476_v55 = vld [vmem:[%s9214_s11 + $0x118] sm:$0xff]  ;;  %v6515_v47 = vld [vmem:[%s9246_s20 + $0xa0] sm:$0xff] }
0x138e   :  { %6853 = vmatpush3.msra.mxu0 %v6476_v55  ;;  %v6514_v1 = vld [vmem:[%s9246_s20 + $0x98] sm:$0xff] }
0x138f   :  { %v3883_v50 = vmul.f32 %v6452_v49, %v3875_v48  ;;  %v3892_v57 = vadd.f32 %v6453_v51, %v3884_v54  ;;  %6854 = vmatprep.subr.mxu0 %v6491_v43  ;;  %v6539_v48 = vld [vmem:[%s9249_s1 + $0xa0] sm:$0xff]  ;;  %v6538_v49 = vld [vmem:[%s9249_s1 + $0x98] sm:$0xff]  ;;  %v6536_v54 = vld [vmem:[%s9249_s1 + $0x88] sm:$0xff] }
0x1390   :  { %6855 = vmatpush3.msra.mxu0 %v6475_v40  ;;  %v6530_v55 = vld [vmem:[%s9248_s26 + $0xb8] sm:$0xff] }
0x1391   :  { %v3891_v52 = vadd.f32 %v6453_v51, %v3883_v50  ;;  %6856 = vmatprep.subr.mxu0 %v6490_v58  ;;  %v6513_v50 = vld [vmem:[%s9246_s20 + $0x90] sm:$0xff] }
0x1392   :  { %6857 = vmatpush3.msra.mxu0 %v6474_v59  ;;  %v6537_v51 = vld [vmem:[%s9249_s1 + $0x90] sm:$0xff] }
0x1393   :  { %6471 = vmatmul.mubr.msk.f32.vlgmr.msra.gmra.mxu1 %vm81_vm0, %v3891_v52  ;;  %6858 = vmatprep.subr.mxu0 %v6489_v60 }
0x1394   :  { %3999 = vmatprep.mubr.f32.mxu1 %v7600_v26  ;;  %6859 = vmatpush3.msra.mxu0 %v6473_v61 }
0x1395   :  { %7335 = vmatprep.subr.mxu0 %v6542_v36  ;;  %7298 = vmatpush3.msra.mxu1 %v6518_v38 }
0x1396   :  { %7299 = vmatprep.subr.mxu1 %v6517_v42 }
0x1397   :  { %6472 = vmatmul.mubr.msk.f32.gmra.mxu1 %vm81_vm0, %v3892_v57 }
0x1398   :  { %7300 = vmatpush3.msra.mxu1 %v6517_v42 }
0x1399   :  { %7301 = vmatprep.subr.mxu1 %v6516_v45 }
0x139a   :  { %7302 = vmatpush3.msra.mxu1 %v6516_v45 }
0x139b   :  { %7303 = vmatprep.subr.mxu1 %v6515_v47 }
0x139c   :  { %7304 = vmatpush3.msra.mxu1 %v6515_v47 }
0x139d   :  { %7305 = vmatprep.subr.mxu1 %v6514_v1 }
0x139e   :  { %7306 = vmatpush3.msra.mxu1 %v6514_v1 }
0x139f   :  { %7307 = vmatprep.subr.mxu1 %v6513_v50 }
0x13a0   :  { %7308 = vmatpush3.msra.mxu1 %v6513_v50 }
0x1453   :  { %v3995_v0 = vpop.f32.mrf.mxu1 }
0x1454   :  { %v3996_v2 = vadd.f32 %v3995_v0, %v3916_v62  ;;  %v6510_v0 = vld [vmem:[%s9220_s16 + $0x1] ss:$0 sm:$0xff] }
0x1455   :  { %v3997_v4 = vpop.f32.mrf.mxu1 }
0x1456   :  { %v3998_v5 = vadd.f32 %v3997_v4, %v3920_v63  ;;  %v4006_v8 = vmax.f32 %v3996_v2, 0.0 }
0x1457   :  { %v4001_v6 = vpop.f32.mrf.mxu1 }
0x1458   :  { %v4007_v7 = vmax.f32 %v3998_v5, 0.0  ;;  %v4002_v10 = vadd.f32 %v4001_v6, %v3916_v62  ;;  %v6509_v62 = vld [vmem:[%s9219_s15 + $0x1] ss:$0 sm:$0xff] }
0x1459   :  { %v4003_v13 = vpop.f32.mrf.mxu1 }
0x145a   :  { %v4004_v11 = vadd.f32 %v4003_v13, %v3920_v63  ;;  %4115 = vmatprep.mubr.f32.mxu0 %v4007_v7  ;;  %v4008_v14 = vmax.f32 %v4002_v10, 0.0  ;;  %v6529_v10 = vld [vmem:[%s9248_s26 + $0xb0] sm:$0xff]  ;;  %v6528_v13 = vld [vmem:[%s9248_s26 + $0xa8] sm:$0xff] }
0x145b   :  { %4116 = vmatmul.mubr.f32.vlgmr.msra.gmra.mxu0 %v4006_v8 }
0x145c   :  { %v4009_v12 = vmax.f32 %v4004_v11, 0.0  ;;  %7336 = vmatpush3.msra.mxu0 %v6542_v36  ;;  %v6527_v11 = vld [vmem:[%s9248_s26 + $0xa0] sm:$0xff] }
0x145d   :  { %7337 = vmatprep.subr.mxu0 %v6541_v44 }
0x145e   :  { %4120 = vmatprep.mubr.f32.mxu0 %v4009_v12  ;;  %7338 = vmatpush3.msra.mxu0 %v6541_v44  ;;  %v6526_v12 = vld [vmem:[%s9248_s26 + $0x98] sm:$0xff] }
0x145f   :  { %4121 = vmatmul.mubr.f32.gmra.mxu0 %v4008_v14  ;;  %7339 = vmatprep.subr.mxu0 %v6540_v46  ;;  %v6525_v14 = vld [vmem:[%s9248_s26 + $0x90] sm:$0xff] }
0x1460   :  { %7340 = vmatpush3.msra.mxu0 %v6540_v46 }
0x1461   :  { %7341 = vmatprep.subr.mxu0 %v6539_v48 }
0x1462   :  { %7342 = vmatpush3.msra.mxu0 %v6539_v48 }
0x1463   :  { %7343 = vmatprep.subr.mxu0 %v6538_v49 }
0x1464   :  { %7344 = vmatpush3.msra.mxu0 %v6538_v49 }
0x1465   :  { %7345 = vmatprep.subr.mxu0 %v6537_v51 }
0x1466   :  { %7346 = vmatpush3.msra.mxu0 %v6537_v51 }
0x1467   :  { %7347 = vmatprep.subr.mxu0 %v6536_v54 }
0x1468   :  { %7348 = vmatpush3.msra.mxu0 %v6536_v54 }
0x1469   :  { %7349 = vmatprep.subr.mxu0 %v6535_v53 }
0x146a   :  { %7350 = vmatpush3.msra.mxu0 %v6535_v53 }
0x146b   :  { %7374 = vmatprep.subr.mxu0 %v7600_v26 }
0x151b   :  { %v6860_v15 = vpop.f32.mrf.mxu0 }
0x151d   :  { %v6861_v17 = vpop.f32.mrf.mxu0 }
0x151e   :  { %v6862_v18 = vadd.f32 %v6861_v17, %v6860_v15  ;;  %v6524_v15 = vld [vmem:[%s9248_s26 + $0x88] sm:$0xff]  ;;  %v6520_v17 = vld [vmem:[%s9209_s2 + $0x2] ss:$0 sm:$0xff]  ;;  %s9255_s2 = smov 96  }
0x151f   :  { %v6863_v19 = vpop.f32.mrf.mxu0 }
0x1520   :  { %v4118_v41 = vadd.f32 %v6862_v18, %v6506_v16  ;;  %v6544_v18 = vld [vmem:[%s9210_s6 + $0x2] ss:$0 sm:$0xff] }
0x1521   :  { %v6864_v20 = vpop.f32.mrf.mxu0 }
0x1522   :  { %v6865_v21 = vadd.f32 %v6864_v20, %v6863_v19  ;;  %v4126_v22 = vadd.f32 %v4118_v41, %v3891_v52  ;;  %v6512_v52 = vld [vmem:[%s9246_s20 + $0x88] sm:$0xff] }
0x1523   :  { %7309 = vmatprep.subr.mxu1 %v6512_v52 }
0x1524   :  { %v4123_v23 = vadd.f32 %v6865_v21, %v6506_v16  ;;  %v4132_v24 = vsel %vm81_vm0, %v4126_v22, 0.0  ;;  %7310 = vmatpush3.msra.mxu1 %v6512_v52  ;;  %v6523_v16 = vld [vmem:[%s9248_s26 + $0x80] sm:$0xff]  ;;  %s9254_s26 = smov 112  }
0x1525   :  { %4133 = vadd.xlane.f32.xlu0 %v4132_v24  ;;  %v6532_v24 = vld [vmem:[%s9208_s4 + $0x2] ss:$0 sm:$0xff] }
0x1526   :  { %v4127_v25 = vadd.f32 %v4123_v23, %v3892_v57  ;;  %v6511_v57 = vld [vmem:[%s9246_s20 + $0x80] sm:$0xff] }
0x1527   :  { %7311 = vmatprep.subr.mxu1 %v6511_v57 }
0x1528   :  { %v4135_v9 = vsel %vm81_vm0, %v4127_v25, 0.0  ;;  %7312 = vmatpush3.msra.mxu1 %v6511_v57 }
0x1529   :  { %4136 = vadd.xlane.f32.xlu1 %v4135_v9  ;;  %7316 = vmatprep.subr.mxu1 %v6530_v55 }
0x15ae   :  { %v4134_v3 = vpop.xlane.xlu0 %4133 }
0x15af   :  { %v4138_v27 = vmul.f32 0.015625, %v4134_v3 }
0x15b1   :  { %v8668_v28 = vsub.f32 %v4126_v22, %v4138_v27 }
0x15b2   :  { %v4137_v29 = vpop.xlane.xlu1 %4136 }
0x15b3   :  { %v4139_v30 = vmul.f32 0.015625, %v4137_v29  ;;  %v4142_v32 = vmul.f32 %v8668_v28, %v8668_v28 }
0x15b5   :  { %v8672_v33 = vsub.f32 %v4127_v25, %v4139_v30  ;;  %v4144_v34 = vsel %vm81_vm0, %v4142_v32, 0.0 }
0x15b6   :  { %4145 = vadd.xlane.f32.xlu0 %v4144_v34 }
0x15b7   :  { %v4143_v35 = vmul.f32 %v8672_v33, %v8672_v33 }
0x15b9   :  { %v4147_v37 = vsel %vm81_vm0, %v4143_v35, 0.0 }
0x15ba   :  { %4148 = vadd.xlane.f32.xlu1 %v4147_v37 }
0x163f   :  { %v4146_v43 = vpop.xlane.xlu0 %4145 }
0x1640   :  { %v4150_v40 = vmul.f32 0.015625, %v4146_v43 }
0x1642   :  { %v4152_v58 = vadd.f32 1e-05, %v4150_v40 }
0x1643   :  { %v4149_v59 = vpop.xlane.xlu1 %4148 }
0x1644   :  { %7556 = vrsqrt.f32 %v4152_v58  ;;  %v4151_v60 = vmul.f32 0.015625, %v4149_v59 }
0x1646   :  { %v4153_v61 = vadd.f32 1e-05, %v4151_v60 }
0x1648   :  { %7558 = vrsqrt.f32 %v4153_v61 }
0x1651   :  { %v7557_v56 = vpop.eup %7556 }
0x1652   :  { %v4156_v63 = vmul.f32 %v7557_v56, %v8668_v28 }
0x1654   :  { %v4164_v2 = vmul.f32 %v6509_v62, %v4156_v63 }
0x1655   :  { %v7559_v4 = vpop.eup %7558 }
0x1656   :  { %v4157_v5 = vmul.f32 %v7559_v4, %v8672_v33  ;;  %v8738_v6 = vadd.f32 %v6510_v0, %v4164_v2 }
0x1658   :  { %v4165_v7 = vmul.f32 %v6509_v62, %v4157_v5  ;;  %7313 = vmatprep.mubr.msk.f32.mxu1 %vm81_vm0, %v8738_v6  ;;  %7351 = vmatprep.mubr.msk.f32.mxu0 %vm81_vm0, %v8738_v6 }
0x165a   :  { %v8744_v8 = vadd.f32 %v6510_v0, %v4165_v7 }
0x165c   :  { %7314 = vmatmul.mubr.msk.f32.vlgmr.msra.gmra.mxu1 %vm81_vm0, %v8744_v8  ;;  %7352 = vmatmul.mubr.msk.f32.vlgmr.msra.gmra.mxu0 %vm81_vm0, %v8744_v8 }
0x165d   :  { %7317 = vmatpush3.msra.mxu1 %v6530_v55  ;;  %7332 = vmatprep.mubr.msk.f32.mxu1 %vm81_vm0, %v8738_v6 }
0x165e   :  { %7318 = vmatprep.subr.mxu1 %v6529_v10  ;;  %7376 = vmatprep.mubr.msk.f32.mxu0 %vm7601_vm1, %v7600_v26 }
0x165f   :  { %7319 = vmatpush3.msra.mxu1 %v6529_v10 }
0x1660   :  { %7320 = vmatprep.subr.mxu1 %v6528_v13 }
0x1661   :  { %7321 = vmatpush3.msra.mxu1 %v6528_v13 }
0x1662   :  { %7322 = vmatprep.subr.mxu1 %v6527_v11 }
0x1663   :  { %7323 = vmatpush3.msra.mxu1 %v6527_v11 }
0x1664   :  { %7324 = vmatprep.subr.mxu1 %v6526_v12 }
0x1665   :  { %7325 = vmatpush3.msra.mxu1 %v6526_v12 }
0x1666   :  { %7326 = vmatprep.subr.mxu1 %v6525_v14 }
0x1667   :  { %7327 = vmatpush3.msra.mxu1 %v6525_v14 }
0x1668   :  { %7328 = vmatprep.subr.mxu1 %v6524_v15 }
0x1669   :  { %7329 = vmatpush3.msra.mxu1 %v6524_v15 }
0x166a   :  { %7330 = vmatprep.subr.mxu1 %v6523_v16 }
0x166b   :  { %7331 = vmatpush3.msra.mxu1 %v6523_v16 }
0x166c   :  { %7333 = vmatmul.mubr.msk.f32.vlgmr.msra.gmra.mxu1 %vm81_vm0, %v8744_v8  ;;  %7354 = vmatprep.subr.mxu1 %v7600_v26 }
0x166d   :  { %7356 = vmatprep.mubr.msk.f32.mxu1 %vm7601_vm1, %v7600_v26 }
0x171c   :  { %v7315_v19 = vpop.f32.mrf.mxu1  ;;  %v7353_v41 = vpop.f32.mrf.mxu0 }
0x171d   :  { %v8786_v20 = vadd.f32 %v7315_v19, %v6520_v17  ;;  %v8788_v21 = vadd.f32 %v7353_v41, %v6544_v18 }
0x171e   :  { %v4263_v22 = vpop.f32.mrf.mxu1  ;;  %v4447_v28 = vpop.f32.mrf.mxu0 }
0x171f   :  { %v4264_v23 = vadd.f32 %v6520_v17, %v4263_v22  ;;  %v8796_v29 = vadd.f32 %v6544_v18, %v4447_v28 }
0x1721   :  { %4617 = vrot.lane.b32.xlu1 %v4264_v23, %s9254_s26 }
0x172c   :  { %v7334_v25 = vpop.f32.mrf.mxu1 }
0x172d   :  { %v4361_v9 = vadd.f32 %v7334_v25, %v6532_v24 }
0x172e   :  { %v4355_v3 = vpop.f32.mrf.mxu1 }
0x172f   :  { %v4356_v27 = vadd.f32 %v6532_v24, %v4355_v3 }
0x1731   :  { %7355 = vmatpush3.xpose.msk.msra.mxu1 %vm343_vm2, %v4356_v27 }
0x1732   :  { %7359 = vmatprep.subr.mxu1 %v7600_v26 }
0x1734   :  { %7357 = vmatmul.mubr.msk.f32.vlgmr.msra.gmra.mxu1 %vm343_vm2, %v4264_v23 }
0x1735   :  { %7360 = vmatpush3.msra.mxu1 %v8796_v29  ;;  %7361 = vmatprep.mubr.msk.f32.mxu1 %vm7601_vm1, %v7600_v26 }
0x1736   :  { %7364 = vmatprep.subr.mxu1 %v7600_v26 }
0x1793   :  { %v4618_v44 = vpop.permute.xlu1 %4617 }
0x17f4   :  { %v4528_v30 = vpop.f32.mrf.mxu1 }
0x17f5   :  { %v4532_v32 = vmul.f32 0.25, %v4528_v30 }
0x17f6   :  { %v7358_v33 = vpop.f32.mrf.mxu1 }
0x17f7   :  { %v4533_v34 = vsel %vm421_vm3, %v4532_v32, -inf }
0x17f8   :  { %4534 = vmax.xlane.f32.xlu0 %v4533_v34 }
0x180e   :  { %4619 = vrot.lane.b32.xlu0 %v4356_v27, %s9254_s26 }
0x1812   :  { %4784 = vrot.lane.b32.xlu0 %v4264_v23, %s9255_s2 }
0x1816   :  { %4950 = vrot.lane.b32.xlu0 %v4264_v23, %s9250_s29 }
0x181a   :  { %5292 = vrot.lane.b32.xlu0 %v8786_v20, %s9254_s26 }
0x181e   :  { %5459 = vrot.lane.b32.xlu0 %v8786_v20, %s9255_s2 }
0x1822   :  { %5625 = vrot.lane.b32.xlu0 %v8786_v20, %s9250_s29 }
0x1881   :  { %v4535_v35 = vpop.xlane.xlu0 %4534 }
0x1882   :  { %v4536_v37 = vsub.f32 %v4532_v32, %v4535_v35 }
0x1884   :  { %v4537_v38 = vmul.f32 1.442695, %v4536_v37 }
0x1885   :  { %v4620_v45 = vpop.permute.xlu0 %4619 }
0x1886   :  { %7560 = vpow2.f32 %v4537_v38 }
0x1889   :  { %v4785_v47 = vpop.permute.xlu0 %4784 }
0x188d   :  { %v4951_v49 = vpop.permute.xlu0 %4950 }
0x1891   :  { %v5293_v52 = vpop.permute.xlu0 %5292 }
0x1893   :  { %v7561_v36 = vpop.eup %7560 }
0x1894   :  { %v4539_v42 = vsel %vm421_vm3, %v7561_v36, 0.0 }
0x1895   :  { %4540 = vadd.xlane.f32.xlu1 %v4539_v42  ;;  %v5460_v53 = vpop.permute.xlu0 %5459 }
0x1899   :  { %v5626_v43 = vpop.permute.xlu0 %5625 }
0x18a6   :  { %4786 = vrot.lane.b32.xlu1 %v4356_v27, %s9255_s2 }
0x18aa   :  { %4952 = vrot.lane.b32.xlu1 %v4356_v27, %s9250_s29 }
0x18ae   :  { %5294 = vrot.lane.b32.xlu1 %v4361_v9, %s9254_s26 }
0x18b2   :  { %5461 = vrot.lane.b32.xlu1 %v4361_v9, %s9255_s2 }
0x18b6   :  { %5627 = vrot.lane.b32.xlu1 %v4361_v9, %s9250_s29 }
0x191e   :  { %v4541_v46 = vpop.xlane.xlu1 %4540 }
0x191f   :  { %7562 = vrcp.f32 %v4541_v46 }
0x1922   :  { %v4787_v48 = vpop.permute.xlu1 %4786 }
0x1923   :  { %7375 = vmatpush3.xpose.msk.msra.mxu0 %vm343_vm2, %v4787_v48 }
0x1924   :  { %7384 = vmatprep.subr.mxu0 %v7600_v26 }
0x1926   :  { %v4953_v1 = vpop.permute.xlu1 %4952  ;;  %7377 = vmatmul.mubr.msk.f32.vlgmr.msra.gmra.mxu0 %vm343_vm2, %v4785_v47 }
0x1927   :  { %7385 = vmatpush3.xpose.msk.msra.mxu0 %vm343_vm2, %v4953_v1  ;;  %7386 = vmatprep.mubr.msk.f32.mxu0 %vm7601_vm1, %v7600_v26 }
0x1928   :  { %7394 = vmatprep.subr.mxu0 %v7600_v26 }
0x192a   :  { %v5295_v50 = vpop.permute.xlu1 %5294  ;;  %7387 = vmatmul.mubr.msk.f32.vlgmr.msra.gmra.mxu0 %vm343_vm2, %v4951_v49 }
0x192b   :  { %7395 = vmatpush3.xpose.msk.msra.mxu0 %vm343_vm2, %v4361_v9  ;;  %7396 = vmatprep.mubr.msk.f32.mxu0 %vm7601_vm1, %v7600_v26 }
0x192c   :  { %v7563_v51 = vpop.eup %7562  ;;  %7404 = vmatprep.subr.mxu0 %v7600_v26 }
0x192d   :  { %v4543_v54 = vmul.f32 %v7563_v51, %v7561_v36 }
0x192e   :  { %7397 = vmatmul.mubr.msk.f32.vlgmr.msra.gmra.mxu0 %vm343_vm2, %v8786_v20  ;;  %v5462_v57 = vpop.permute.xlu1 %5461 }
0x192f   :  { %7362 = vmatmul.mubr.msk.f32.vlgmr.msra.gmra.mxu1 %vm421_vm3, %v4543_v54  ;;  %7405 = vmatpush3.xpose.msk.msra.mxu0 %vm343_vm2, %v5295_v50 }
0x1930   :  { %7365 = vmatpush3.xpose.msk.msra.mxu1 %vm343_vm2, %v4620_v45  ;;  %7406 = vmatprep.mubr.msk.f32.mxu0 %vm7601_vm1, %v7600_v26 }
0x1931   :  { %7366 = vmatprep.mubr.msk.f32.mxu1 %vm7601_vm1, %v7600_v26  ;;  %7414 = vmatprep.subr.mxu0 %v7600_v26 }
0x1932   :  { %7407 = vmatmul.mubr.msk.f32.vlgmr.msra.gmra.mxu0 %vm343_vm2, %v5293_v52  ;;  %7369 = vmatprep.subr.mxu1 %v7600_v26  ;;  %v5628_v55 = vpop.permute.xlu1 %5627 }
0x1933   :  { %7367 = vmatmul.mubr.msk.f32.vlgmr.msra.gmra.mxu1 %vm343_vm2, %v4618_v44  ;;  %7415 = vmatpush3.xpose.msk.msra.mxu0 %vm343_vm2, %v5462_v57 }
0x1934   :  { %7416 = vmatprep.mubr.msk.f32.mxu0 %vm7601_vm1, %v7600_v26  ;;  %7424 = vmatprep.subr.mxu0 %v7600_v26 }
0x1935   :  { %7371 = vmatprep.mubr.msk.f32.mxu1 %vm7601_vm1, %v7600_v26 }
0x1936   :  { %7417 = vmatmul.mubr.msk.f32.vlgmr.msra.gmra.mxu0 %vm343_vm2, %v5460_v53 }
0x1937   :  { %7425 = vmatpush3.xpose.msk.msra.mxu0 %vm343_vm2, %v5628_v55  ;;  %7426 = vmatprep.mubr.msk.f32.mxu0 %vm7601_vm1, %v7600_v26 }
0x193a   :  { %7427 = vmatmul.mubr.msk.f32.vlgmr.msra.gmra.mxu0 %vm343_vm2, %v5626_v43 }
0x19e6   :  { %v4858_v40 = vpop.f32.mrf.mxu0 }
0x19e7   :  { %v4862_v58 = vmul.f32 0.25, %v4858_v40 }
0x19e8   :  { %v7378_v59 = vpop.f32.mrf.mxu0 }
0x19e9   :  { %v4863_v60 = vsel %vm421_vm3, %v4862_v58, -inf }
0x19ea   :  { %4864 = vmax.xlane.f32.xlu0 %v4863_v60  ;;  %v5024_v61 = vpop.f32.mrf.mxu0 }
0x19eb   :  { %v5028_v56 = vmul.f32 0.25, %v5024_v61 }
0x19ec   :  { %v7388_v62 = vpop.f32.mrf.mxu0 }
0x19ed   :  { %v5029_v63 = vsel %vm421_vm3, %v5028_v56, -inf }
0x19ee   :  { %5030 = vmax.xlane.f32.xlu0 %v5029_v63  ;;  %v5203_v0 = vpop.f32.mrf.mxu0 }
0x19ef   :  { %v8857_v2 = vpop.f32.mrf.mxu1  ;;  %v5207_v16 = vmul.f32 0.25, %v5203_v0 }
0x19f0   :  { %v7398_v4 = vpop.f32.mrf.mxu0 }
0x19f1   :  { %v7363_v5 = vpop.f32.mrf.mxu1  ;;  %v5208_v22 = vsel %vm421_vm3, %v5207_v16, -inf }
0x19f2   :  { %v5366_v7 = vpop.f32.mrf.mxu0 }
0x19f3   :  { %v5370_v10 = vmul.f32 0.25, %v5366_v7  ;;  %v4691_v13 = vpop.f32.mrf.mxu1 }
0x19f4   :  { %v8859_v11 = vmul.f32 0.25, %v4691_v13  ;;  %v7408_v12 = vpop.f32.mrf.mxu0 }
0x19f5   :  { %v7368_v14 = vpop.f32.mrf.mxu1  ;;  %v5371_v15 = vsel %vm421_vm3, %v5370_v10, -inf }
0x19f6   :  { %5372 = vmax.xlane.f32.xlu0 %v5371_v15  ;;  %v5533_v17 = vpop.f32.mrf.mxu0  ;;  %v4696_v18 = vsel %vm421_vm3, %v8859_v11, -inf }
0x19f7   :  { %4697 = vmax.xlane.f32.xlu1 %v4696_v18  ;;  %v5537_v41 = vmul.f32 0.25, %v5533_v17 }
0x19f8   :  { %v7418_v19 = vpop.f32.mrf.mxu0 }
0x19f9   :  { %v5538_v9 = vsel %vm421_vm3, %v5537_v41, -inf }
0x19fa   :  { %v5699_v20 = vpop.f32.mrf.mxu0 }
0x19fb   :  { %v5703_v23 = vmul.f32 0.25, %v5699_v20  ;;  %5209 = vmax.xlane.f32.xlu1 %v5208_v22 }
0x19fc   :  { %v7428_v24 = vpop.f32.mrf.mxu0 }
0x19fd   :  { %v5704_v25 = vsel %vm421_vm3, %v5703_v23, -inf }
0x19fe   :  { %5705 = vmax.xlane.f32.xlu0 %v5704_v25 }
0x19ff   :  { %5539 = vmax.xlane.f32.xlu1 %v5538_v9 }
0x1a73   :  { %v4865_v3 = vpop.xlane.xlu0 %4864 }
0x1a74   :  { %v4866_v27 = vsub.f32 %v4862_v58, %v4865_v3 }
0x1a76   :  { %v4867_v28 = vmul.f32 1.442695, %v4866_v27 }
0x1a77   :  { %v5031_v30 = vpop.xlane.xlu0 %5030 }
0x1a78   :  { %7564 = vpow2.f32 %v4867_v28  ;;  %v5032_v32 = vsub.f32 %v5028_v56, %v5031_v30 }
0x1a7a   :  { %v5033_v33 = vmul.f32 1.442695, %v5032_v32  ;;  %v6578_v32 = vld [vmem:[%s9211_s7 + $0xb8] sm:$0xff] }
0x1a7b   :  { %7434 = vmatprep.subr.mxu0 %v6578_v32 }
0x1a7c   :  { %7566 = vpow2.f32 %v5033_v33  ;;  %v6577_v33 = vld [vmem:[%s9211_s7 + $0xb0] sm:$0xff]  ;;  %7435 = vmatpush3.msra.mxu0 %v6578_v32  ;;  %v6594_v32 = vld [vmem:[%s9213_s9 + $0x138] sm:$0xff] }
0x1a7d   :  { %7436 = vmatprep.subr.mxu0 %v6577_v33 }
0x1a7e   :  { %7437 = vmatpush3.msra.mxu0 %v6577_v33  ;;  %v6593_v33 = vld [vmem:[%s9213_s9 + $0x130] sm:$0xff] }
0x1a7f   :  { %v5373_v34 = vpop.xlane.xlu0 %5372 }
0x1a80   :  { %v5374_v35 = vsub.f32 %v5370_v10, %v5373_v34  ;;  %v4698_v37 = vpop.xlane.xlu1 %4697  ;;  %v6576_v34 = vld [vmem:[%s9211_s7 + $0xa8] sm:$0xff] }
0x1a81   :  { %v4699_v61 = vsub.f32 %v8859_v11, %v4698_v37  ;;  %v6575_v37 = vld [vmem:[%s9211_s7 + $0xa0] sm:$0xff]  ;;  %7438 = vmatprep.subr.mxu0 %v6576_v34 }
0x1a82   :  { %v5375_v38 = vmul.f32 1.442695, %v5374_v35  ;;  %7439 = vmatpush3.msra.mxu0 %v6576_v34  ;;  %v6592_v34 = vld [vmem:[%s9213_s9 + $0x128] sm:$0xff] }
0x1a83   :  { %v4700_v56 = vmul.f32 1.442695, %v4699_v61  ;;  %7440 = vmatprep.subr.mxu0 %v6575_v37 }
0x1a84   :  { %7568 = vpow2.f32 %v5375_v38  ;;  %v5210_v36 = vpop.xlane.xlu1 %5209  ;;  %7441 = vmatpush3.msra.mxu0 %v6575_v37  ;;  %v6590_v37 = vld [vmem:[%s9213_s9 + $0x118] sm:$0xff] }
0x1a85   :  { %v8867_v42 = vpop.eup %7564  ;;  %v5211_v44 = vsub.f32 %v5207_v16, %v5210_v36 }
0x1a86   :  { %v4869_v45 = vsel %vm421_vm3, %v8867_v42, 0.0 }
0x1a87   :  { %v5212_v46 = vmul.f32 1.442695, %v5211_v44  ;;  %4870 = vadd.xlane.f32.xlu0 %v4869_v45  ;;  %v5706_v47 = vpop.xlane.xlu0 %5705  ;;  %v6573_v44 = vld [vmem:[%s9211_s7 + $0x90] sm:$0xff] }
0x1a88   :  { %v5707_v48 = vsub.f32 %v5703_v23, %v5706_v47  ;;  %v5540_v1 = vpop.xlane.xlu1 %5539  ;;  %v6572_v47 = vld [vmem:[%s9211_s7 + $0x88] sm:$0xff] }
0x1a89   :  { %v8871_v49 = vpop.eup %7566  ;;  %7570 = vpow2.f32 %v5212_v46  ;;  %v5541_v50 = vsub.f32 %v5537_v41, %v5540_v1 }
0x1a8a   :  { %v5708_v51 = vmul.f32 1.442695, %v5707_v48  ;;  %v5035_v52 = vsel %vm421_vm3, %v8871_v49, 0.0  ;;  %v6571_v48 = vld [vmem:[%s9211_s7 + $0x80] sm:$0xff] }
0x1a8b   :  { %v5542_v54 = vmul.f32 1.442695, %v5541_v50  ;;  %5036 = vadd.xlane.f32.xlu1 %v5035_v52 }
0x1a8c   :  { %7572 = vpow2.f32 %v5708_v51 }
0x1a8d   :  { %7574 = vpow2.f32 %v5542_v54 }
0x1a8e   :  { %7576 = vpow2.f32 %v4700_v56 }
0x1a91   :  { %v8875_v57 = vpop.eup %7568 }
0x1a92   :  { %v5377_v53 = vsel %vm421_vm3, %v8875_v57, 0.0 }
0x1a93   :  { %5378 = vadd.xlane.f32.xlu1 %v5377_v53 }
0x1a96   :  { %v7571_v55 = vpop.eup %7570 }
0x1a97   :  { %v5214_v43 = vsel %vm421_vm3, %v7571_v55, 0.0 }
0x1a98   :  { %5215 = vadd.xlane.f32.xlu0 %v5214_v43 }
0x1a99   :  { %v8880_v40 = vpop.eup %7572 }
0x1a9a   :  { %v8882_v58 = vpop.eup %7574  ;;  %v5710_v59 = vsel %vm421_vm3, %v8880_v40, 0.0 }
0x1a9b   :  { %5711 = vadd.xlane.f32.xlu1 %v5710_v59  ;;  %v5544_v60 = vsel %vm421_vm3, %v8882_v58, 0.0  ;;  %v7577_v62 = vpop.eup %7576 }
0x1a9c   :  { %5545 = vadd.xlane.f32.xlu0 %v5544_v60  ;;  %v4702_v63 = vsel %vm421_vm3, %v7577_v62, 0.0 }
0x1aac   :  { %4874 = vrot.lane.b32.xlu1 %v8796_v29, %s9255_s2 }
0x1ab2   :  { %4708 = vrot.lane.b32.xlu0 %v8796_v29, %s9254_s26 }
0x1ab6   :  { %5383 = vrot.lane.b32.xlu0 %v8788_v21, %s9254_s26 }
0x1aba   :  { %5715 = vrot.lane.b32.xlu0 %v8788_v21, %s9250_s29 }
0x1ad0   :  { %4703 = vadd.xlane.f32.xlu1 %v4702_v63 }
0x1ae1   :  { %5040 = vrot.lane.b32.xlu1 %v8796_v29, %s9250_s29  ;;  %s9257_s29 = sld [smem:[#allocation8_spill]] }
0x1ae5   :  { %5549 = vrot.lane.b32.xlu1 %v8788_v21, %s9255_s2 }
0x1b10   :  { %v4871_v0 = vpop.xlane.xlu0 %4870 }
0x1b14   :  { %v5037_v10 = vpop.xlane.xlu1 %5036 }
0x1b1c   :  { %v5379_v13 = vpop.xlane.xlu1 %5378 }
0x1b21   :  { %v5216_v4 = vpop.xlane.xlu0 %5215 }
0x1b24   :  { %v5712_v11 = vpop.xlane.xlu1 %5711 }
0x1b25   :  { %v5546_v5 = vpop.xlane.xlu0 %5545 }
0x1b28   :  { %v4875_v12 = vpop.permute.xlu1 %4874 }
0x1b29   :  { %v4709_v7 = vpop.permute.xlu0 %4708 }
0x1b2a   :  { %7370 = vmatpush3.msra.mxu1 %v4709_v7 }
0x1b2b   :  { %7379 = vmatprep.subr.mxu1 %v7600_v26 }
0x1b2d   :  { %v5384_v24 = vpop.permute.xlu0 %5383 }
0x1b31   :  { %v5716_v28 = vpop.permute.xlu0 %5715 }
0x1b59   :  { %v4704_v14 = vpop.xlane.xlu1 %4703 }
0x1b5a   :  { %7578 = vrcp.f32 %v4704_v14 }
0x1b5b   :  { %7580 = vrcp.f32 %v4871_v0 }
0x1b5c   :  { %7582 = vrcp.f32 %v5037_v10 }
0x1b5d   :  { %7584 = vrcp.f32 %v5216_v4  ;;  %v5041_v19 = vpop.permute.xlu1 %5040 }
0x1b5e   :  { %7586 = vrcp.f32 %v5379_v13 }
0x1b5f   :  { %7588 = vrcp.f32 %v5546_v5 }
0x1b60   :  { %7590 = vrcp.f32 %v5712_v11 }
0x1b67   :  { %v7579_v29 = vpop.eup %7578 }
0x1b68   :  { %v4706_v15 = vmul.f32 %v7579_v29, %v7577_v62  ;;  %v7581_v16 = vpop.eup %7580 }
0x1b69   :  { %v4873_v17 = vmul.f32 %v7581_v16, %v8867_v42  ;;  %v7583_v18 = vpop.eup %7582  ;;  %v6574_v42 = vld [vmem:[%s9211_s7 + $0x98] sm:$0xff] }
0x1b6a   :  { %7372 = vmatmul.mubr.msk.f32.vlgmr.msra.gmra.mxu1 %vm421_vm3, %v4706_v15  ;;  %v5039_v41 = vmul.f32 %v7583_v18, %v8871_v49  ;;  %v7585_v20 = vpop.eup %7584  ;;  %7442 = vmatprep.subr.mxu0 %v6574_v42 }
0x1b6b   :  { %7380 = vmatpush3.msra.mxu1 %v4875_v12  ;;  %7381 = vmatprep.mubr.msk.f32.mxu1 %vm7601_vm1, %v7600_v26  ;;  %v5218_v22 = vmul.f32 %v7585_v20, %v7571_v55  ;;  %v7587_v23 = vpop.eup %7586 }
0x1b6c   :  { %7389 = vmatprep.subr.mxu1 %v7600_v26  ;;  %v5381_v25 = vmul.f32 %v7587_v23, %v8875_v57  ;;  %v7589_v9 = vpop.eup %7588  ;;  %7443 = vmatpush3.msra.mxu0 %v6574_v42  ;;  %v6587_v42 = vld [vmem:[%s9213_s9 + $0x100] sm:$0xff] }
0x1b6d   :  { %v5548_v3 = vmul.f32 %v7589_v9, %v8882_v58  ;;  %v7591_v27 = vpop.eup %7590  ;;  %7444 = vmatprep.subr.mxu0 %v6573_v44  ;;  %v6600_v9 = vld [vmem:[%s9213_s9 + $0x168] sm:$0xff] }
0x1b6e   :  { %7382 = vmatmul.mubr.msk.f32.vlgmr.msra.gmra.mxu1 %vm421_vm3, %v4873_v17  ;;  %v5714_v30 = vmul.f32 %v7591_v27, %v8880_v40  ;;  %7445 = vmatpush3.msra.mxu0 %v6573_v44  ;;  %v6597_v27 = vld [vmem:[%s9213_s9 + $0x150] sm:$0xff]  ;;  %v6637_v44 = vld [vmem:[%s9214_s11 + $0x2f8] sm:$0xff] }
0x1b6f   :  { %7390 = vmatpush3.msra.mxu1 %v5041_v19  ;;  %7391 = vmatprep.mubr.msk.f32.mxu1 %vm7601_vm1, %v7600_v26 }
0x1b70   :  { %7399 = vmatprep.subr.mxu1 %v7600_v26  ;;  %7446 = vmatprep.subr.mxu0 %v6572_v47 }
0x1b71   :  { %7447 = vmatpush3.msra.mxu0 %v6572_v47  ;;  %v6620_v47 = vld [vmem:[%s9214_s11 + $0x270] sm:$0xff] }
0x1b72   :  { %7392 = vmatmul.mubr.msk.f32.vlgmr.msra.gmra.mxu1 %vm421_vm3, %v5039_v41  ;;  %7448 = vmatprep.subr.mxu0 %v6571_v48 }
0x1b73   :  { %7400 = vmatpush3.msra.mxu1 %v8788_v21  ;;  %7401 = vmatprep.mubr.msk.f32.mxu1 %vm7601_vm1, %v7600_v26  ;;  %v5550_v21 = vpop.permute.xlu1 %5549 }
0x1b74   :  { %7409 = vmatprep.subr.mxu1 %v7600_v26  ;;  %7449 = vmatpush3.msra.mxu0 %v6571_v48  ;;  %v6635_v48 = vld [vmem:[%s9214_s11 + $0x2e8] sm:$0xff] }
0x1b75   :  { %6938 = vmatprep.subr.mxu0 %v6637_v44 }
0x1b76   :  { %7402 = vmatmul.mubr.msk.f32.vlgmr.msra.gmra.mxu1 %vm421_vm3, %v5218_v22 }
0x1b77   :  { %7410 = vmatpush3.msra.mxu1 %v5384_v24  ;;  %7411 = vmatprep.mubr.msk.f32.mxu1 %vm7601_vm1, %v7600_v26  ;;  %v6602_v24 = vld [vmem:[%s9213_s9 + $0x178] sm:$0xff] }
0x1b78   :  { %7419 = vmatprep.subr.mxu1 %v7600_v26 }
0x1b7a   :  { %7412 = vmatmul.mubr.msk.f32.vlgmr.msra.gmra.mxu1 %vm421_vm3, %v5381_v25  ;;  %v6601_v25 = vld [vmem:[%s9213_s9 + $0x170] sm:$0xff] }
0x1b7b   :  { %7420 = vmatpush3.msra.mxu1 %v5550_v21  ;;  %7421 = vmatprep.mubr.msk.f32.mxu1 %vm7601_vm1, %v7600_v26  ;;  %v6599_v21 = vld [vmem:[%s9213_s9 + $0x160] sm:$0xff] }
0x1b7c   :  { %7429 = vmatprep.subr.mxu1 %v7600_v26 }
0x1b7e   :  { %7422 = vmatmul.mubr.msk.f32.vlgmr.msra.gmra.mxu1 %vm421_vm3, %v5548_v3  ;;  %v6598_v3 = vld [vmem:[%s9213_s9 + $0x158] sm:$0xff] }
0x1b7f   :  { %7430 = vmatpush3.msra.mxu1 %v5716_v28  ;;  %7431 = vmatprep.mubr.msk.f32.mxu1 %vm7601_vm1, %v7600_v26  ;;  %v6596_v28 = vld [vmem:[%s9213_s9 + $0x148] sm:$0xff] }
0x1b80   :  { %6004 = vmatprep.subr.mxu1 %v6602_v24  ;;  %v6607_v24 = vld [vmem:[%s9214_s11 + $0x208] sm:$0xff] }
0x1b82   :  { %7432 = vmatmul.mubr.msk.f32.vlgmr.msra.gmra.mxu1 %vm421_vm3, %v5714_v30  ;;  %v6595_v30 = vld [vmem:[%s9213_s9 + $0x140] sm:$0xff] }
0x1b83   :  { %6052 = vmatprep.mubr.f32.mxu1 %v7600_v26  ;;  %6005 = vmatpush1.msra.mxu1 %v6601_v25  ;;  %v6622_v25 = vld [vmem:[%s9214_s11 + $0x280] sm:$0xff] }
0x1b84   :  { %6006 = vmatprep.subr.mxu1 %v6600_v9  ;;  %v6606_v9 = vld [vmem:[%s9214_s11 + $0x200] sm:$0xff] }
0x1b85   :  { %6007 = vmatpush1.msra.mxu1 %v6599_v21  ;;  %v6603_v21 = vld [vmem:[%s9217_s10 + $0x4] sm:$0x3] }
0x1b86   :  { %6008 = vmatprep.subr.mxu1 %v6598_v3  ;;  %v5975_v3 = vrot.slane %v6603_v21, %v8167_v31  ;;  %v6639_v31 = vld [vmem:[%s9218_s12 + $0x2] ss:$0 sm:$0xff] }
0x1b87   :  { %6009 = vmatpush1.msra.mxu1 %v6597_v27  ;;  %v5979_v27 = vrot.slane %v6603_v21, %v8172_v39 }
0x1b88   :  { %6010 = vmatprep.subr.mxu1 %v6596_v28 }
0x1b89   :  { %6011 = vmatpush1.msra.mxu1 %v6595_v30 }
0x1b8a   :  { %6012 = vmatprep.subr.mxu1 %v6594_v32 }
0x1b8b   :  { %6013 = vmatpush1.msra.mxu1 %v6593_v33 }
0x1b8c   :  { %6014 = vmatprep.subr.mxu1 %v6592_v34 }
0x1c2a   :  { %v4780_v35 = vpop.f32.mrf.mxu1 }
0x1c2b   :  { %5117 = vrot.lane.b32.xlu1 %v4780_v35, %s9251_s27  ;;  %v6591_v35 = vld [vmem:[%s9213_s9 + $0x120] sm:$0xff] }
0x1c2c   :  { %v7373_v38 = vpop.f32.mrf.mxu1  ;;  %6015 = vmatpush1.msra.mxu1 %v6591_v35 }
0x1c2d   :  { %v6589_v38 = vld [vmem:[%s9213_s9 + $0x110] sm:$0xff]  ;;  %6016 = vmatprep.subr.mxu1 %v6590_v37 }
0x1c2e   :  { %v4946_v36 = vpop.f32.mrf.mxu1  ;;  %6017 = vmatpush1.msra.mxu1 %v6589_v38 }
0x1c2f   :  { %5121 = vrot.lane.b32.xlu0 %v4946_v36, %s9252_s28  ;;  %v6588_v36 = vld [vmem:[%s9213_s9 + $0x108] sm:$0xff] }
0x1c30   :  { %v7383_v45 = vpop.f32.mrf.mxu1  ;;  %6018 = vmatprep.subr.mxu1 %v6588_v36 }
0x1c31   :  { %6019 = vmatpush1.msra.mxu1 %v6587_v42  ;;  %v6621_v45 = vld [vmem:[%s9214_s11 + $0x278] sm:$0xff] }
0x1c32   :  { %v5112_v46 = vpop.f32.mrf.mxu1  ;;  %7453 = vmatprep.subr.mxu1 %v7600_v26 }
0x1c33   :  { %5125 = vrot.lane.b32.xlu0 %v5112_v46, %s9253_s25  ;;  %v6636_v46 = vld [vmem:[%s9214_s11 + $0x2f0] sm:$0xff] }
0x1c34   :  { %v7393_v1 = vpop.f32.mrf.mxu1 }
0x1c35   :  { %v6619_v1 = vld [vmem:[%s9214_s11 + $0x268] sm:$0xff] }
0x1c36   :  { %v5288_v49 = vpop.f32.mrf.mxu1 }
0x1c38   :  { %v7403_v50 = vpop.f32.mrf.mxu1 }
0x1c39   :  { %v6618_v50 = vld [vmem:[%s9214_s11 + $0x260] sm:$0xff] }
0x1c3a   :  { %v5455_v51 = vpop.f32.mrf.mxu1 }
0x1c3b   :  { %5792 = vrot.lane.b32.xlu1 %v5455_v51, %s9251_s27  ;;  %v6633_v51 = vld [vmem:[%s9214_s11 + $0x2d8] sm:$0xff] }
0x1c3c   :  { %v7413_v52 = vpop.f32.mrf.mxu1 }
0x1c3d   :  { %v6617_v52 = vld [vmem:[%s9214_s11 + $0x258] sm:$0xff] }
0x1c3e   :  { %v5621_v54 = vpop.f32.mrf.mxu1 }
0x1c3f   :  { %5796 = vrot.lane.b32.xlu1 %v5621_v54, %s9252_s28  ;;  %v6632_v54 = vld [vmem:[%s9214_s11 + $0x2d0] sm:$0xff]  ;;  %s9256_s28 = sld [smem:[#allocation7_spill]] }
0x1c40   :  { %v7423_v57 = vpop.f32.mrf.mxu1 }
0x1c41   :  { %v6616_v57 = vld [vmem:[%s9214_s11 + $0x250] sm:$0xff] }
0x1c42   :  { %v5787_v53 = vpop.f32.mrf.mxu1 }
0x1c43   :  { %5800 = vrot.lane.b32.xlu0 %v5787_v53, %s9253_s25  ;;  %v6631_v53 = vld [vmem:[%s9214_s11 + $0x2c8] sm:$0xff] }
0x1c44   :  { %v7433_v55 = vpop.f32.mrf.mxu1 }
0x1c45   :  { %v6615_v55 = vld [vmem:[%s9214_s11 + $0x248] sm:$0xff] }
0x1c9d   :  { %v5118_v43 = vpop.permute.xlu1 %5117 }
0x1c9e   :  { %v5128_v58 = vsel %vm343_vm2, %v8857_v2, %v5118_v43  ;;  %v6580_v2 = vld [vmem:[%s9212_s8 + $0x2] ss:$0 sm:$0xff] }
0x1c9f   :  { %v6630_v43 = vld [vmem:[%s9214_s11 + $0x2c0] sm:$0xff] }
0x1ca1   :  { %v5122_v40 = vpop.permute.xlu0 %5121 }
0x1ca2   :  { %v5129_v59 = vsel %vm1018_vm4, %v5128_v58, %v5122_v40  ;;  %v6614_v40 = vld [vmem:[%s9214_s11 + $0x240] sm:$0xff]  ;;  %v6629_v58 = vld [vmem:[%s9214_s11 + $0x2b8] sm:$0xff] }
0x1ca5   :  { %v5126_v60 = vpop.permute.xlu0 %5125 }
0x1ca6   :  { %v5130_v61 = vsel %vm1020_vm5, %v5129_v59, %v5126_v60  ;;  %v6613_v59 = vld [vmem:[%s9214_s11 + $0x238] sm:$0xff]  ;;  %v6628_v60 = vld [vmem:[%s9214_s11 + $0x2b0] sm:$0xff] }
0x1ca7   :  { %7450 = vmatprep.mubr.msk.f32.mxu0 %vm81_vm0, %v5130_v61  ;;  %v6612_v61 = vld [vmem:[%s9214_s11 + $0x230] sm:$0xff] }
0x1cad   :  { %v5793_v56 = vpop.permute.xlu1 %5792 }
0x1cae   :  { %v5803_v63 = vsel %vm343_vm2, %v5288_v49, %v5793_v56  ;;  %v6634_v49 = vld [vmem:[%s9214_s11 + $0x2e0] sm:$0xff]  ;;  %v6627_v56 = vld [vmem:[%s9214_s11 + $0x2a8] sm:$0xff] }
0x1cb1   :  { %v5797_v62 = vpop.permute.xlu1 %5796 }
0x1cb2   :  { %v5804_v0 = vsel %vm1018_vm4, %v5803_v63, %v5797_v62  ;;  %v6611_v62 = vld [vmem:[%s9214_s11 + $0x228] sm:$0xff]  ;;  %v6626_v63 = vld [vmem:[%s9214_s11 + $0x2a0] sm:$0xff] }
0x1cb5   :  { %v5801_v4 = vpop.permute.xlu0 %5800 }
0x1cb6   :  { %v5805_v5 = vsel %vm1020_vm5, %v5804_v0, %v5801_v4  ;;  %v6610_v0 = vld [vmem:[%s9214_s11 + $0x220] sm:$0xff] }
0x1cb7   :  { %7451 = vmatmul.mubr.msk.f32.vlgmr.msra.gmra.mxu0 %vm81_vm0, %v5805_v5 }
0x1cb8   :  { %6939 = vmatpush3.msra.mxu0 %v6621_v45 }
0x1cb9   :  { %6940 = vmatprep.subr.mxu0 %v6636_v46 }
0x1cba   :  { %6941 = vmatpush3.msra.mxu0 %v6620_v47 }
0x1cbb   :  { %6942 = vmatprep.subr.mxu0 %v6635_v48 }
0x1cbc   :  { %6943 = vmatpush3.msra.mxu0 %v6619_v1 }
0x1cbd   :  { %6944 = vmatprep.subr.mxu0 %v6634_v49 }
0x1cbe   :  { %6945 = vmatpush3.msra.mxu0 %v6618_v50 }
0x1cbf   :  { %6946 = vmatprep.subr.mxu0 %v6633_v51 }
0x1cc0   :  { %6947 = vmatpush3.msra.mxu0 %v6617_v52 }
0x1cc1   :  { %6948 = vmatprep.subr.mxu0 %v6632_v54 }
0x1cc2   :  { %6949 = vmatpush3.msra.mxu0 %v6616_v57 }
0x1cc3   :  { %6950 = vmatprep.subr.mxu0 %v6631_v53 }
0x1cc4   :  { %6951 = vmatpush3.msra.mxu0 %v6615_v55 }
0x1cc5   :  { %6952 = vmatprep.subr.mxu0 %v6630_v43 }
0x1cc6   :  { %6953 = vmatpush3.msra.mxu0 %v6614_v40 }
0x1cc7   :  { %6954 = vmatprep.subr.mxu0 %v6629_v58 }
0x1cc8   :  { %6955 = vmatpush3.msra.mxu0 %v6613_v59 }
0x1cc9   :  { %6956 = vmatprep.subr.mxu0 %v6628_v60 }
0x1cca   :  { %6957 = vmatpush3.msra.mxu0 %v6612_v61 }
0x1ccb   :  { %6958 = vmatprep.subr.mxu0 %v6627_v56 }
0x1ccc   :  { %6959 = vmatpush3.msra.mxu0 %v6611_v62 }
0x1ccd   :  { %6960 = vmatprep.subr.mxu0 %v6626_v63 }
0x1cce   :  { %6961 = vmatpush3.msra.mxu0 %v6610_v0  ;;  %v6248_v0 = vld [vmem:[%s9221_s17 + $0x38] sm:$0xff] }
0x1d77   :  { %v7452_v7 = vpop.f32.mrf.mxu0 }
0x1d78   :  { %v5901_v10 = vadd.f32 %v7452_v7, %v6580_v2 }
0x1d79   :  { %v5895_v13 = vpop.f32.mrf.mxu0 }
0x1d7a   :  { %v5905_v11 = vadd.f32 %v5901_v10, %v8744_v8  ;;  %v5896_v12 = vadd.f32 %v6580_v2, %v5895_v13 }
0x1d7c   :  { %v5904_v14 = vadd.f32 %v5896_v12, %v8738_v6  ;;  %v5913_v29 = vsel %vm81_vm0, %v5905_v11, 0.0 }
0x1d7d   :  { %5914 = vadd.xlane.f32.xlu0 %v5913_v29 }
0x1d7e   :  { %v5910_v15 = vsel %vm81_vm0, %v5904_v14, 0.0 }
0x1d7f   :  { %5911 = vadd.xlane.f32.xlu1 %v5910_v15  ;;  %v6585_v15 = vld [vmem:[%s9215_s13 + $0x2] ss:$0 sm:$0xff] }
0x1e06   :  { %v5915_v16 = vpop.xlane.xlu0 %5914 }
0x1e07   :  { %v5917_v17 = vmul.f32 0.015625, %v5915_v16 }
0x1e08   :  { %v5912_v18 = vpop.xlane.xlu1 %5911 }
0x1e09   :  { %v8980_v19 = vsub.f32 %v5905_v11, %v5917_v17  ;;  %v5916_v41 = vmul.f32 0.015625, %v5912_v18  ;;  %v6586_v17 = vld [vmem:[%s9216_s14 + $0x2] ss:$0 sm:$0xff] }
0x1e0b   :  { %v8982_v20 = vsub.f32 %v5904_v14, %v5916_v41  ;;  %v5921_v8 = vmul.f32 %v8980_v19, %v8980_v19 }
0x1e0d   :  { %v5925_v22 = vsel %vm81_vm0, %v5921_v8, 0.0  ;;  %v5920_v6 = vmul.f32 %v8982_v20, %v8982_v20 }
0x1e0e   :  { %5926 = vadd.xlane.f32.xlu1 %v5925_v22  ;;  %v6624_v22 = vld [vmem:[%s9214_s11 + $0x290] sm:$0xff] }
0x1e0f   :  { %v5922_v23 = vsel %vm81_vm0, %v5920_v6, 0.0  ;;  %v6608_v6 = vld [vmem:[%s9214_s11 + $0x210] sm:$0xff] }
0x1e10   :  { %5923 = vadd.xlane.f32.xlu0 %v5922_v23  ;;  %v6623_v23 = vld [vmem:[%s9214_s11 + $0x288] sm:$0xff] }
0x1e97   :  { %v5927_v4 = vpop.xlane.xlu1 %5926 }
0x1e98   :  { %v5929_v5 = vmul.f32 0.015625, %v5927_v4  ;;  %v6247_v4 = vld [vmem:[%s9221_s17 + $0x30] sm:$0xff] }
0x1e99   :  { %v5924_v2 = vpop.xlane.xlu0 %5923 }
0x1e9a   :  { %v5931_v7 = vadd.f32 1e-05, %v5929_v5  ;;  %v5928_v10 = vmul.f32 0.015625, %v5924_v2  ;;  %v6246_v5 = vld [vmem:[%s9221_s17 + $0x28] sm:$0xff]  ;;  %v6245_v2 = vld [vmem:[%s9221_s17 + $0x20] sm:$0xff] }
0x1e9c   :  { %7592 = vrsqrt.f32 %v5931_v7  ;;  %v5930_v13 = vadd.f32 1e-05, %v5928_v10  ;;  %v6244_v7 = vld [vmem:[%s9221_s17 + $0x18] sm:$0xff]  ;;  %v6243_v10 = vld [vmem:[%s9221_s17 + $0x10] sm:$0xff] }
0x1e9e   :  { %7594 = vrsqrt.f32 %v5930_v13  ;;  %v6242_v13 = vld [vmem:[%s9221_s17 + $0x8] sm:$0xff] }
0x1ea9   :  { %v7593_v11 = vpop.eup %7592 }
0x1eaa   :  { %v5935_v29 = vmul.f32 %v7593_v11, %v8980_v19  ;;  %v6625_v19 = vld [vmem:[%s9214_s11 + $0x298] sm:$0xff]  ;;  %v6241_v11 = vld [vmem:[%s9221_s17] sm:$0xff] }
0x1eab   :  { %v7595_v12 = vpop.eup %7594  ;;  %6962 = vmatprep.subr.mxu0 %v6625_v19 }
0x1eac   :  { %v5934_v14 = vmul.f32 %v7595_v12, %v8982_v20  ;;  %v5943_v41 = vmul.f32 %v6585_v15, %v5935_v29  ;;  %v6609_v20 = vld [vmem:[%s9214_s11 + $0x218] sm:$0xff]  ;;  %v24_v12 = vstv %s9256_s28 }
0x1ead   :  { %6963 = vmatpush3.msra.mxu0 %v6609_v20  ;;  %25 = vst [vmem:[#allocation2] sm:$0x1] %v24_v12 }
0x1eae   :  { %v5942_v16 = vmul.f32 %v6585_v15, %v5934_v14  ;;  %v5951_v8 = vadd.f32 %v6586_v17, %v5943_v41  ;;  %6964 = vmatprep.subr.mxu0 %v6624_v22  ;;  %v6643_v22 = vld [vmem:[%s9220_s16 + $0x2] ss:$0 sm:$0xff] }
0x1eaf   :  { %6965 = vmatpush3.msra.mxu0 %v6608_v6 }
0x1eb0   :  { %v5950_v18 = vadd.f32 %v6586_v17, %v5942_v16  ;;  %6966 = vmatprep.subr.mxu0 %v6623_v23 }
0x1eb1   :  { %6967 = vmatpush3.msra.mxu0 %v6607_v24 }
0x1eb2   :  { %6604 = vmatmul.mubr.msk.f32.vlgmr.msra.gmra.mxu1 %vm81_vm0, %v5950_v18  ;;  %6968 = vmatprep.subr.mxu0 %v6622_v25 }
0x1eb3   :  { %6058 = vmatprep.mubr.f32.mxu1 %v7600_v26  ;;  %6969 = vmatpush3.msra.mxu0 %v6606_v9 }
0x1eb4   :  { %7454 = vmatpush3.msra.mxu1 %v6248_v0 }
0x1eb5   :  { %7455 = vmatprep.subr.mxu1 %v7600_v26 }
0x1eb6   :  { %6605 = vmatmul.mubr.msk.f32.gmra.mxu1 %vm81_vm0, %v5951_v8 }
0x1eb7   :  { %7469 = vmatprep.mubr.msk.f32.mxu1 %vm7601_vm1, %v7600_v26  ;;  %7456 = vmatpush3.msra.mxu1 %v6247_v4 }
0x1eb8   :  { %7457 = vmatprep.subr.mxu1 %v7600_v26 }
0x1eb9   :  { %7458 = vmatpush3.msra.mxu1 %v6246_v5 }
0x1eba   :  { %7459 = vmatprep.subr.mxu1 %v7600_v26 }
0x1ebb   :  { %7460 = vmatpush3.msra.mxu1 %v6245_v2 }
0x1ebc   :  { %7461 = vmatprep.subr.mxu1 %v7600_v26 }
0x1ebd   :  { %7462 = vmatpush3.msra.mxu1 %v6244_v7 }
0x1ebe   :  { %7463 = vmatprep.subr.mxu1 %v7600_v26 }
0x1ebf   :  { %7464 = vmatpush3.msra.mxu1 %v6243_v10 }
0x1ec0   :  { %7465 = vmatprep.subr.mxu1 %v7600_v26 }
0x1ec1   :  { %7466 = vmatpush3.msra.mxu1 %v6242_v13 }
0x1ec2   :  { %7467 = vmatprep.subr.mxu1 %v7600_v26 }
0x1ec3   :  { %7468 = vmatpush3.msra.mxu1 %v6241_v11 }
0x1f72   :  { %v6054_v28 = vpop.f32.mrf.mxu1 }
0x1f73   :  { %v6055_v30 = vadd.f32 %v6054_v28, %v5975_v3 }
0x1f74   :  { %v6056_v32 = vpop.f32.mrf.mxu1 }
0x1f75   :  { %v6057_v33 = vadd.f32 %v6056_v32, %v5979_v27  ;;  %v6065_v37 = vmax.f32 %v6055_v30, 0.0 }
0x1f76   :  { %v6060_v34 = vpop.f32.mrf.mxu1 }
0x1f77   :  { %v6066_v35 = vmax.f32 %v6057_v33, 0.0  ;;  %v6061_v38 = vadd.f32 %v6060_v34, %v5975_v3 }
0x1f78   :  { %v6062_v36 = vpop.f32.mrf.mxu1 }
0x1f79   :  { %v6063_v42 = vadd.f32 %v6062_v36, %v5979_v27  ;;  %6174 = vmatprep.mubr.f32.mxu0 %v6066_v35  ;;  %v6067_v45 = vmax.f32 %v6061_v38, 0.0  ;;  %v6644_v27 = vld [vmem:[#allocation2] ss:$0 sm:$0xff] }
0x1f7a   :  { %6175 = vmatmul.mubr.f32.vlgmr.msra.gmra.mxu0 %v6065_v37 }
0x1f7b   :  { %v6068_v44 = vmax.f32 %v6063_v42, 0.0 }
0x1f7d   :  { %6179 = vmatprep.mubr.f32.mxu0 %v6068_v44 }
0x1f7e   :  { %6180 = vmatmul.mubr.f32.gmra.mxu0 %v6067_v45 }
0x203a   :  { %v6970_v46 = vpop.f32.mrf.mxu0 }
0x203c   :  { %v6971_v39 = vpop.f32.mrf.mxu0 }
0x203d   :  { %v6972_v47 = vadd.f32 %v6971_v39, %v6970_v46 }
0x203e   :  { %v6973_v48 = vpop.f32.mrf.mxu0 }
0x203f   :  { %v6177_v1 = vadd.f32 %v6972_v47, %v6639_v31 }
0x2040   :  { %v6974_v49 = vpop.f32.mrf.mxu0 }
0x2041   :  { %v6975_v50 = vadd.f32 %v6974_v49, %v6973_v48  ;;  %v6185_v51 = vadd.f32 %v6177_v1, %v5950_v18 }
0x2043   :  { %v6182_v52 = vadd.f32 %v6975_v50, %v6639_v31  ;;  %v6191_v54 = vsel %vm81_vm0, %v6185_v51, 0.0 }
0x2044   :  { %6192 = vadd.xlane.f32.xlu0 %v6191_v54 }
0x2045   :  { %v6186_v57 = vadd.f32 %v6182_v52, %v5951_v8  ;;  %v6642_v8 = vld [vmem:[%s9219_s15 + $0x2] ss:$0 sm:$0xff] }
0x2047   :  { %v6194_v53 = vsel %vm81_vm0, %v6186_v57, 0.0 }
0x2048   :  { %6195 = vadd.xlane.f32.xlu1 %v6194_v53 }
0x20cd   :  { %v6193_v55 = vpop.xlane.xlu0 %6192 }
0x20ce   :  { %v6197_v43 = vmul.f32 0.015625, %v6193_v55 }
0x20d0   :  { %v6199_v40 = vsub.f32 %v6185_v51, %v6197_v43 }
0x20d1   :  { %v6196_v58 = vpop.xlane.xlu1 %6195 }
0x20d2   :  { %v6198_v59 = vmul.f32 0.015625, %v6196_v58  ;;  %v6201_v60 = vmul.f32 %v6199_v40, %v6199_v40 }
0x20d4   :  { %v6200_v61 = vsub.f32 %v6186_v57, %v6198_v59  ;;  %v6203_v56 = vsel %vm81_vm0, %v6201_v60, 0.0 }
0x20d5   :  { %6204 = vadd.xlane.f32.xlu0 %v6203_v56 }
0x20d6   :  { %v6202_v62 = vmul.f32 %v6200_v61, %v6200_v61 }
0x20d8   :  { %v6206_v63 = vsel %vm81_vm0, %v6202_v62, 0.0 }
0x20d9   :  { %6207 = vadd.xlane.f32.xlu1 %v6206_v63 }
0x215e   :  { %v6205_v14 = vpop.xlane.xlu0 %6204 }
0x215f   :  { %v6209_v29 = vmul.f32 0.015625, %v6205_v14 }
0x2161   :  { %v6211_v15 = vadd.f32 1e-05, %v6209_v29 }
0x2162   :  { %v6208_v16 = vpop.xlane.xlu1 %6207 }
0x2163   :  { %7596 = vrsqrt.f32 %v6211_v15  ;;  %v6210_v17 = vmul.f32 0.015625, %v6208_v16 }
0x2165   :  { %v6212_v18 = vadd.f32 1e-05, %v6210_v17 }
0x2167   :  { %7598 = vrsqrt.f32 %v6212_v18 }
0x2170   :  { %v7597_v41 = vpop.eup %7596 }
0x2171   :  { %v6215_v26 = vmul.f32 %v7597_v41, %v6199_v40 }
0x2173   :  { %v6223_v19 = vmul.f32 %v6642_v8, %v6215_v26 }
0x2174   :  { %v7599_v20 = vpop.eup %7598 }
0x2175   :  { %v6216_v6 = vmul.f32 %v7599_v20, %v6200_v61  ;;  %v6231_v24 = vadd.f32 %v6643_v22, %v6223_v19 }
0x2177   :  { %v6224_v23 = vmul.f32 %v6642_v8, %v6216_v6  ;;  %v6234_v9 = vrot.slane %v6231_v24, 7 }
0x2179   :  { %v6232_v25 = vadd.f32 %v6643_v22, %v6224_v23 }
0x217b   :  { %v6237_v21 = vrot.slane %v6232_v25, 6 }
0x217d   :  { %v6240_v3 = vsel %vm6239_vm6, %v6234_v9, %v6237_v21 }
0x217e   :  { %7470 = vmatmul.mubr.msk.f32.vlgmr.msra.gmra.mxu1 %vm81_vm0, %v6240_v3 }
0x223e   :  { %v6325_v28 = vpop.f32.mrf.mxu1 }
0x223f   :  { %v6326_v30 = vadd.f32 %v6644_v27, %v6325_v28 }
0x2240   :  { %v7471_v32 = vpop.f32.mrf.mxu1 }
0x2241   :  { %6330 = vst.msk [vmem:[%s9257_s29] sm:$0x3] %vm6329_vm7, %v6326_v30 }

</bundles_post_ra>
